<compile_context>
chip_gen: v7x
topology: tpu7x:2x2x1
jax: 0.10.0
libtpu: 0.0.40
codegen_flags: <defaults>
</compile_context>

<pallas_src>
import numpy as np
import jax
import jax.numpy as jnp
from jax import lax
from jax.experimental import pallas as pl
from jax.experimental.pallas import tpu as pltpu


# --------------------------------------------------------------------------
# Kernel
# --------------------------------------------------------------------------
def avsubnet_kernel(x_ref, len_ref,
                    w1_ref, b1_ref, whh1_ref,
                    gamma_ref, beta_ref,
                    w2_ref, b2_ref, whh2_ref,
                    out_ref,
                    gates_scr, h1_scr):
    T, Bb, Dp = x_ref.shape
    H = whh1_ref.shape[0] // 2
    G8 = 8 * H
    unroll_amt = True if T <= 32 else 4

    lengths = len_ref[...]                              # (Bb, 1) int32

    # Hoisted, loop-invariant lane masks (interleaved-by-direction gate layout).
    lane8 = lax.broadcasted_iota(jnp.int32, (Bb, G8), 1)
    fwd8 = (lane8 % (2 * H)) < H                        # lane belongs to fwd dir
    lane2 = lax.broadcasted_iota(jnp.int32, (Bb, 2 * H), 1)
    fwd2 = lane2 < H

    # ---- hoisted input path: Linear (dropout = identity) folded into the
    # ---- layer-1 input-gate projection -> ONE big MXU matmul.
    x2d = x_ref[...].reshape(T * Bb, Dp).astype(jnp.bfloat16)
    g1 = jnp.dot(x2d, w1_ref[...], preferred_element_type=jnp.float32) + b1_ref[...]
    gates_scr[...] = g1.reshape(T, Bb, G8).astype(jnp.bfloat16)

    zeros2 = jnp.zeros((Bb, 2 * H), jnp.float32)

    def make_body(whh_bf16, store_layer1):
        def body(k, carry):
            h_cat, c_cat = carry                        # (Bb, 2H) f32 each
            tf = k
            tb = T - 1 - k
            # fwd lanes come from time tf, bwd lanes from time tb.
            # (This load + select does not depend on the carry -> off the
            #  serial dependency chain, scheduler can prefetch it.)
            gx = jnp.where(fwd8, gates_scr[tf], gates_scr[tb])        # bf16 (Bb, 8H)
            # single block-diagonal hh matmul for BOTH directions (bf16 MXU, f32 acc)
            hh = jnp.dot(h_cat.astype(jnp.bfloat16), whh_bf16,
                         preferred_element_type=jnp.float32)          # (Bb, 8H)
            gates = gx.astype(jnp.float32) + hh
            # lane-dense activations: gate layout is [i(2H) | f(2H) | g(2H) | o(2H)]
            sg = jax.nn.sigmoid(gates)
            i = sg[:, 0:2 * H]
            f = sg[:, 2 * H:4 * H]
            g = jnp.tanh(gates[:, 4 * H:6 * H])
            o = sg[:, 6 * H:8 * H]
            c_new = f * c_cat + i * g
            h_new = o * jnp.tanh(c_new)
            # one validity mask per step, reused for h, c and the scratch store
            t_vec = jnp.where(fwd2, tf, tb)                           # (Bb, 2H) int32
            valid = t_vec < lengths                                   # (Bb, 2H) bool
            h_cat = jnp.where(valid, h_new, h_cat)
            c_cat = jnp.where(valid, c_new, c_cat)
            if store_layer1:
                h_out = jnp.where(valid, h_new, 0.0)
                h1_scr[tf, :, 0:H] = h_out[:, 0:H]          # fwd output at time tf
                h1_scr[tb, :, H:2 * H] = h_out[:, H:2 * H]   # bwd output at time tb
            return h_cat, c_cat
        return body

    # ---------------- LSTM layer 1 (fused fwd+bwd recurrence) ----------------
    whh1 = whh1_ref[...]
    h1_fin, _ = lax.fori_loop(0, T, make_body(whh1, True),
                              (zeros2, zeros2), unroll=unroll_amt)

    # ------- batched LayerNorm + hoisted layer-2 gate projection -------------
    h1 = h1_scr[...]                                         # (T, Bb, 2H) f32
    mean = jnp.mean(h1, axis=-1, keepdims=True)
    var = jnp.mean((h1 - mean) ** 2, axis=-1, keepdims=True)
    nh1 = (h1 - mean) * lax.rsqrt(var + 1e-5) * gamma_ref[...] + beta_ref[...]
    g2 = jnp.dot(nh1.reshape(T * Bb, 2 * H).astype(jnp.bfloat16), w2_ref[...],
                 preferred_element_type=jnp.float32) + b2_ref[...]
    gates_scr[...] = g2.reshape(T, Bb, G8).astype(jnp.bfloat16)   # reuse scratch

    # ---------------- LSTM layer 2 (fused fwd+bwd recurrence) ----------------
    whh2 = whh2_ref[...]
    h2_fin, _ = lax.fori_loop(0, T, make_body(whh2, False),
                              (zeros2, zeros2), unroll=unroll_amt)

    # single lane-dense (Bb, 4H=128) store: [h1_fwd | h2_fwd | h1_bwd | h2_bwd]
    out_ref[...] = jnp.concatenate(
        [h1_fin[:, :H], h2_fin[:, :H], h1_fin[:, H:], h2_fin[:, H:]], axis=-1)


# --------------------------------------------------------------------------
# Wrapper: weight fusion / padding / pallas_call
# --------------------------------------------------------------------------
def _interleave_gates(wf, wb):
    """cols [i|f|g|o] per dir -> [i_f,i_b, f_f,f_b, g_f,g_b, o_f,o_b]."""
    H = wf.shape[-1] // 4
    parts = []
    for g in range(4):
        parts.append(wf[..., g * H:(g + 1) * H])
        parts.append(wb[..., g * H:(g + 1) * H])
    return jnp.concatenate(parts, axis=-1)


def _blockdiag_hh(whh_f, whh_b):
    """(H,4H)x2 -> (2H,8H) block-diagonal with interleaved gate columns."""
    z = jnp.zeros_like(whh_f)
    top = _interleave_gates(whh_f, z)        # rows fed by h_fwd
    bot = _interleave_gates(z, whh_b)        # rows fed by h_bwd
    return jnp.concatenate([top, bot], axis=0)


def avsubnet_forward(sequence, lengths, params):
    """sequence: (B, T, D_in) float32 (batch-first); lengths: (B,) int."""
    B, T, D_in = sequence.shape
    H = params["w_hh1f"].shape[0]
    f32, bf16 = jnp.float32, jnp.bfloat16

    # Batch tile: multiple of 8 sublanes; bigger tiles on v5e/v6e (128 MiB VMEM,
    # single TC), capped at 64 on v7x (64 MiB VMEM, 2 TCs sharded via 'parallel').
    try:
        kind = jax.devices()[0].device_kind.lower()
    except Exception:  # pragma: no cover
        kind = ""
    cap = 64 if ("v7" in kind or "7x" in kind) else 128
    bB = min(cap, ((B + 7) // 8) * 8)
    Bp = ((B + bB - 1) // bB) * bB

    # Pad D_in to a multiple of 32 (zero columns; matching zero rows in W1).
    Dp = ((D_in + 31) // 32) * 32
    x = jnp.zeros((Bp, T, Dp), f32).at[:B, :, :D_in].set(sequence.astype(f32))
    lens = jnp.zeros((Bp,), jnp.int32).at[:B].set(lengths.astype(jnp.int32))
    x_tm = jnp.transpose(x, (1, 0, 2))                # time-major (T, Bp, Dp)
    len2d = lens.reshape(Bp, 1)

    # Fold Linear into layer-1 gates: x@(w_l@w_ih1) + (b_l@w_ih1 + b1).
    w1f = params["w_l"] @ params["w_ih1f"]
    w1b = params["w_l"] @ params["w_ih1b"]
    b1f = params["b_l"] @ params["w_ih1f"] + params["b1f"]
    b1b = params["b_l"] @ params["w_ih1b"] + params["b1b"]
    w1 = (jnp.zeros((Dp, 8 * H), f32)
          .at[:D_in].set(_interleave_gates(w1f, w1b))).astype(bf16)
    b1 = _interleave_gates(b1f, b1b).astype(f32)

    w2 = _interleave_gates(params["w_ih2f"], params["w_ih2b"]).astype(bf16)
    b2 = _interleave_gates(params["b2f"], params["b2b"]).astype(f32)
    whh1 = _blockdiag_hh(params["w_hh1f"], params["w_hh1b"]).astype(bf16)
    whh2 = _blockdiag_hh(params["w_hh2f"], params["w_hh2b"]).astype(bf16)
    gamma = params["gamma"].astype(f32)
    beta = params["beta"].astype(f32)

    weights = [w1, b1, whh1, gamma, beta, w2, b2, whh2]

    in_specs = ([pl.BlockSpec((T, bB, Dp), lambda b: (0, b, 0)),
                 pl.BlockSpec((bB, 1), lambda b: (b, 0))]
                + [pl.BlockSpec(w.shape, lambda b: (0, 0)) for w in weights])

    # Scoped-VMEM limit sized from the actual footprint (v5e default is 16 MiB).
    scratch_bytes = T * bB * 8 * H * 2 + T * bB * 2 * H * 4
    io_bytes = 2 * (T * bB * Dp * 4) + 2 * (bB * 4 * H * 4) + 2 * (bB * 4)
    w_bytes = sum(int(np.prod(w.shape)) * w.dtype.itemsize for w in weights)
    vmem_limit = int(min(max(2 * (scratch_bytes + io_bytes + w_bytes) + (4 << 20),
                             32 << 20), 64 << 20))

    grid_spec = pltpu.PrefetchScalarGridSpec(
        num_scalar_prefetch=0,
        grid=(Bp // bB,),
        in_specs=in_specs,
        out_specs=pl.BlockSpec((bB, 4 * H), lambda b: (b, 0)),
        scratch_shapes=[
            pltpu.VMEM((T, bB, 8 * H), jnp.bfloat16),   # shared gate scratch (layer 1 & 2)
            pltpu.VMEM((T, bB, 2 * H), jnp.float32),    # layer-1 outputs [fwd | bwd]
        ],
    )

    out = pl.pallas_call(
        avsubnet_kernel,
        out_shape=jax.ShapeDtypeStruct((Bp, 4 * H), jnp.float32),
        grid_spec=grid_spec,
        compiler_params=pltpu.CompilerParams(
            dimension_semantics=("parallel",),
            vmem_limit_bytes=vmem_limit),
    )(x_tm, len2d, *weights)
    return out[:B]


# --------------------------------------------------------------------------
# Pure-JAX reference (same masked-packed-LSTM semantics, raw f32 weights)
# --------------------------------------------------------------------------
def reference_forward(sequence, lengths, p):
    B, T, _ = sequence.shape
    H = p["w_hh1f"].shape[0]
    lens = lengths.reshape(B, 1)
    x = sequence.astype(jnp.float32)
    lin = x @ p["w_l"] + p["b_l"]                                    # (B, T, H)

    def cell(xt, h, c, wih, whh, b):
        g = xt @ wih + h @ whh + b
        i = jax.nn.sigmoid(g[:, :H])
        f = jax.nn.sigmoid(g[:, H:2 * H])
        gg = jnp.tanh(g[:, 2 * H:3 * H])
        o = jax.nn.sigmoid(g[:, 3 * H:])
        c2 = f * c + i * gg
        return o * jnp.tanh(c2), c2

    def run_dir(xs, wih, whh, b, reverse):
        h = jnp.zeros((B, H), jnp.float32)
        c = jnp.zeros((B, H), jnp.float32)
        outs = [None] * T
        order = range(T - 1, -1, -1) if reverse else range(T)
        for t in order:
            h2, c2 = cell(xs[:, t], h, c, wih, whh, b)
            valid = t < lens
            h = jnp.where(valid, h2, h)
            c = jnp.where(valid, c2, c)
            outs[t] = jnp.where(valid, h2, 0.0)
        return jnp.stack(outs, axis=1), h

    o1f, hf1 = run_dir(lin, p["w_ih1f"], p["w_hh1f"], p["b1f"], False)
    o1b, hb1 = run_dir(lin, p["w_ih1b"], p["w_hh1b"], p["b1b"], True)
    h1 = jnp.concatenate([o1f, o1b], axis=-1)
    mean = h1.mean(-1, keepdims=True)
    var = ((h1 - mean) ** 2).mean(-1, keepdims=True)
    nh1 = (h1 - mean) / jnp.sqrt(var + 1e-5) * p["gamma"] + p["beta"]
    _, hf2 = run_dir(nh1, p["w_ih2f"], p["w_hh2f"], p["b2f"], False)
    _, hb2 = run_dir(nh1, p["w_ih2b"], p["w_hh2b"], p["b2b"], True)
    # matches torch.cat((final_h1, final_h2), 2).permute(1,0,2).view(B, -1)
    return jnp.concatenate([hf1, hf2, hb1, hb2], axis=-1)


if __name__ == "__main__":
    B, T, D_IN, H = 2, 8, 20, 32

    key = jax.random.PRNGKey(0)
    ks = jax.random.split(key, 20)

    def nrm(k, shape, scale=0.1):
        return (scale * jax.random.normal(k, shape)).astype(jnp.float32)

    params = {
        "w_l":    nrm(ks[0], (D_IN, H)),
        "b_l":    nrm(ks[1], (1, H)),
        # LSTM1 (input H -> hidden H), fused bias = b_ih + b_hh, gate order i,f,g,o
        "w_ih1f": nrm(ks[2], (H, 4 * H)),
        "w_hh1f": nrm(ks[3], (H, 4 * H)),
        "b1f":    nrm(ks[4], (1, 4 * H)),
        "w_ih1b": nrm(ks[5], (H, 4 * H)),
        "w_hh1b": nrm(ks[6], (H, 4 * H)),
        "b1b":    nrm(ks[7], (1, 4 * H)),
        # LayerNorm over 2H
        "gamma":  (1.0 + 0.1 * jax.random.normal(ks[8], (1, 2 * H))).astype(jnp.float32),
        "beta":   nrm(ks[9], (1, 2 * H)),
        # LSTM2 (input 2H -> hidden H)
        "w_ih2f": nrm(ks[10], (2 * H, 4 * H)),
        "w_hh2f": nrm(ks[11], (H, 4 * H)),
        "b2f":    nrm(ks[12], (1, 4 * H)),
        "w_ih2b": nrm(ks[13], (2 * H, 4 * H)),
        "w_hh2b": nrm(ks[14], (H, 4 * H)),
        "b2b":    nrm(ks[15], (1, 4 * H)),
    }

    sequence = jax.random.normal(ks[16], (B, T, D_IN), dtype=jnp.float32)
    lengths = jnp.array([8, 5], dtype=jnp.int32)      # per-sequence valid lengths

    out = avsubnet_forward(sequence, lengths, params)
    out = jax.block_until_ready(out)

    ref = reference_forward(sequence, lengths, params)
    assert out.shape == (B, 4 * H), out.shape
    # bf16 gate storage / bf16 MXU inputs (f32 accumulation) -> bf16-appropriate tolerance
    np.testing.assert_allclose(np.asarray(out), np.asarray(ref), atol=2e-2, rtol=2e-2)

    print("KERNEL_OK")
</pallas_src>

<mosaic_0001>
module attributes {stable_mosaic.version = 11 : i64} {
  func.func @avsubnet_kernel(%arg0: i32, %arg1: memref<8x8x32xf32, #tpu.memory_space<vmem>>, %arg2: memref<8x1xi32, #tpu.memory_space<vmem>>, %arg3: memref<32x256xbf16, #tpu.memory_space<vmem>>, %arg4: memref<1x256xf32, #tpu.memory_space<vmem>>, %arg5: memref<64x256xbf16, #tpu.memory_space<vmem>>, %arg6: memref<1x64xf32, #tpu.memory_space<vmem>>, %arg7: memref<1x64xf32, #tpu.memory_space<vmem>>, %arg8: memref<64x256xbf16, #tpu.memory_space<vmem>>, %arg9: memref<1x256xf32, #tpu.memory_space<vmem>>, %arg10: memref<64x256xbf16, #tpu.memory_space<vmem>>, %arg11: memref<8x128xf32, #tpu.memory_space<vmem>>, %arg12: memref<8x8x256xbf16, #tpu.memory_space<vmem>>, %arg13: memref<8x8x64xf32, #tpu.memory_space<vmem>>) attributes {dimension_semantics = [#tpu.dimension_semantics<parallel>], iteration_bounds = array<i64: 1>, scalar_prefetch = 0 : i64, scratch_operands = 2 : i64, tpu.core_type = #tpu.core_type<tc>, window_params = [{transform_indices = @transform_0, window_bounds = array<i64: 8, 8, 32>}, {transform_indices = @transform_1, window_bounds = array<i64: 8, 1>}, {pipeline_mode = #tpu.pipeline_mode<synchronous>, transform_indices = @transform_2, window_bounds = array<i64: 32, 256>}, {pipeline_mode = #tpu.pipeline_mode<synchronous>, transform_indices = @transform_3, window_bounds = array<i64: 1, 256>}, {pipeline_mode = #tpu.pipeline_mode<synchronous>, transform_indices = @transform_4, window_bounds = array<i64: 64, 256>}, {pipeline_mode = #tpu.pipeline_mode<synchronous>, transform_indices = @transform_5, window_bounds = array<i64: 1, 64>}, {pipeline_mode = #tpu.pipeline_mode<synchronous>, transform_indices = @transform_6, window_bounds = array<i64: 1, 64>}, {pipeline_mode = #tpu.pipeline_mode<synchronous>, transform_indices = @transform_7, window_bounds = array<i64: 64, 256>}, {pipeline_mode = #tpu.pipeline_mode<synchronous>, transform_indices = @transform_8, window_bounds = array<i64: 1, 256>}, {pipeline_mode = #tpu.pipeline_mode<synchronous>, transform_indices = @transform_9, window_bounds = array<i64: 64, 256>}, {transform_indices = @transform_10, window_bounds = array<i64: 8, 128>}]} {
    %c0 = arith.constant 0 : index
    %c0_0 = arith.constant 0 : index
    %0 = vector.load %arg2[%c0, %c0_0] : memref<8x1xi32, #tpu.memory_space<vmem>>, vector<8x1xi32>
    %1 = tpu.iota {dimensions = array<i32: 1>} : vector<8x256xi32>
    %c64_i32 = arith.constant 64 : i32
    %c0_i32 = arith.constant 0 : i32
    %2 = arith.cmpi eq, %c64_i32, %c0_i32 : i32
    %c1_i32 = arith.constant 1 : i32
    %3 = arith.select %2, %c1_i32, %c64_i32 : i32
    %4 = vector.broadcast %3 : i32 to vector<8x256xi32>
    %5 = arith.remsi %1, %4 : vector<8x256xi32>
    %c0_i32_1 = arith.constant 0 : i32
    %6 = vector.broadcast %c0_i32_1 : i32 to vector<8x256xi32>
    %7 = arith.cmpi ne, %5, %6 : vector<8x256xi32>
    %c0_i32_2 = arith.constant 0 : i32
    %8 = vector.broadcast %c0_i32_2 : i32 to vector<8x256xi32>
    %9 = arith.cmpi slt, %5, %8 : vector<8x256xi32>
    %c0_i32_3 = arith.constant 0 : i32
    %10 = arith.cmpi slt, %3, %c0_i32_3 : i32
    %11 = vector.broadcast %10 : i1 to vector<8x256xi1>
    %12 = vector.broadcast %11 : vector<8x256xi1> to vector<8x256xi1>
    %13 = arith.xori %9, %12 : vector<8x256xi1>
    %14 = arith.andi %13, %7 : vector<8x256xi1>
    %15 = vector.broadcast %3 : i32 to vector<8x256xi32>
    %16 = arith.addi %5, %15 : vector<8x256xi32>
    %17 = arith.select %14, %16, %5 : vector<8x256xi1>, vector<8x256xi32>
    %c32_i32 = arith.constant 32 : i32
    %18 = vector.broadcast %c32_i32 : i32 to vector<8x256xi32>
    %19 = arith.cmpi slt, %17, %18 : vector<8x256xi32>
    %20 = tpu.iota {dimensions = array<i32: 1>} : vector<8x64xi32>
    %c32_i32_4 = arith.constant 32 : i32
    %21 = vector.broadcast %c32_i32_4 : i32 to vector<8x64xi32>
    %22 = arith.cmpi slt, %20, %21 : vector<8x64xi32>
    %c0_5 = arith.constant 0 : index
    %c0_6 = arith.constant 0 : index
    %c0_7 = arith.constant 0 : index
    %23 = vector.load %arg1[%c0_5, %c0_6, %c0_7] : memref<8x8x32xf32, #tpu.memory_space<vmem>>, vector<8x8x32xf32>
    %24 = vector.shape_cast %23 : vector<8x8x32xf32> to vector<64x32xf32>
    %25 = arith.truncf %24 : vector<64x32xf32> to vector<64x32xbf16>
    %c0_8 = arith.constant 0 : index
    %c0_9 = arith.constant 0 : index
    %26 = vector.load %arg3[%c0_8, %c0_9] : memref<32x256xbf16, #tpu.memory_space<vmem>>, vector<32x256xbf16>
    %cst = arith.constant dense<0.000000e+00> : vector<64x256xf32>
    %27 = tpu.matmul %25, %26, %cst {dimension_numbers = #tpu.dot_dimension_numbers<[1], [0], [0], [1], [0, 0, 1, 1], [], []>} : vector<64x32xbf16>, vector<32x256xbf16>, vector<64x256xf32> -> vector<64x256xf32>
    %c0_10 = arith.constant 0 : index
    %c0_11 = arith.constant 0 : index
    %28 = vector.load %arg4[%c0_10, %c0_11] : memref<1x256xf32, #tpu.memory_space<vmem>>, vector<1x256xf32>
    %29 = vector.broadcast %28 : vector<1x256xf32> to vector<64x256xf32>
    %30 = arith.addf %27, %29 : vector<64x256xf32>
    %31 = vector.shape_cast %30 : vector<64x256xf32> to vector<8x8x256xf32>
    %32 = arith.truncf %31 : vector<8x8x256xf32> to vector<8x8x256xbf16>
    %c0_12 = arith.constant 0 : index
    %c0_13 = arith.constant 0 : index
    %c0_14 = arith.constant 0 : index
    %33 = vector.load %arg12[%c0_12, %c0_13, %c0_14] : memref<8x8x256xbf16, #tpu.memory_space<vmem>>, vector<8x8x256xbf16>
    tpu.vector_store %arg12[%c0_12, %c0_13, %c0_14], %32 {strides = array<i32>} : memref<8x8x256xbf16, #tpu.memory_space<vmem>>, vector<8x8x256xbf16>,
    %cst_15 = arith.constant 0.000000e+00 : f32
    %34 = vector.broadcast %cst_15 : f32 to vector<8x64xf32>
    %c0_16 = arith.constant 0 : index
    %c0_17 = arith.constant 0 : index
    %35 = vector.load %arg5[%c0_16, %c0_17] : memref<64x256xbf16, #tpu.memory_space<vmem>>, vector<64x256xbf16>
    %c0_i32_18 = arith.constant 0 : i32
    %c7_i32 = arith.constant 7 : i32
    %36 = arith.subi %c7_i32, %c0_i32_18 : i32
    %37 = arith.index_cast %c0_i32_18 : i32 to index
    %c0_19 = arith.constant 0 : index
    %c0_20 = arith.constant 0 : index
    %38 = vector.load %arg12[%37, %c0_19, %c0_20] : memref<8x8x256xbf16, #tpu.memory_space<vmem>>, vector<1x8x256xbf16>
    %39 = vector.shape_cast %38 : vector<1x8x256xbf16> to vector<8x256xbf16>
    %40 = arith.index_cast %36 : i32 to index
    %c0_21 = arith.constant 0 : index
    %c0_22 = arith.constant 0 : index
    %41 = vector.load %arg12[%40, %c0_21, %c0_22] : memref<8x8x256xbf16, #tpu.memory_space<vmem>>, vector<1x8x256xbf16>
    %42 = vector.shape_cast %41 : vector<1x8x256xbf16> to vector<8x256xbf16>
    %43 = arith.select %19, %39, %42 : vector<8x256xi1>, vector<8x256xbf16>
    %44 = arith.truncf %34 : vector<8x64xf32> to vector<8x64xbf16>
    %cst_23 = arith.constant dense<0.000000e+00> : vector<8x256xf32>
    %45 = tpu.matmul %44, %35, %cst_23 {dimension_numbers = #tpu.dot_dimension_numbers<[1], [0], [0], [1], [0, 0, 1, 1], [], []>} : vector<8x64xbf16>, vector<64x256xbf16>, vector<8x256xf32> -> vector<8x256xf32>
    %46 = arith.extf %43 : vector<8x256xbf16> to vector<8x256xf32>
    %47 = arith.addf %46, %45 : vector<8x256xf32>
    %48 = arith.negf %47 : vector<8x256xf32>
    %49 = math.exp %48 : vector<8x256xf32>
    %cst_24 = arith.constant 1.000000e+00 : f32
    %50 = vector.broadcast %cst_24 : f32 to vector<8x256xf32>
    %51 = arith.addf %50, %49 : vector<8x256xf32>
    %52 = arith.divf %50, %51 : vector<8x256xf32>
    %53 = vector.extract_strided_slice %52 {offsets = [0, 0], sizes = [8, 64], strides = [1, 1]} : vector<8x256xf32> to vector<8x64xf32>
    %54 = vector.extract_strided_slice %52 {offsets = [0, 64], sizes = [8, 64], strides = [1, 1]} : vector<8x256xf32> to vector<8x64xf32>
    %55 = vector.extract_strided_slice %47 {offsets = [0, 128], sizes = [8, 64], strides = [1, 1]} : vector<8x256xf32> to vector<8x64xf32>
    %56 = math.tanh %55 : vector<8x64xf32>
    %57 = vector.extract_strided_slice %52 {offsets = [0, 192], sizes = [8, 64], strides = [1, 1]} : vector<8x256xf32> to vector<8x64xf32>
    %58 = arith.mulf %54, %34 : vector<8x64xf32>
    %59 = arith.mulf %53, %56 : vector<8x64xf32>
    %60 = arith.addf %58, %59 : vector<8x64xf32>
    %61 = math.tanh %60 : vector<8x64xf32>
    %62 = arith.mulf %57, %61 : vector<8x64xf32>
    %63 = vector.broadcast %c0_i32_18 : i32 to vector<8x64xi32>
    %64 = vector.broadcast %36 : i32 to vector<8x64xi32>
    %65 = arith.select %22, %63, %64 : vector<8x64xi1>, vector<8x64xi32>
    %66 = vector.broadcast %0 : vector<8x1xi32> to vector<8x64xi32>
    %67 = arith.cmpi slt, %65, %66 : vector<8x64xi32>
    %68 = arith.select %67, %62, %34 : vector<8x64xi1>, vector<8x64xf32>
    %69 = arith.select %67, %60, %34 : vector<8x64xi1>, vector<8x64xf32>
    %cst_25 = arith.constant 0.000000e+00 : f32
    %70 = vector.broadcast %cst_25 : f32 to vector<8x64xf32>
    %71 = arith.select %67, %62, %70 : vector<8x64xi1>, vector<8x64xf32>
    %72 = vector.extract_strided_slice %71 {offsets = [0, 0], sizes = [8, 32], strides = [1, 1]} : vector<8x64xf32> to vector<8x32xf32>
    %73 = arith.index_cast %c0_i32_18 : i32 to index
    %c0_26 = arith.constant 0 : index
    %c0_27 = arith.constant 0 : index
    %74 = vector.load %arg13[%73, %c0_26, %c0_27] : memref<8x8x64xf32, #tpu.memory_space<vmem>>, vector<1x8x32xf32>
    %75 = vector.shape_cast %74 : vector<1x8x32xf32> to vector<8x32xf32>
    %76 = vector.shape_cast %72 : vector<8x32xf32> to vector<1x8x32xf32>
    tpu.vector_store %arg13[%73, %c0_26, %c0_27], %76 {strides = array<i32>} : memref<8x8x64xf32, #tpu.memory_space<vmem>>, vector<1x8x32xf32>,
    %77 = vector.extract_strided_slice %71 {offsets = [0, 32], sizes = [8, 32], strides = [1, 1]} : vector<8x64xf32> to vector<8x32xf32>
    %78 = arith.index_cast %36 : i32 to index
    %c0_28 = arith.constant 0 : index
    %c32 = arith.constant 32 : index
    %79 = vector.load %arg13[%78, %c0_28, %c32] : memref<8x8x64xf32, #tpu.memory_space<vmem>>, vector<1x8x32xf32>
    %80 = vector.shape_cast %79 : vector<1x8x32xf32> to vector<8x32xf32>
    %81 = vector.shape_cast %77 : vector<8x32xf32> to vector<1x8x32xf32>
    tpu.vector_store %arg13[%78, %c0_28, %c32], %81 {strides = array<i32>} : memref<8x8x64xf32, #tpu.memory_space<vmem>>, vector<1x8x32xf32>,
    %c1_i32_29 = arith.constant 1 : i32
    %c7_i32_30 = arith.constant 7 : i32
    %82 = arith.subi %c7_i32_30, %c1_i32_29 : i32
    %83 = arith.index_cast %c1_i32_29 : i32 to index
    %c0_31 = arith.constant 0 : index
    %c0_32 = arith.constant 0 : index
    %84 = vector.load %arg12[%83, %c0_31, %c0_32] : memref<8x8x256xbf16, #tpu.memory_space<vmem>>, vector<1x8x256xbf16>
    %85 = vector.shape_cast %84 : vector<1x8x256xbf16> to vector<8x256xbf16>
    %86 = arith.index_cast %82 : i32 to index
    %c0_33 = arith.constant 0 : index
    %c0_34 = arith.constant 0 : index
    %87 = vector.load %arg12[%86, %c0_33, %c0_34] : memref<8x8x256xbf16, #tpu.memory_space<vmem>>, vector<1x8x256xbf16>
    %88 = vector.shape_cast %87 : vector<1x8x256xbf16> to vector<8x256xbf16>
    %89 = arith.select %19, %85, %88 : vector<8x256xi1>, vector<8x256xbf16>
    %90 = arith.truncf %68 : vector<8x64xf32> to vector<8x64xbf16>
    %cst_35 = arith.constant dense<0.000000e+00> : vector<8x256xf32>
    %91 = tpu.matmul %90, %35, %cst_35 {dimension_numbers = #tpu.dot_dimension_numbers<[1], [0], [0], [1], [0, 0, 1, 1], [], []>} : vector<8x64xbf16>, vector<64x256xbf16>, vector<8x256xf32> -> vector<8x256xf32>
    %92 = arith.extf %89 : vector<8x256xbf16> to vector<8x256xf32>
    %93 = arith.addf %92, %91 : vector<8x256xf32>
    %94 = arith.negf %93 : vector<8x256xf32>
    %95 = math.exp %94 : vector<8x256xf32>
    %cst_36 = arith.constant 1.000000e+00 : f32
    %96 = vector.broadcast %cst_36 : f32 to vector<8x256xf32>
    %97 = arith.addf %96, %95 : vector<8x256xf32>
    %98 = arith.divf %96, %97 : vector<8x256xf32>
    %99 = vector.extract_strided_slice %98 {offsets = [0, 0], sizes = [8, 64], strides = [1, 1]} : vector<8x256xf32> to vector<8x64xf32>
    %100 = vector.extract_strided_slice %98 {offsets = [0, 64], sizes = [8, 64], strides = [1, 1]} : vector<8x256xf32> to vector<8x64xf32>
    %101 = vector.extract_strided_slice %93 {offsets = [0, 128], sizes = [8, 64], strides = [1, 1]} : vector<8x256xf32> to vector<8x64xf32>
    %102 = math.tanh %101 : vector<8x64xf32>
    %103 = vector.extract_strided_slice %98 {offsets = [0, 192], sizes = [8, 64], strides = [1, 1]} : vector<8x256xf32> to vector<8x64xf32>
    %104 = arith.mulf %100, %69 : vector<8x64xf32>
    %105 = arith.mulf %99, %102 : vector<8x64xf32>
    %106 = arith.addf %104, %105 : vector<8x64xf32>
    %107 = math.tanh %106 : vector<8x64xf32>
    %108 = arith.mulf %103, %107 : vector<8x64xf32>
    %109 = vector.broadcast %c1_i32_29 : i32 to vector<8x64xi32>
    %110 = vector.broadcast %82 : i32 to vector<8x64xi32>
    %111 = arith.select %22, %109, %110 : vector<8x64xi1>, vector<8x64xi32>
    %112 = vector.broadcast %0 : vector<8x1xi32> to vector<8x64xi32>
    %113 = arith.cmpi slt, %111, %112 : vector<8x64xi32>
    %114 = arith.select %113, %108, %68 : vector<8x64xi1>, vector<8x64xf32>
    %115 = arith.select %113, %106, %69 : vector<8x64xi1>, vector<8x64xf32>
    %cst_37 = arith.constant 0.000000e+00 : f32
    %116 = vector.broadcast %cst_37 : f32 to vector<8x64xf32>
    %117 = arith.select %113, %108, %116 : vector<8x64xi1>, vector<8x64xf32>
    %118 = vector.extract_strided_slice %117 {offsets = [0, 0], sizes = [8, 32], strides = [1, 1]} : vector<8x64xf32> to vector<8x32xf32>
    %119 = arith.index_cast %c1_i32_29 : i32 to index
    %c0_38 = arith.constant 0 : index
    %c0_39 = arith.constant 0 : index
    %120 = vector.load %arg13[%119, %c0_38, %c0_39] : memref<8x8x64xf32, #tpu.memory_space<vmem>>, vector<1x8x32xf32>
    %121 = vector.shape_cast %120 : vector<1x8x32xf32> to vector<8x32xf32>
    %122 = vector.shape_cast %118 : vector<8x32xf32> to vector<1x8x32xf32>
    tpu.vector_store %arg13[%119, %c0_38, %c0_39], %122 {strides = array<i32>} : memref<8x8x64xf32, #tpu.memory_space<vmem>>, vector<1x8x32xf32>,
    %123 = vector.extract_strided_slice %117 {offsets = [0, 32], sizes = [8, 32], strides = [1, 1]} : vector<8x64xf32> to vector<8x32xf32>
    %124 = arith.index_cast %82 : i32 to index
    %c0_40 = arith.constant 0 : index
    %c32_41 = arith.constant 32 : index
    %125 = vector.load %arg13[%124, %c0_40, %c32_41] : memref<8x8x64xf32, #tpu.memory_space<vmem>>, vector<1x8x32xf32>
    %126 = vector.shape_cast %125 : vector<1x8x32xf32> to vector<8x32xf32>
    %127 = vector.shape_cast %123 : vector<8x32xf32> to vector<1x8x32xf32>
    tpu.vector_store %arg13[%124, %c0_40, %c32_41], %127 {strides = array<i32>} : memref<8x8x64xf32, #tpu.memory_space<vmem>>, vector<1x8x32xf32>,
    %c2_i32 = arith.constant 2 : i32
    %c7_i32_42 = arith.constant 7 : i32
    %128 = arith.subi %c7_i32_42, %c2_i32 : i32
    %129 = arith.index_cast %c2_i32 : i32 to index
    %c0_43 = arith.constant 0 : index
    %c0_44 = arith.constant 0 : index
    %130 = vector.load %arg12[%129, %c0_43, %c0_44] : memref<8x8x256xbf16, #tpu.memory_space<vmem>>, vector<1x8x256xbf16>
    %131 = vector.shape_cast %130 : vector<1x8x256xbf16> to vector<8x256xbf16>
    %132 = arith.index_cast %128 : i32 to index
    %c0_45 = arith.constant 0 : index
    %c0_46 = arith.constant 0 : index
    %133 = vector.load %arg12[%132, %c0_45, %c0_46] : memref<8x8x256xbf16, #tpu.memory_space<vmem>>, vector<1x8x256xbf16>
    %134 = vector.shape_cast %133 : vector<1x8x256xbf16> to vector<8x256xbf16>
    %135 = arith.select %19, %131, %134 : vector<8x256xi1>, vector<8x256xbf16>
    %136 = arith.truncf %114 : vector<8x64xf32> to vector<8x64xbf16>
    %cst_47 = arith.constant dense<0.000000e+00> : vector<8x256xf32>
    %137 = tpu.matmul %136, %35, %cst_47 {dimension_numbers = #tpu.dot_dimension_numbers<[1], [0], [0], [1], [0, 0, 1, 1], [], []>} : vector<8x64xbf16>, vector<64x256xbf16>, vector<8x256xf32> -> vector<8x256xf32>
    %138 = arith.extf %135 : vector<8x256xbf16> to vector<8x256xf32>
    %139 = arith.addf %138, %137 : vector<8x256xf32>
    %140 = arith.negf %139 : vector<8x256xf32>
    %141 = math.exp %140 : vector<8x256xf32>
    %cst_48 = arith.constant 1.000000e+00 : f32
    %142 = vector.broadcast %cst_48 : f32 to vector<8x256xf32>
    %143 = arith.addf %142, %141 : vector<8x256xf32>
    %144 = arith.divf %142, %143 : vector<8x256xf32>
    %145 = vector.extract_strided_slice %144 {offsets = [0, 0], sizes = [8, 64], strides = [1, 1]} : vector<8x256xf32> to vector<8x64xf32>
    %146 = vector.extract_strided_slice %144 {offsets = [0, 64], sizes = [8, 64], strides = [1, 1]} : vector<8x256xf32> to vector<8x64xf32>
    %147 = vector.extract_strided_slice %139 {offsets = [0, 128], sizes = [8, 64], strides = [1, 1]} : vector<8x256xf32> to vector<8x64xf32>
    %148 = math.tanh %147 : vector<8x64xf32>
    %149 = vector.extract_strided_slice %144 {offsets = [0, 192], sizes = [8, 64], strides = [1, 1]} : vector<8x256xf32> to vector<8x64xf32>
    %150 = arith.mulf %146, %115 : vector<8x64xf32>
    %151 = arith.mulf %145, %148 : vector<8x64xf32>
    %152 = arith.addf %150, %151 : vector<8x64xf32>
    %153 = math.tanh %152 : vector<8x64xf32>
    %154 = arith.mulf %149, %153 : vector<8x64xf32>
    %155 = vector.broadcast %c2_i32 : i32 to vector<8x64xi32>
    %156 = vector.broadcast %128 : i32 to vector<8x64xi32>
    %157 = arith.select %22, %155, %156 : vector<8x64xi1>, vector<8x64xi32>
    %158 = vector.broadcast %0 : vector<8x1xi32> to vector<8x64xi32>
    %159 = arith.cmpi slt, %157, %158 : vector<8x64xi32>
    %160 = arith.select %159, %154, %114 : vector<8x64xi1>, vector<8x64xf32>
    %161 = arith.select %159, %152, %115 : vector<8x64xi1>, vector<8x64xf32>
    %cst_49 = arith.constant 0.000000e+00 : f32
    %162 = vector.broadcast %cst_49 : f32 to vector<8x64xf32>
    %163 = arith.select %159, %154, %162 : vector<8x64xi1>, vector<8x64xf32>
    %164 = vector.extract_strided_slice %163 {offsets = [0, 0], sizes = [8, 32], strides = [1, 1]} : vector<8x64xf32> to vector<8x32xf32>
    %165 = arith.index_cast %c2_i32 : i32 to index
    %c0_50 = arith.constant 0 : index
    %c0_51 = arith.constant 0 : index
    %166 = vector.load %arg13[%165, %c0_50, %c0_51] : memref<8x8x64xf32, #tpu.memory_space<vmem>>, vector<1x8x32xf32>
    %167 = vector.shape_cast %166 : vector<1x8x32xf32> to vector<8x32xf32>
    %168 = vector.shape_cast %164 : vector<8x32xf32> to vector<1x8x32xf32>
    tpu.vector_store %arg13[%165, %c0_50, %c0_51], %168 {strides = array<i32>} : memref<8x8x64xf32, #tpu.memory_space<vmem>>, vector<1x8x32xf32>,
    %169 = vector.extract_strided_slice %163 {offsets = [0, 32], sizes = [8, 32], strides = [1, 1]} : vector<8x64xf32> to vector<8x32xf32>
    %170 = arith.index_cast %128 : i32 to index
    %c0_52 = arith.constant 0 : index
    %c32_53 = arith.constant 32 : index
    %171 = vector.load %arg13[%170, %c0_52, %c32_53] : memref<8x8x64xf32, #tpu.memory_space<vmem>>, vector<1x8x32xf32>
    %172 = vector.shape_cast %171 : vector<1x8x32xf32> to vector<8x32xf32>
    %173 = vector.shape_cast %169 : vector<8x32xf32> to vector<1x8x32xf32>
    tpu.vector_store %arg13[%170, %c0_52, %c32_53], %173 {strides = array<i32>} : memref<8x8x64xf32, #tpu.memory_space<vmem>>, vector<1x8x32xf32>,
    %c3_i32 = arith.constant 3 : i32
    %c7_i32_54 = arith.constant 7 : i32
    %174 = arith.subi %c7_i32_54, %c3_i32 : i32
    %175 = arith.index_cast %c3_i32 : i32 to index
    %c0_55 = arith.constant 0 : index
    %c0_56 = arith.constant 0 : index
    %176 = vector.load %arg12[%175, %c0_55, %c0_56] : memref<8x8x256xbf16, #tpu.memory_space<vmem>>, vector<1x8x256xbf16>
    %177 = vector.shape_cast %176 : vector<1x8x256xbf16> to vector<8x256xbf16>
    %178 = arith.index_cast %174 : i32 to index
    %c0_57 = arith.constant 0 : index
    %c0_58 = arith.constant 0 : index
    %179 = vector.load %arg12[%178, %c0_57, %c0_58] : memref<8x8x256xbf16, #tpu.memory_space<vmem>>, vector<1x8x256xbf16>
    %180 = vector.shape_cast %179 : vector<1x8x256xbf16> to vector<8x256xbf16>
    %181 = arith.select %19, %177, %180 : vector<8x256xi1>, vector<8x256xbf16>
    %182 = arith.truncf %160 : vector<8x64xf32> to vector<8x64xbf16>
    %cst_59 = arith.constant dense<0.000000e+00> : vector<8x256xf32>
    %183 = tpu.matmul %182, %35, %cst_59 {dimension_numbers = #tpu.dot_dimension_numbers<[1], [0], [0], [1], [0, 0, 1, 1], [], []>} : vector<8x64xbf16>, vector<64x256xbf16>, vector<8x256xf32> -> vector<8x256xf32>
    %184 = arith.extf %181 : vector<8x256xbf16> to vector<8x256xf32>
    %185 = arith.addf %184, %183 : vector<8x256xf32>
    %186 = arith.negf %185 : vector<8x256xf32>
    %187 = math.exp %186 : vector<8x256xf32>
    %cst_60 = arith.constant 1.000000e+00 : f32
    %188 = vector.broadcast %cst_60 : f32 to vector<8x256xf32>
    %189 = arith.addf %188, %187 : vector<8x256xf32>
    %190 = arith.divf %188, %189 : vector<8x256xf32>
    %191 = vector.extract_strided_slice %190 {offsets = [0, 0], sizes = [8, 64], strides = [1, 1]} : vector<8x256xf32> to vector<8x64xf32>
    %192 = vector.extract_strided_slice %190 {offsets = [0, 64], sizes = [8, 64], strides = [1, 1]} : vector<8x256xf32> to vector<8x64xf32>
    %193 = vector.extract_strided_slice %185 {offsets = [0, 128], sizes = [8, 64], strides = [1, 1]} : vector<8x256xf32> to vector<8x64xf32>
    %194 = math.tanh %193 : vector<8x64xf32>
    %195 = vector.extract_strided_slice %190 {offsets = [0, 192], sizes = [8, 64], strides = [1, 1]} : vector<8x256xf32> to vector<8x64xf32>
    %196 = arith.mulf %192, %161 : vector<8x64xf32>
    %197 = arith.mulf %191, %194 : vector<8x64xf32>
    %198 = arith.addf %196, %197 : vector<8x64xf32>
    %199 = math.tanh %198 : vector<8x64xf32>
    %200 = arith.mulf %195, %199 : vector<8x64xf32>
    %201 = vector.broadcast %c3_i32 : i32 to vector<8x64xi32>
    %202 = vector.broadcast %174 : i32 to vector<8x64xi32>
    %203 = arith.select %22, %201, %202 : vector<8x64xi1>, vector<8x64xi32>
    %204 = vector.broadcast %0 : vector<8x1xi32> to vector<8x64xi32>
    %205 = arith.cmpi slt, %203, %204 : vector<8x64xi32>
    %206 = arith.select %205, %200, %160 : vector<8x64xi1>, vector<8x64xf32>
    %207 = arith.select %205, %198, %161 : vector<8x64xi1>, vector<8x64xf32>
    %cst_61 = arith.constant 0.000000e+00 : f32
    %208 = vector.broadcast %cst_61 : f32 to vector<8x64xf32>
    %209 = arith.select %205, %200, %208 : vector<8x64xi1>, vector<8x64xf32>
    %210 = vector.extract_strided_slice %209 {offsets = [0, 0], sizes = [8, 32], strides = [1, 1]} : vector<8x64xf32> to vector<8x32xf32>
    %211 = arith.index_cast %c3_i32 : i32 to index
    %c0_62 = arith.constant 0 : index
    %c0_63 = arith.constant 0 : index
    %212 = vector.load %arg13[%211, %c0_62, %c0_63] : memref<8x8x64xf32, #tpu.memory_space<vmem>>, vector<1x8x32xf32>
    %213 = vector.shape_cast %212 : vector<1x8x32xf32> to vector<8x32xf32>
    %214 = vector.shape_cast %210 : vector<8x32xf32> to vector<1x8x32xf32>
    tpu.vector_store %arg13[%211, %c0_62, %c0_63], %214 {strides = array<i32>} : memref<8x8x64xf32, #tpu.memory_space<vmem>>, vector<1x8x32xf32>,
    %215 = vector.extract_strided_slice %209 {offsets = [0, 32], sizes = [8, 32], strides = [1, 1]} : vector<8x64xf32> to vector<8x32xf32>
    %216 = arith.index_cast %174 : i32 to index
    %c0_64 = arith.constant 0 : index
    %c32_65 = arith.constant 32 : index
    %217 = vector.load %arg13[%216, %c0_64, %c32_65] : memref<8x8x64xf32, #tpu.memory_space<vmem>>, vector<1x8x32xf32>
    %218 = vector.shape_cast %217 : vector<1x8x32xf32> to vector<8x32xf32>
    %219 = vector.shape_cast %215 : vector<8x32xf32> to vector<1x8x32xf32>
    tpu.vector_store %arg13[%216, %c0_64, %c32_65], %219 {strides = array<i32>} : memref<8x8x64xf32, #tpu.memory_space<vmem>>, vector<1x8x32xf32>,
    %c4_i32 = arith.constant 4 : i32
    %c7_i32_66 = arith.constant 7 : i32
    %220 = arith.subi %c7_i32_66, %c4_i32 : i32
    %221 = arith.index_cast %c4_i32 : i32 to index
    %c0_67 = arith.constant 0 : index
    %c0_68 = arith.constant 0 : index
    %222 = vector.load %arg12[%221, %c0_67, %c0_68] : memref<8x8x256xbf16, #tpu.memory_space<vmem>>, vector<1x8x256xbf16>
    %223 = vector.shape_cast %222 : vector<1x8x256xbf16> to vector<8x256xbf16>
    %224 = arith.index_cast %220 : i32 to index
    %c0_69 = arith.constant 0 : index
    %c0_70 = arith.constant 0 : index
    %225 = vector.load %arg12[%224, %c0_69, %c0_70] : memref<8x8x256xbf16, #tpu.memory_space<vmem>>, vector<1x8x256xbf16>
    %226 = vector.shape_cast %225 : vector<1x8x256xbf16> to vector<8x256xbf16>
    %227 = arith.select %19, %223, %226 : vector<8x256xi1>, vector<8x256xbf16>
    %228 = arith.truncf %206 : vector<8x64xf32> to vector<8x64xbf16>
    %cst_71 = arith.constant dense<0.000000e+00> : vector<8x256xf32>
    %229 = tpu.matmul %228, %35, %cst_71 {dimension_numbers = #tpu.dot_dimension_numbers<[1], [0], [0], [1], [0, 0, 1, 1], [], []>} : vector<8x64xbf16>, vector<64x256xbf16>, vector<8x256xf32> -> vector<8x256xf32>
    %230 = arith.extf %227 : vector<8x256xbf16> to vector<8x256xf32>
    %231 = arith.addf %230, %229 : vector<8x256xf32>
    %232 = arith.negf %231 : vector<8x256xf32>
    %233 = math.exp %232 : vector<8x256xf32>
    %cst_72 = arith.constant 1.000000e+00 : f32
    %234 = vector.broadcast %cst_72 : f32 to vector<8x256xf32>
    %235 = arith.addf %234, %233 : vector<8x256xf32>
    %236 = arith.divf %234, %235 : vector<8x256xf32>
    %237 = vector.extract_strided_slice %236 {offsets = [0, 0], sizes = [8, 64], strides = [1, 1]} : vector<8x256xf32> to vector<8x64xf32>
    %238 = vector.extract_strided_slice %236 {offsets = [0, 64], sizes = [8, 64], strides = [1, 1]} : vector<8x256xf32> to vector<8x64xf32>
    %239 = vector.extract_strided_slice %231 {offsets = [0, 128], sizes = [8, 64], strides = [1, 1]} : vector<8x256xf32> to vector<8x64xf32>
    %240 = math.tanh %239 : vector<8x64xf32>
    %241 = vector.extract_strided_slice %236 {offsets = [0, 192], sizes = [8, 64], strides = [1, 1]} : vector<8x256xf32> to vector<8x64xf32>
    %242 = arith.mulf %238, %207 : vector<8x64xf32>
    %243 = arith.mulf %237, %240 : vector<8x64xf32>
    %244 = arith.addf %242, %243 : vector<8x64xf32>
    %245 = math.tanh %244 : vector<8x64xf32>
    %246 = arith.mulf %241, %245 : vector<8x64xf32>
    %247 = vector.broadcast %c4_i32 : i32 to vector<8x64xi32>
    %248 = vector.broadcast %220 : i32 to vector<8x64xi32>
    %249 = arith.select %22, %247, %248 : vector<8x64xi1>, vector<8x64xi32>
    %250 = vector.broadcast %0 : vector<8x1xi32> to vector<8x64xi32>
    %251 = arith.cmpi slt, %249, %250 : vector<8x64xi32>
    %252 = arith.select %251, %246, %206 : vector<8x64xi1>, vector<8x64xf32>
    %253 = arith.select %251, %244, %207 : vector<8x64xi1>, vector<8x64xf32>
    %cst_73 = arith.constant 0.000000e+00 : f32
    %254 = vector.broadcast %cst_73 : f32 to vector<8x64xf32>
    %255 = arith.select %251, %246, %254 : vector<8x64xi1>, vector<8x64xf32>
    %256 = vector.extract_strided_slice %255 {offsets = [0, 0], sizes = [8, 32], strides = [1, 1]} : vector<8x64xf32> to vector<8x32xf32>
    %257 = arith.index_cast %c4_i32 : i32 to index
    %c0_74 = arith.constant 0 : index
    %c0_75 = arith.constant 0 : index
    %258 = vector.load %arg13[%257, %c0_74, %c0_75] : memref<8x8x64xf32, #tpu.memory_space<vmem>>, vector<1x8x32xf32>
    %259 = vector.shape_cast %258 : vector<1x8x32xf32> to vector<8x32xf32>
    %260 = vector.shape_cast %256 : vector<8x32xf32> to vector<1x8x32xf32>
    tpu.vector_store %arg13[%257, %c0_74, %c0_75], %260 {strides = array<i32>} : memref<8x8x64xf32, #tpu.memory_space<vmem>>, vector<1x8x32xf32>,
    %261 = vector.extract_strided_slice %255 {offsets = [0, 32], sizes = [8, 32], strides = [1, 1]} : vector<8x64xf32> to vector<8x32xf32>
    %262 = arith.index_cast %220 : i32 to index
    %c0_76 = arith.constant 0 : index
    %c32_77 = arith.constant 32 : index
    %263 = vector.load %arg13[%262, %c0_76, %c32_77] : memref<8x8x64xf32, #tpu.memory_space<vmem>>, vector<1x8x32xf32>
    %264 = vector.shape_cast %263 : vector<1x8x32xf32> to vector<8x32xf32>
    %265 = vector.shape_cast %261 : vector<8x32xf32> to vector<1x8x32xf32>
    tpu.vector_store %arg13[%262, %c0_76, %c32_77], %265 {strides = array<i32>} : memref<8x8x64xf32, #tpu.memory_space<vmem>>, vector<1x8x32xf32>,
    %c5_i32 = arith.constant 5 : i32
    %c7_i32_78 = arith.constant 7 : i32
    %266 = arith.subi %c7_i32_78, %c5_i32 : i32
    %267 = arith.index_cast %c5_i32 : i32 to index
    %c0_79 = arith.constant 0 : index
    %c0_80 = arith.constant 0 : index
    %268 = vector.load %arg12[%267, %c0_79, %c0_80] : memref<8x8x256xbf16, #tpu.memory_space<vmem>>, vector<1x8x256xbf16>
    %269 = vector.shape_cast %268 : vector<1x8x256xbf16> to vector<8x256xbf16>
    %270 = arith.index_cast %266 : i32 to index
    %c0_81 = arith.constant 0 : index
    %c0_82 = arith.constant 0 : index
    %271 = vector.load %arg12[%270, %c0_81, %c0_82] : memref<8x8x256xbf16, #tpu.memory_space<vmem>>, vector<1x8x256xbf16>
    %272 = vector.shape_cast %271 : vector<1x8x256xbf16> to vector<8x256xbf16>
    %273 = arith.select %19, %269, %272 : vector<8x256xi1>, vector<8x256xbf16>
    %274 = arith.truncf %252 : vector<8x64xf32> to vector<8x64xbf16>
    %cst_83 = arith.constant dense<0.000000e+00> : vector<8x256xf32>
    %275 = tpu.matmul %274, %35, %cst_83 {dimension_numbers = #tpu.dot_dimension_numbers<[1], [0], [0], [1], [0, 0, 1, 1], [], []>} : vector<8x64xbf16>, vector<64x256xbf16>, vector<8x256xf32> -> vector<8x256xf32>
    %276 = arith.extf %273 : vector<8x256xbf16> to vector<8x256xf32>
    %277 = arith.addf %276, %275 : vector<8x256xf32>
    %278 = arith.negf %277 : vector<8x256xf32>
    %279 = math.exp %278 : vector<8x256xf32>
    %cst_84 = arith.constant 1.000000e+00 : f32
    %280 = vector.broadcast %cst_84 : f32 to vector<8x256xf32>
    %281 = arith.addf %280, %279 : vector<8x256xf32>
    %282 = arith.divf %280, %281 : vector<8x256xf32>
    %283 = vector.extract_strided_slice %282 {offsets = [0, 0], sizes = [8, 64], strides = [1, 1]} : vector<8x256xf32> to vector<8x64xf32>
    %284 = vector.extract_strided_slice %282 {offsets = [0, 64], sizes = [8, 64], strides = [1, 1]} : vector<8x256xf32> to vector<8x64xf32>
    %285 = vector.extract_strided_slice %277 {offsets = [0, 128], sizes = [8, 64], strides = [1, 1]} : vector<8x256xf32> to vector<8x64xf32>
    %286 = math.tanh %285 : vector<8x64xf32>
    %287 = vector.extract_strided_slice %282 {offsets = [0, 192], sizes = [8, 64], strides = [1, 1]} : vector<8x256xf32> to vector<8x64xf32>
    %288 = arith.mulf %284, %253 : vector<8x64xf32>
    %289 = arith.mulf %283, %286 : vector<8x64xf32>
    %290 = arith.addf %288, %289 : vector<8x64xf32>
    %291 = math.tanh %290 : vector<8x64xf32>
    %292 = arith.mulf %287, %291 : vector<8x64xf32>
    %293 = vector.broadcast %c5_i32 : i32 to vector<8x64xi32>
    %294 = vector.broadcast %266 : i32 to vector<8x64xi32>
    %295 = arith.select %22, %293, %294 : vector<8x64xi1>, vector<8x64xi32>
    %296 = vector.broadcast %0 : vector<8x1xi32> to vector<8x64xi32>
    %297 = arith.cmpi slt, %295, %296 : vector<8x64xi32>
    %298 = arith.select %297, %292, %252 : vector<8x64xi1>, vector<8x64xf32>
    %299 = arith.select %297, %290, %253 : vector<8x64xi1>, vector<8x64xf32>
    %cst_85 = arith.constant 0.000000e+00 : f32
    %300 = vector.broadcast %cst_85 : f32 to vector<8x64xf32>
    %301 = arith.select %297, %292, %300 : vector<8x64xi1>, vector<8x64xf32>
    %302 = vector.extract_strided_slice %301 {offsets = [0, 0], sizes = [8, 32], strides = [1, 1]} : vector<8x64xf32> to vector<8x32xf32>
    %303 = arith.index_cast %c5_i32 : i32 to index
    %c0_86 = arith.constant 0 : index
    %c0_87 = arith.constant 0 : index
    %304 = vector.load %arg13[%303, %c0_86, %c0_87] : memref<8x8x64xf32, #tpu.memory_space<vmem>>, vector<1x8x32xf32>
    %305 = vector.shape_cast %304 : vector<1x8x32xf32> to vector<8x32xf32>
    %306 = vector.shape_cast %302 : vector<8x32xf32> to vector<1x8x32xf32>
    tpu.vector_store %arg13[%303, %c0_86, %c0_87], %306 {strides = array<i32>} : memref<8x8x64xf32, #tpu.memory_space<vmem>>, vector<1x8x32xf32>,
    %307 = vector.extract_strided_slice %301 {offsets = [0, 32], sizes = [8, 32], strides = [1, 1]} : vector<8x64xf32> to vector<8x32xf32>
    %308 = arith.index_cast %266 : i32 to index
    %c0_88 = arith.constant 0 : index
    %c32_89 = arith.constant 32 : index
    %309 = vector.load %arg13[%308, %c0_88, %c32_89] : memref<8x8x64xf32, #tpu.memory_space<vmem>>, vector<1x8x32xf32>
    %310 = vector.shape_cast %309 : vector<1x8x32xf32> to vector<8x32xf32>
    %311 = vector.shape_cast %307 : vector<8x32xf32> to vector<1x8x32xf32>
    tpu.vector_store %arg13[%308, %c0_88, %c32_89], %311 {strides = array<i32>} : memref<8x8x64xf32, #tpu.memory_space<vmem>>, vector<1x8x32xf32>,
    %c6_i32 = arith.constant 6 : i32
    %c7_i32_90 = arith.constant 7 : i32
    %312 = arith.subi %c7_i32_90, %c6_i32 : i32
    %313 = arith.index_cast %c6_i32 : i32 to index
    %c0_91 = arith.constant 0 : index
    %c0_92 = arith.constant 0 : index
    %314 = vector.load %arg12[%313, %c0_91, %c0_92] : memref<8x8x256xbf16, #tpu.memory_space<vmem>>, vector<1x8x256xbf16>
    %315 = vector.shape_cast %314 : vector<1x8x256xbf16> to vector<8x256xbf16>
    %316 = arith.index_cast %312 : i32 to index
    %c0_93 = arith.constant 0 : index
    %c0_94 = arith.constant 0 : index
    %317 = vector.load %arg12[%316, %c0_93, %c0_94] : memref<8x8x256xbf16, #tpu.memory_space<vmem>>, vector<1x8x256xbf16>
    %318 = vector.shape_cast %317 : vector<1x8x256xbf16> to vector<8x256xbf16>
    %319 = arith.select %19, %315, %318 : vector<8x256xi1>, vector<8x256xbf16>
    %320 = arith.truncf %298 : vector<8x64xf32> to vector<8x64xbf16>
    %cst_95 = arith.constant dense<0.000000e+00> : vector<8x256xf32>
    %321 = tpu.matmul %320, %35, %cst_95 {dimension_numbers = #tpu.dot_dimension_numbers<[1], [0], [0], [1], [0, 0, 1, 1], [], []>} : vector<8x64xbf16>, vector<64x256xbf16>, vector<8x256xf32> -> vector<8x256xf32>
    %322 = arith.extf %319 : vector<8x256xbf16> to vector<8x256xf32>
    %323 = arith.addf %322, %321 : vector<8x256xf32>
    %324 = arith.negf %323 : vector<8x256xf32>
    %325 = math.exp %324 : vector<8x256xf32>
    %cst_96 = arith.constant 1.000000e+00 : f32
    %326 = vector.broadcast %cst_96 : f32 to vector<8x256xf32>
    %327 = arith.addf %326, %325 : vector<8x256xf32>
    %328 = arith.divf %326, %327 : vector<8x256xf32>
    %329 = vector.extract_strided_slice %328 {offsets = [0, 0], sizes = [8, 64], strides = [1, 1]} : vector<8x256xf32> to vector<8x64xf32>
    %330 = vector.extract_strided_slice %328 {offsets = [0, 64], sizes = [8, 64], strides = [1, 1]} : vector<8x256xf32> to vector<8x64xf32>
    %331 = vector.extract_strided_slice %323 {offsets = [0, 128], sizes = [8, 64], strides = [1, 1]} : vector<8x256xf32> to vector<8x64xf32>
    %332 = math.tanh %331 : vector<8x64xf32>
    %333 = vector.extract_strided_slice %328 {offsets = [0, 192], sizes = [8, 64], strides = [1, 1]} : vector<8x256xf32> to vector<8x64xf32>
    %334 = arith.mulf %330, %299 : vector<8x64xf32>
    %335 = arith.mulf %329, %332 : vector<8x64xf32>
    %336 = arith.addf %334, %335 : vector<8x64xf32>
    %337 = math.tanh %336 : vector<8x64xf32>
    %338 = arith.mulf %333, %337 : vector<8x64xf32>
    %339 = vector.broadcast %c6_i32 : i32 to vector<8x64xi32>
    %340 = vector.broadcast %312 : i32 to vector<8x64xi32>
    %341 = arith.select %22, %339, %340 : vector<8x64xi1>, vector<8x64xi32>
    %342 = vector.broadcast %0 : vector<8x1xi32> to vector<8x64xi32>
    %343 = arith.cmpi slt, %341, %342 : vector<8x64xi32>
    %344 = arith.select %343, %338, %298 : vector<8x64xi1>, vector<8x64xf32>
    %345 = arith.select %343, %336, %299 : vector<8x64xi1>, vector<8x64xf32>
    %cst_97 = arith.constant 0.000000e+00 : f32
    %346 = vector.broadcast %cst_97 : f32 to vector<8x64xf32>
    %347 = arith.select %343, %338, %346 : vector<8x64xi1>, vector<8x64xf32>
    %348 = vector.extract_strided_slice %347 {offsets = [0, 0], sizes = [8, 32], strides = [1, 1]} : vector<8x64xf32> to vector<8x32xf32>
    %349 = arith.index_cast %c6_i32 : i32 to index
    %c0_98 = arith.constant 0 : index
    %c0_99 = arith.constant 0 : index
    %350 = vector.load %arg13[%349, %c0_98, %c0_99] : memref<8x8x64xf32, #tpu.memory_space<vmem>>, vector<1x8x32xf32>
    %351 = vector.shape_cast %350 : vector<1x8x32xf32> to vector<8x32xf32>
    %352 = vector.shape_cast %348 : vector<8x32xf32> to vector<1x8x32xf32>
    tpu.vector_store %arg13[%349, %c0_98, %c0_99], %352 {strides = array<i32>} : memref<8x8x64xf32, #tpu.memory_space<vmem>>, vector<1x8x32xf32>,
    %353 = vector.extract_strided_slice %347 {offsets = [0, 32], sizes = [8, 32], strides = [1, 1]} : vector<8x64xf32> to vector<8x32xf32>
    %354 = arith.index_cast %312 : i32 to index
    %c0_100 = arith.constant 0 : index
    %c32_101 = arith.constant 32 : index
    %355 = vector.load %arg13[%354, %c0_100, %c32_101] : memref<8x8x64xf32, #tpu.memory_space<vmem>>, vector<1x8x32xf32>
    %356 = vector.shape_cast %355 : vector<1x8x32xf32> to vector<8x32xf32>
    %357 = vector.shape_cast %353 : vector<8x32xf32> to vector<1x8x32xf32>
    tpu.vector_store %arg13[%354, %c0_100, %c32_101], %357 {strides = array<i32>} : memref<8x8x64xf32, #tpu.memory_space<vmem>>, vector<1x8x32xf32>,
    %c7_i32_102 = arith.constant 7 : i32
    %c7_i32_103 = arith.constant 7 : i32
    %358 = arith.subi %c7_i32_103, %c7_i32_102 : i32
    %359 = arith.index_cast %c7_i32_102 : i32 to index
    %c0_104 = arith.constant 0 : index
    %c0_105 = arith.constant 0 : index
    %360 = vector.load %arg12[%359, %c0_104, %c0_105] : memref<8x8x256xbf16, #tpu.memory_space<vmem>>, vector<1x8x256xbf16>
    %361 = vector.shape_cast %360 : vector<1x8x256xbf16> to vector<8x256xbf16>
    %362 = arith.index_cast %358 : i32 to index
    %c0_106 = arith.constant 0 : index
    %c0_107 = arith.constant 0 : index
    %363 = vector.load %arg12[%362, %c0_106, %c0_107] : memref<8x8x256xbf16, #tpu.memory_space<vmem>>, vector<1x8x256xbf16>
    %364 = vector.shape_cast %363 : vector<1x8x256xbf16> to vector<8x256xbf16>
    %365 = arith.select %19, %361, %364 : vector<8x256xi1>, vector<8x256xbf16>
    %366 = arith.truncf %344 : vector<8x64xf32> to vector<8x64xbf16>
    %cst_108 = arith.constant dense<0.000000e+00> : vector<8x256xf32>
    %367 = tpu.matmul %366, %35, %cst_108 {dimension_numbers = #tpu.dot_dimension_numbers<[1], [0], [0], [1], [0, 0, 1, 1], [], []>} : vector<8x64xbf16>, vector<64x256xbf16>, vector<8x256xf32> -> vector<8x256xf32>
    %368 = arith.extf %365 : vector<8x256xbf16> to vector<8x256xf32>
    %369 = arith.addf %368, %367 : vector<8x256xf32>
    %370 = arith.negf %369 : vector<8x256xf32>
    %371 = math.exp %370 : vector<8x256xf32>
    %cst_109 = arith.constant 1.000000e+00 : f32
    %372 = vector.broadcast %cst_109 : f32 to vector<8x256xf32>
    %373 = arith.addf %372, %371 : vector<8x256xf32>
    %374 = arith.divf %372, %373 : vector<8x256xf32>
    %375 = vector.extract_strided_slice %374 {offsets = [0, 0], sizes = [8, 64], strides = [1, 1]} : vector<8x256xf32> to vector<8x64xf32>
    %376 = vector.extract_strided_slice %374 {offsets = [0, 64], sizes = [8, 64], strides = [1, 1]} : vector<8x256xf32> to vector<8x64xf32>
    %377 = vector.extract_strided_slice %369 {offsets = [0, 128], sizes = [8, 64], strides = [1, 1]} : vector<8x256xf32> to vector<8x64xf32>
    %378 = math.tanh %377 : vector<8x64xf32>
    %379 = vector.extract_strided_slice %374 {offsets = [0, 192], sizes = [8, 64], strides = [1, 1]} : vector<8x256xf32> to vector<8x64xf32>
    %380 = arith.mulf %376, %345 : vector<8x64xf32>
    %381 = arith.mulf %375, %378 : vector<8x64xf32>
    %382 = arith.addf %380, %381 : vector<8x64xf32>
    %383 = math.tanh %382 : vector<8x64xf32>
    %384 = arith.mulf %379, %383 : vector<8x64xf32>
    %385 = vector.broadcast %c7_i32_102 : i32 to vector<8x64xi32>
    %386 = vector.broadcast %358 : i32 to vector<8x64xi32>
    %387 = arith.select %22, %385, %386 : vector<8x64xi1>, vector<8x64xi32>
    %388 = vector.broadcast %0 : vector<8x1xi32> to vector<8x64xi32>
    %389 = arith.cmpi slt, %387, %388 : vector<8x64xi32>
    %390 = arith.select %389, %384, %344 : vector<8x64xi1>, vector<8x64xf32>
    %391 = arith.select %389, %382, %345 : vector<8x64xi1>, vector<8x64xf32>
    %cst_110 = arith.constant 0.000000e+00 : f32
    %392 = vector.broadcast %cst_110 : f32 to vector<8x64xf32>
    %393 = arith.select %389, %384, %392 : vector<8x64xi1>, vector<8x64xf32>
    %394 = vector.extract_strided_slice %393 {offsets = [0, 0], sizes = [8, 32], strides = [1, 1]} : vector<8x64xf32> to vector<8x32xf32>
    %395 = arith.index_cast %c7_i32_102 : i32 to index
    %c0_111 = arith.constant 0 : index
    %c0_112 = arith.constant 0 : index
    %396 = vector.load %arg13[%395, %c0_111, %c0_112] : memref<8x8x64xf32, #tpu.memory_space<vmem>>, vector<1x8x32xf32>
    %397 = vector.shape_cast %396 : vector<1x8x32xf32> to vector<8x32xf32>
    %398 = vector.shape_cast %394 : vector<8x32xf32> to vector<1x8x32xf32>
    tpu.vector_store %arg13[%395, %c0_111, %c0_112], %398 {strides = array<i32>} : memref<8x8x64xf32, #tpu.memory_space<vmem>>, vector<1x8x32xf32>,
    %399 = vector.extract_strided_slice %393 {offsets = [0, 32], sizes = [8, 32], strides = [1, 1]} : vector<8x64xf32> to vector<8x32xf32>
    %400 = arith.index_cast %358 : i32 to index
    %c0_113 = arith.constant 0 : index
    %c32_114 = arith.constant 32 : index
    %401 = vector.load %arg13[%400, %c0_113, %c32_114] : memref<8x8x64xf32, #tpu.memory_space<vmem>>, vector<1x8x32xf32>
    %402 = vector.shape_cast %401 : vector<1x8x32xf32> to vector<8x32xf32>
    %403 = vector.shape_cast %399 : vector<8x32xf32> to vector<1x8x32xf32>
    tpu.vector_store %arg13[%400, %c0_113, %c32_114], %403 {strides = array<i32>} : memref<8x8x64xf32, #tpu.memory_space<vmem>>, vector<1x8x32xf32>,
    %c8_i32 = arith.constant 8 : i32
    %c0_115 = arith.constant 0 : index
    %c0_116 = arith.constant 0 : index
    %c0_117 = arith.constant 0 : index
    %404 = vector.load %arg13[%c0_115, %c0_116, %c0_117] : memref<8x8x64xf32, #tpu.memory_space<vmem>>, vector<8x8x64xf32>
    %cst_118 = arith.constant dense<0.000000e+00> : vector<8x8xf32>
    %405 = vector.multi_reduction <add>, %404, %cst_118 [2] : vector<8x8x64xf32> to vector<8x8xf32>
    %406 = vector.shape_cast %405 : vector<8x8xf32> to vector<8x8x1xf32>
    %cst_119 = arith.constant 6.400000e+01 : f32
    %407 = vector.broadcast %cst_119 : f32 to vector<8x8x1xf32>
    %408 = arith.divf %406, %407 : vector<8x8x1xf32>
    %409 = vector.broadcast %408 : vector<8x8x1xf32> to vector<8x8x64xf32>
    %410 = arith.subf %404, %409 : vector<8x8x64xf32>
    %411 = arith.mulf %410, %410 : vector<8x8x64xf32>
    %cst_120 = arith.constant dense<0.000000e+00> : vector<8x8xf32>
    %412 = vector.multi_reduction <add>, %411, %cst_120 [2] : vector<8x8x64xf32> to vector<8x8xf32>
    %413 = vector.shape_cast %412 : vector<8x8xf32> to vector<8x8x1xf32>
    %cst_121 = arith.constant 6.400000e+01 : f32
    %414 = vector.broadcast %cst_121 : f32 to vector<8x8x1xf32>
    %415 = arith.divf %413, %414 : vector<8x8x1xf32>
    %416 = vector.broadcast %408 : vector<8x8x1xf32> to vector<8x8x64xf32>
    %417 = arith.subf %404, %416 : vector<8x8x64xf32>
    %cst_122 = arith.constant 9.99999974E-6 : f32
    %418 = vector.broadcast %cst_122 : f32 to vector<8x8x1xf32>
    %419 = arith.addf %415, %418 : vector<8x8x1xf32>
    %420 = math.rsqrt %419 : vector<8x8x1xf32>
    %421 = vector.broadcast %420 : vector<8x8x1xf32> to vector<8x8x64xf32>
    %422 = arith.mulf %417, %421 : vector<8x8x64xf32>
    %c0_123 = arith.constant 0 : index
    %c0_124 = arith.constant 0 : index
    %423 = vector.load %arg6[%c0_123, %c0_124] : memref<1x64xf32, #tpu.memory_space<vmem>>, vector<1x64xf32>
    %424 = vector.shape_cast %423 : vector<1x64xf32> to vector<1x1x64xf32>
    %425 = vector.broadcast %424 : vector<1x1x64xf32> to vector<8x8x64xf32>
    %426 = arith.mulf %422, %425 : vector<8x8x64xf32>
    %c0_125 = arith.constant 0 : index
    %c0_126 = arith.constant 0 : index
    %427 = vector.load %arg7[%c0_125, %c0_126] : memref<1x64xf32, #tpu.memory_space<vmem>>, vector<1x64xf32>
    %428 = vector.shape_cast %427 : vector<1x64xf32> to vector<1x1x64xf32>
    %429 = vector.broadcast %428 : vector<1x1x64xf32> to vector<8x8x64xf32>
    %430 = arith.addf %426, %429 : vector<8x8x64xf32>
    %431 = vector.shape_cast %430 : vector<8x8x64xf32> to vector<64x64xf32>
    %432 = arith.truncf %431 : vector<64x64xf32> to vector<64x64xbf16>
    %c0_127 = arith.constant 0 : index
    %c0_128 = arith.constant 0 : index
    %433 = vector.load %arg8[%c0_127, %c0_128] : memref<64x256xbf16, #tpu.memory_space<vmem>>, vector<64x256xbf16>
    %cst_129 = arith.constant dense<0.000000e+00> : vector<64x256xf32>
    %434 = tpu.matmul %432, %433, %cst_129 {dimension_numbers = #tpu.dot_dimension_numbers<[1], [0], [0], [1], [0, 0, 1, 1], [], []>} : vector<64x64xbf16>, vector<64x256xbf16>, vector<64x256xf32> -> vector<64x256xf32>
    %c0_130 = arith.constant 0 : index
    %c0_131 = arith.constant 0 : index
    %435 = vector.load %arg9[%c0_130, %c0_131] : memref<1x256xf32, #tpu.memory_space<vmem>>, vector<1x256xf32>
    %436 = vector.broadcast %435 : vector<1x256xf32> to vector<64x256xf32>
    %437 = arith.addf %434, %436 : vector<64x256xf32>
    %438 = vector.shape_cast %437 : vector<64x256xf32> to vector<8x8x256xf32>
    %439 = arith.truncf %438 : vector<8x8x256xf32> to vector<8x8x256xbf16>
    %c0_132 = arith.constant 0 : index
    %c0_133 = arith.constant 0 : index
    %c0_134 = arith.constant 0 : index
    %440 = vector.load %arg12[%c0_132, %c0_133, %c0_134] : memref<8x8x256xbf16, #tpu.memory_space<vmem>>, vector<8x8x256xbf16>
    tpu.vector_store %arg12[%c0_132, %c0_133, %c0_134], %439 {strides = array<i32>} : memref<8x8x256xbf16, #tpu.memory_space<vmem>>, vector<8x8x256xbf16>,
    %c0_135 = arith.constant 0 : index
    %c0_136 = arith.constant 0 : index
    %441 = vector.load %arg10[%c0_135, %c0_136] : memref<64x256xbf16, #tpu.memory_space<vmem>>, vector<64x256xbf16>
    %c0_i32_137 = arith.constant 0 : i32
    %c7_i32_138 = arith.constant 7 : i32
    %442 = arith.subi %c7_i32_138, %c0_i32_137 : i32
    %443 = arith.index_cast %c0_i32_137 : i32 to index
    %c0_139 = arith.constant 0 : index
    %c0_140 = arith.constant 0 : index
    %444 = vector.load %arg12[%443, %c0_139, %c0_140] : memref<8x8x256xbf16, #tpu.memory_space<vmem>>, vector<1x8x256xbf16>
    %445 = vector.shape_cast %444 : vector<1x8x256xbf16> to vector<8x256xbf16>
    %446 = arith.index_cast %442 : i32 to index
    %c0_141 = arith.constant 0 : index
    %c0_142 = arith.constant 0 : index
    %447 = vector.load %arg12[%446, %c0_141, %c0_142] : memref<8x8x256xbf16, #tpu.memory_space<vmem>>, vector<1x8x256xbf16>
    %448 = vector.shape_cast %447 : vector<1x8x256xbf16> to vector<8x256xbf16>
    %449 = arith.select %19, %445, %448 : vector<8x256xi1>, vector<8x256xbf16>
    %450 = arith.truncf %34 : vector<8x64xf32> to vector<8x64xbf16>
    %cst_143 = arith.constant dense<0.000000e+00> : vector<8x256xf32>
    %451 = tpu.matmul %450, %441, %cst_143 {dimension_numbers = #tpu.dot_dimension_numbers<[1], [0], [0], [1], [0, 0, 1, 1], [], []>} : vector<8x64xbf16>, vector<64x256xbf16>, vector<8x256xf32> -> vector<8x256xf32>
    %452 = arith.extf %449 : vector<8x256xbf16> to vector<8x256xf32>
    %453 = arith.addf %452, %451 : vector<8x256xf32>
    %454 = arith.negf %453 : vector<8x256xf32>
    %455 = math.exp %454 : vector<8x256xf32>
    %cst_144 = arith.constant 1.000000e+00 : f32
    %456 = vector.broadcast %cst_144 : f32 to vector<8x256xf32>
    %457 = arith.addf %456, %455 : vector<8x256xf32>
    %458 = arith.divf %456, %457 : vector<8x256xf32>
    %459 = vector.extract_strided_slice %458 {offsets = [0, 0], sizes = [8, 64], strides = [1, 1]} : vector<8x256xf32> to vector<8x64xf32>
    %460 = vector.extract_strided_slice %458 {offsets = [0, 64], sizes = [8, 64], strides = [1, 1]} : vector<8x256xf32> to vector<8x64xf32>
    %461 = vector.extract_strided_slice %453 {offsets = [0, 128], sizes = [8, 64], strides = [1, 1]} : vector<8x256xf32> to vector<8x64xf32>
    %462 = math.tanh %461 : vector<8x64xf32>
    %463 = vector.extract_strided_slice %458 {offsets = [0, 192], sizes = [8, 64], strides = [1, 1]} : vector<8x256xf32> to vector<8x64xf32>
    %464 = arith.mulf %460, %34 : vector<8x64xf32>
    %465 = arith.mulf %459, %462 : vector<8x64xf32>
    %466 = arith.addf %464, %465 : vector<8x64xf32>
    %467 = math.tanh %466 : vector<8x64xf32>
    %468 = arith.mulf %463, %467 : vector<8x64xf32>
    %469 = vector.broadcast %c0_i32_137 : i32 to vector<8x64xi32>
    %470 = vector.broadcast %442 : i32 to vector<8x64xi32>
    %471 = arith.select %22, %469, %470 : vector<8x64xi1>, vector<8x64xi32>
    %472 = vector.broadcast %0 : vector<8x1xi32> to vector<8x64xi32>
    %473 = arith.cmpi slt, %471, %472 : vector<8x64xi32>
    %474 = arith.select %473, %468, %34 : vector<8x64xi1>, vector<8x64xf32>
    %475 = arith.select %473, %466, %34 : vector<8x64xi1>, vector<8x64xf32>
    %c1_i32_145 = arith.constant 1 : i32
    %c7_i32_146 = arith.constant 7 : i32
    %476 = arith.subi %c7_i32_146, %c1_i32_145 : i32
    %477 = arith.index_cast %c1_i32_145 : i32 to index
    %c0_147 = arith.constant 0 : index
    %c0_148 = arith.constant 0 : index
    %478 = vector.load %arg12[%477, %c0_147, %c0_148] : memref<8x8x256xbf16, #tpu.memory_space<vmem>>, vector<1x8x256xbf16>
    %479 = vector.shape_cast %478 : vector<1x8x256xbf16> to vector<8x256xbf16>
    %480 = arith.index_cast %476 : i32 to index
    %c0_149 = arith.constant 0 : index
    %c0_150 = arith.constant 0 : index
    %481 = vector.load %arg12[%480, %c0_149, %c0_150] : memref<8x8x256xbf16, #tpu.memory_space<vmem>>, vector<1x8x256xbf16>
    %482 = vector.shape_cast %481 : vector<1x8x256xbf16> to vector<8x256xbf16>
    %483 = arith.select %19, %479, %482 : vector<8x256xi1>, vector<8x256xbf16>
    %484 = arith.truncf %474 : vector<8x64xf32> to vector<8x64xbf16>
    %cst_151 = arith.constant dense<0.000000e+00> : vector<8x256xf32>
    %485 = tpu.matmul %484, %441, %cst_151 {dimension_numbers = #tpu.dot_dimension_numbers<[1], [0], [0], [1], [0, 0, 1, 1], [], []>} : vector<8x64xbf16>, vector<64x256xbf16>, vector<8x256xf32> -> vector<8x256xf32>
    %486 = arith.extf %483 : vector<8x256xbf16> to vector<8x256xf32>
    %487 = arith.addf %486, %485 : vector<8x256xf32>
    %488 = arith.negf %487 : vector<8x256xf32>
    %489 = math.exp %488 : vector<8x256xf32>
    %cst_152 = arith.constant 1.000000e+00 : f32
    %490 = vector.broadcast %cst_152 : f32 to vector<8x256xf32>
    %491 = arith.addf %490, %489 : vector<8x256xf32>
    %492 = arith.divf %490, %491 : vector<8x256xf32>
    %493 = vector.extract_strided_slice %492 {offsets = [0, 0], sizes = [8, 64], strides = [1, 1]} : vector<8x256xf32> to vector<8x64xf32>
    %494 = vector.extract_strided_slice %492 {offsets = [0, 64], sizes = [8, 64], strides = [1, 1]} : vector<8x256xf32> to vector<8x64xf32>
    %495 = vector.extract_strided_slice %487 {offsets = [0, 128], sizes = [8, 64], strides = [1, 1]} : vector<8x256xf32> to vector<8x64xf32>
    %496 = math.tanh %495 : vector<8x64xf32>
    %497 = vector.extract_strided_slice %492 {offsets = [0, 192], sizes = [8, 64], strides = [1, 1]} : vector<8x256xf32> to vector<8x64xf32>
    %498 = arith.mulf %494, %475 : vector<8x64xf32>
    %499 = arith.mulf %493, %496 : vector<8x64xf32>
    %500 = arith.addf %498, %499 : vector<8x64xf32>
    %501 = math.tanh %500 : vector<8x64xf32>
    %502 = arith.mulf %497, %501 : vector<8x64xf32>
    %503 = vector.broadcast %c1_i32_145 : i32 to vector<8x64xi32>
    %504 = vector.broadcast %476 : i32 to vector<8x64xi32>
    %505 = arith.select %22, %503, %504 : vector<8x64xi1>, vector<8x64xi32>
    %506 = vector.broadcast %0 : vector<8x1xi32> to vector<8x64xi32>
    %507 = arith.cmpi slt, %505, %506 : vector<8x64xi32>
    %508 = arith.select %507, %502, %474 : vector<8x64xi1>, vector<8x64xf32>
    %509 = arith.select %507, %500, %475 : vector<8x64xi1>, vector<8x64xf32>
    %c2_i32_153 = arith.constant 2 : i32
    %c7_i32_154 = arith.constant 7 : i32
    %510 = arith.subi %c7_i32_154, %c2_i32_153 : i32
    %511 = arith.index_cast %c2_i32_153 : i32 to index
    %c0_155 = arith.constant 0 : index
    %c0_156 = arith.constant 0 : index
    %512 = vector.load %arg12[%511, %c0_155, %c0_156] : memref<8x8x256xbf16, #tpu.memory_space<vmem>>, vector<1x8x256xbf16>
    %513 = vector.shape_cast %512 : vector<1x8x256xbf16> to vector<8x256xbf16>
    %514 = arith.index_cast %510 : i32 to index
    %c0_157 = arith.constant 0 : index
    %c0_158 = arith.constant 0 : index
    %515 = vector.load %arg12[%514, %c0_157, %c0_158] : memref<8x8x256xbf16, #tpu.memory_space<vmem>>, vector<1x8x256xbf16>
    %516 = vector.shape_cast %515 : vector<1x8x256xbf16> to vector<8x256xbf16>
    %517 = arith.select %19, %513, %516 : vector<8x256xi1>, vector<8x256xbf16>
    %518 = arith.truncf %508 : vector<8x64xf32> to vector<8x64xbf16>
    %cst_159 = arith.constant dense<0.000000e+00> : vector<8x256xf32>
    %519 = tpu.matmul %518, %441, %cst_159 {dimension_numbers = #tpu.dot_dimension_numbers<[1], [0], [0], [1], [0, 0, 1, 1], [], []>} : vector<8x64xbf16>, vector<64x256xbf16>, vector<8x256xf32> -> vector<8x256xf32>
    %520 = arith.extf %517 : vector<8x256xbf16> to vector<8x256xf32>
    %521 = arith.addf %520, %519 : vector<8x256xf32>
    %522 = arith.negf %521 : vector<8x256xf32>
    %523 = math.exp %522 : vector<8x256xf32>
    %cst_160 = arith.constant 1.000000e+00 : f32
    %524 = vector.broadcast %cst_160 : f32 to vector<8x256xf32>
    %525 = arith.addf %524, %523 : vector<8x256xf32>
    %526 = arith.divf %524, %525 : vector<8x256xf32>
    %527 = vector.extract_strided_slice %526 {offsets = [0, 0], sizes = [8, 64], strides = [1, 1]} : vector<8x256xf32> to vector<8x64xf32>
    %528 = vector.extract_strided_slice %526 {offsets = [0, 64], sizes = [8, 64], strides = [1, 1]} : vector<8x256xf32> to vector<8x64xf32>
    %529 = vector.extract_strided_slice %521 {offsets = [0, 128], sizes = [8, 64], strides = [1, 1]} : vector<8x256xf32> to vector<8x64xf32>
    %530 = math.tanh %529 : vector<8x64xf32>
    %531 = vector.extract_strided_slice %526 {offsets = [0, 192], sizes = [8, 64], strides = [1, 1]} : vector<8x256xf32> to vector<8x64xf32>
    %532 = arith.mulf %528, %509 : vector<8x64xf32>
    %533 = arith.mulf %527, %530 : vector<8x64xf32>
    %534 = arith.addf %532, %533 : vector<8x64xf32>
    %535 = math.tanh %534 : vector<8x64xf32>
    %536 = arith.mulf %531, %535 : vector<8x64xf32>
    %537 = vector.broadcast %c2_i32_153 : i32 to vector<8x64xi32>
    %538 = vector.broadcast %510 : i32 to vector<8x64xi32>
    %539 = arith.select %22, %537, %538 : vector<8x64xi1>, vector<8x64xi32>
    %540 = vector.broadcast %0 : vector<8x1xi32> to vector<8x64xi32>
    %541 = arith.cmpi slt, %539, %540 : vector<8x64xi32>
    %542 = arith.select %541, %536, %508 : vector<8x64xi1>, vector<8x64xf32>
    %543 = arith.select %541, %534, %509 : vector<8x64xi1>, vector<8x64xf32>
    %c3_i32_161 = arith.constant 3 : i32
    %c7_i32_162 = arith.constant 7 : i32
    %544 = arith.subi %c7_i32_162, %c3_i32_161 : i32
    %545 = arith.index_cast %c3_i32_161 : i32 to index
    %c0_163 = arith.constant 0 : index
    %c0_164 = arith.constant 0 : index
    %546 = vector.load %arg12[%545, %c0_163, %c0_164] : memref<8x8x256xbf16, #tpu.memory_space<vmem>>, vector<1x8x256xbf16>
    %547 = vector.shape_cast %546 : vector<1x8x256xbf16> to vector<8x256xbf16>
    %548 = arith.index_cast %544 : i32 to index
    %c0_165 = arith.constant 0 : index
    %c0_166 = arith.constant 0 : index
    %549 = vector.load %arg12[%548, %c0_165, %c0_166] : memref<8x8x256xbf16, #tpu.memory_space<vmem>>, vector<1x8x256xbf16>
    %550 = vector.shape_cast %549 : vector<1x8x256xbf16> to vector<8x256xbf16>
    %551 = arith.select %19, %547, %550 : vector<8x256xi1>, vector<8x256xbf16>
    %552 = arith.truncf %542 : vector<8x64xf32> to vector<8x64xbf16>
    %cst_167 = arith.constant dense<0.000000e+00> : vector<8x256xf32>
    %553 = tpu.matmul %552, %441, %cst_167 {dimension_numbers = #tpu.dot_dimension_numbers<[1], [0], [0], [1], [0, 0, 1, 1], [], []>} : vector<8x64xbf16>, vector<64x256xbf16>, vector<8x256xf32> -> vector<8x256xf32>
    %554 = arith.extf %551 : vector<8x256xbf16> to vector<8x256xf32>
    %555 = arith.addf %554, %553 : vector<8x256xf32>
    %556 = arith.negf %555 : vector<8x256xf32>
    %557 = math.exp %556 : vector<8x256xf32>
    %cst_168 = arith.constant 1.000000e+00 : f32
    %558 = vector.broadcast %cst_168 : f32 to vector<8x256xf32>
    %559 = arith.addf %558, %557 : vector<8x256xf32>
    %560 = arith.divf %558, %559 : vector<8x256xf32>
    %561 = vector.extract_strided_slice %560 {offsets = [0, 0], sizes = [8, 64], strides = [1, 1]} : vector<8x256xf32> to vector<8x64xf32>
    %562 = vector.extract_strided_slice %560 {offsets = [0, 64], sizes = [8, 64], strides = [1, 1]} : vector<8x256xf32> to vector<8x64xf32>
    %563 = vector.extract_strided_slice %555 {offsets = [0, 128], sizes = [8, 64], strides = [1, 1]} : vector<8x256xf32> to vector<8x64xf32>
    %564 = math.tanh %563 : vector<8x64xf32>
    %565 = vector.extract_strided_slice %560 {offsets = [0, 192], sizes = [8, 64], strides = [1, 1]} : vector<8x256xf32> to vector<8x64xf32>
    %566 = arith.mulf %562, %543 : vector<8x64xf32>
    %567 = arith.mulf %561, %564 : vector<8x64xf32>
    %568 = arith.addf %566, %567 : vector<8x64xf32>
    %569 = math.tanh %568 : vector<8x64xf32>
    %570 = arith.mulf %565, %569 : vector<8x64xf32>
    %571 = vector.broadcast %c3_i32_161 : i32 to vector<8x64xi32>
    %572 = vector.broadcast %544 : i32 to vector<8x64xi32>
    %573 = arith.select %22, %571, %572 : vector<8x64xi1>, vector<8x64xi32>
    %574 = vector.broadcast %0 : vector<8x1xi32> to vector<8x64xi32>
    %575 = arith.cmpi slt, %573, %574 : vector<8x64xi32>
    %576 = arith.select %575, %570, %542 : vector<8x64xi1>, vector<8x64xf32>
    %577 = arith.select %575, %568, %543 : vector<8x64xi1>, vector<8x64xf32>
    %c4_i32_169 = arith.constant 4 : i32
    %c7_i32_170 = arith.constant 7 : i32
    %578 = arith.subi %c7_i32_170, %c4_i32_169 : i32
    %579 = arith.index_cast %c4_i32_169 : i32 to index
    %c0_171 = arith.constant 0 : index
    %c0_172 = arith.constant 0 : index
    %580 = vector.load %arg12[%579, %c0_171, %c0_172] : memref<8x8x256xbf16, #tpu.memory_space<vmem>>, vector<1x8x256xbf16>
    %581 = vector.shape_cast %580 : vector<1x8x256xbf16> to vector<8x256xbf16>
    %582 = arith.index_cast %578 : i32 to index
    %c0_173 = arith.constant 0 : index
    %c0_174 = arith.constant 0 : index
    %583 = vector.load %arg12[%582, %c0_173, %c0_174] : memref<8x8x256xbf16, #tpu.memory_space<vmem>>, vector<1x8x256xbf16>
    %584 = vector.shape_cast %583 : vector<1x8x256xbf16> to vector<8x256xbf16>
    %585 = arith.select %19, %581, %584 : vector<8x256xi1>, vector<8x256xbf16>
    %586 = arith.truncf %576 : vector<8x64xf32> to vector<8x64xbf16>
    %cst_175 = arith.constant dense<0.000000e+00> : vector<8x256xf32>
    %587 = tpu.matmul %586, %441, %cst_175 {dimension_numbers = #tpu.dot_dimension_numbers<[1], [0], [0], [1], [0, 0, 1, 1], [], []>} : vector<8x64xbf16>, vector<64x256xbf16>, vector<8x256xf32> -> vector<8x256xf32>
    %588 = arith.extf %585 : vector<8x256xbf16> to vector<8x256xf32>
    %589 = arith.addf %588, %587 : vector<8x256xf32>
    %590 = arith.negf %589 : vector<8x256xf32>
    %591 = math.exp %590 : vector<8x256xf32>
    %cst_176 = arith.constant 1.000000e+00 : f32
    %592 = vector.broadcast %cst_176 : f32 to vector<8x256xf32>
    %593 = arith.addf %592, %591 : vector<8x256xf32>
    %594 = arith.divf %592, %593 : vector<8x256xf32>
    %595 = vector.extract_strided_slice %594 {offsets = [0, 0], sizes = [8, 64], strides = [1, 1]} : vector<8x256xf32> to vector<8x64xf32>
    %596 = vector.extract_strided_slice %594 {offsets = [0, 64], sizes = [8, 64], strides = [1, 1]} : vector<8x256xf32> to vector<8x64xf32>
    %597 = vector.extract_strided_slice %589 {offsets = [0, 128], sizes = [8, 64], strides = [1, 1]} : vector<8x256xf32> to vector<8x64xf32>
    %598 = math.tanh %597 : vector<8x64xf32>
    %599 = vector.extract_strided_slice %594 {offsets = [0, 192], sizes = [8, 64], strides = [1, 1]} : vector<8x256xf32> to vector<8x64xf32>
    %600 = arith.mulf %596, %577 : vector<8x64xf32>
    %601 = arith.mulf %595, %598 : vector<8x64xf32>
    %602 = arith.addf %600, %601 : vector<8x64xf32>
    %603 = math.tanh %602 : vector<8x64xf32>
    %604 = arith.mulf %599, %603 : vector<8x64xf32>
    %605 = vector.broadcast %c4_i32_169 : i32 to vector<8x64xi32>
    %606 = vector.broadcast %578 : i32 to vector<8x64xi32>
    %607 = arith.select %22, %605, %606 : vector<8x64xi1>, vector<8x64xi32>
    %608 = vector.broadcast %0 : vector<8x1xi32> to vector<8x64xi32>
    %609 = arith.cmpi slt, %607, %608 : vector<8x64xi32>
    %610 = arith.select %609, %604, %576 : vector<8x64xi1>, vector<8x64xf32>
    %611 = arith.select %609, %602, %577 : vector<8x64xi1>, vector<8x64xf32>
    %c5_i32_177 = arith.constant 5 : i32
    %c7_i32_178 = arith.constant 7 : i32
    %612 = arith.subi %c7_i32_178, %c5_i32_177 : i32
    %613 = arith.index_cast %c5_i32_177 : i32 to index
    %c0_179 = arith.constant 0 : index
    %c0_180 = arith.constant 0 : index
    %614 = vector.load %arg12[%613, %c0_179, %c0_180] : memref<8x8x256xbf16, #tpu.memory_space<vmem>>, vector<1x8x256xbf16>
    %615 = vector.shape_cast %614 : vector<1x8x256xbf16> to vector<8x256xbf16>
    %616 = arith.index_cast %612 : i32 to index
    %c0_181 = arith.constant 0 : index
    %c0_182 = arith.constant 0 : index
    %617 = vector.load %arg12[%616, %c0_181, %c0_182] : memref<8x8x256xbf16, #tpu.memory_space<vmem>>, vector<1x8x256xbf16>
    %618 = vector.shape_cast %617 : vector<1x8x256xbf16> to vector<8x256xbf16>
    %619 = arith.select %19, %615, %618 : vector<8x256xi1>, vector<8x256xbf16>
    %620 = arith.truncf %610 : vector<8x64xf32> to vector<8x64xbf16>
    %cst_183 = arith.constant dense<0.000000e+00> : vector<8x256xf32>
    %621 = tpu.matmul %620, %441, %cst_183 {dimension_numbers = #tpu.dot_dimension_numbers<[1], [0], [0], [1], [0, 0, 1, 1], [], []>} : vector<8x64xbf16>, vector<64x256xbf16>, vector<8x256xf32> -> vector<8x256xf32>
    %622 = arith.extf %619 : vector<8x256xbf16> to vector<8x256xf32>
    %623 = arith.addf %622, %621 : vector<8x256xf32>
    %624 = arith.negf %623 : vector<8x256xf32>
    %625 = math.exp %624 : vector<8x256xf32>
    %cst_184 = arith.constant 1.000000e+00 : f32
    %626 = vector.broadcast %cst_184 : f32 to vector<8x256xf32>
    %627 = arith.addf %626, %625 : vector<8x256xf32>
    %628 = arith.divf %626, %627 : vector<8x256xf32>
    %629 = vector.extract_strided_slice %628 {offsets = [0, 0], sizes = [8, 64], strides = [1, 1]} : vector<8x256xf32> to vector<8x64xf32>
    %630 = vector.extract_strided_slice %628 {offsets = [0, 64], sizes = [8, 64], strides = [1, 1]} : vector<8x256xf32> to vector<8x64xf32>
    %631 = vector.extract_strided_slice %623 {offsets = [0, 128], sizes = [8, 64], strides = [1, 1]} : vector<8x256xf32> to vector<8x64xf32>
    %632 = math.tanh %631 : vector<8x64xf32>
    %633 = vector.extract_strided_slice %628 {offsets = [0, 192], sizes = [8, 64], strides = [1, 1]} : vector<8x256xf32> to vector<8x64xf32>
    %634 = arith.mulf %630, %611 : vector<8x64xf32>
    %635 = arith.mulf %629, %632 : vector<8x64xf32>
    %636 = arith.addf %634, %635 : vector<8x64xf32>
    %637 = math.tanh %636 : vector<8x64xf32>
    %638 = arith.mulf %633, %637 : vector<8x64xf32>
    %639 = vector.broadcast %c5_i32_177 : i32 to vector<8x64xi32>
    %640 = vector.broadcast %612 : i32 to vector<8x64xi32>
    %641 = arith.select %22, %639, %640 : vector<8x64xi1>, vector<8x64xi32>
    %642 = vector.broadcast %0 : vector<8x1xi32> to vector<8x64xi32>
    %643 = arith.cmpi slt, %641, %642 : vector<8x64xi32>
    %644 = arith.select %643, %638, %610 : vector<8x64xi1>, vector<8x64xf32>
    %645 = arith.select %643, %636, %611 : vector<8x64xi1>, vector<8x64xf32>
    %c6_i32_185 = arith.constant 6 : i32
    %c7_i32_186 = arith.constant 7 : i32
    %646 = arith.subi %c7_i32_186, %c6_i32_185 : i32
    %647 = arith.index_cast %c6_i32_185 : i32 to index
    %c0_187 = arith.constant 0 : index
    %c0_188 = arith.constant 0 : index
    %648 = vector.load %arg12[%647, %c0_187, %c0_188] : memref<8x8x256xbf16, #tpu.memory_space<vmem>>, vector<1x8x256xbf16>
    %649 = vector.shape_cast %648 : vector<1x8x256xbf16> to vector<8x256xbf16>
    %650 = arith.index_cast %646 : i32 to index
    %c0_189 = arith.constant 0 : index
    %c0_190 = arith.constant 0 : index
    %651 = vector.load %arg12[%650, %c0_189, %c0_190] : memref<8x8x256xbf16, #tpu.memory_space<vmem>>, vector<1x8x256xbf16>
    %652 = vector.shape_cast %651 : vector<1x8x256xbf16> to vector<8x256xbf16>
    %653 = arith.select %19, %649, %652 : vector<8x256xi1>, vector<8x256xbf16>
    %654 = arith.truncf %644 : vector<8x64xf32> to vector<8x64xbf16>
    %cst_191 = arith.constant dense<0.000000e+00> : vector<8x256xf32>
    %655 = tpu.matmul %654, %441, %cst_191 {dimension_numbers = #tpu.dot_dimension_numbers<[1], [0], [0], [1], [0, 0, 1, 1], [], []>} : vector<8x64xbf16>, vector<64x256xbf16>, vector<8x256xf32> -> vector<8x256xf32>
    %656 = arith.extf %653 : vector<8x256xbf16> to vector<8x256xf32>
    %657 = arith.addf %656, %655 : vector<8x256xf32>
    %658 = arith.negf %657 : vector<8x256xf32>
    %659 = math.exp %658 : vector<8x256xf32>
    %cst_192 = arith.constant 1.000000e+00 : f32
    %660 = vector.broadcast %cst_192 : f32 to vector<8x256xf32>
    %661 = arith.addf %660, %659 : vector<8x256xf32>
    %662 = arith.divf %660, %661 : vector<8x256xf32>
    %663 = vector.extract_strided_slice %662 {offsets = [0, 0], sizes = [8, 64], strides = [1, 1]} : vector<8x256xf32> to vector<8x64xf32>
    %664 = vector.extract_strided_slice %662 {offsets = [0, 64], sizes = [8, 64], strides = [1, 1]} : vector<8x256xf32> to vector<8x64xf32>
    %665 = vector.extract_strided_slice %657 {offsets = [0, 128], sizes = [8, 64], strides = [1, 1]} : vector<8x256xf32> to vector<8x64xf32>
    %666 = math.tanh %665 : vector<8x64xf32>
    %667 = vector.extract_strided_slice %662 {offsets = [0, 192], sizes = [8, 64], strides = [1, 1]} : vector<8x256xf32> to vector<8x64xf32>
    %668 = arith.mulf %664, %645 : vector<8x64xf32>
    %669 = arith.mulf %663, %666 : vector<8x64xf32>
    %670 = arith.addf %668, %669 : vector<8x64xf32>
    %671 = math.tanh %670 : vector<8x64xf32>
    %672 = arith.mulf %667, %671 : vector<8x64xf32>
    %673 = vector.broadcast %c6_i32_185 : i32 to vector<8x64xi32>
    %674 = vector.broadcast %646 : i32 to vector<8x64xi32>
    %675 = arith.select %22, %673, %674 : vector<8x64xi1>, vector<8x64xi32>
    %676 = vector.broadcast %0 : vector<8x1xi32> to vector<8x64xi32>
    %677 = arith.cmpi slt, %675, %676 : vector<8x64xi32>
    %678 = arith.select %677, %672, %644 : vector<8x64xi1>, vector<8x64xf32>
    %679 = arith.select %677, %670, %645 : vector<8x64xi1>, vector<8x64xf32>
    %c7_i32_193 = arith.constant 7 : i32
    %c7_i32_194 = arith.constant 7 : i32
    %680 = arith.subi %c7_i32_194, %c7_i32_193 : i32
    %681 = arith.index_cast %c7_i32_193 : i32 to index
    %c0_195 = arith.constant 0 : index
    %c0_196 = arith.constant 0 : index
    %682 = vector.load %arg12[%681, %c0_195, %c0_196] : memref<8x8x256xbf16, #tpu.memory_space<vmem>>, vector<1x8x256xbf16>
    %683 = vector.shape_cast %682 : vector<1x8x256xbf16> to vector<8x256xbf16>
    %684 = arith.index_cast %680 : i32 to index
    %c0_197 = arith.constant 0 : index
    %c0_198 = arith.constant 0 : index
    %685 = vector.load %arg12[%684, %c0_197, %c0_198] : memref<8x8x256xbf16, #tpu.memory_space<vmem>>, vector<1x8x256xbf16>
    %686 = vector.shape_cast %685 : vector<1x8x256xbf16> to vector<8x256xbf16>
    %687 = arith.select %19, %683, %686 : vector<8x256xi1>, vector<8x256xbf16>
    %688 = arith.truncf %678 : vector<8x64xf32> to vector<8x64xbf16>
    %cst_199 = arith.constant dense<0.000000e+00> : vector<8x256xf32>
    %689 = tpu.matmul %688, %441, %cst_199 {dimension_numbers = #tpu.dot_dimension_numbers<[1], [0], [0], [1], [0, 0, 1, 1], [], []>} : vector<8x64xbf16>, vector<64x256xbf16>, vector<8x256xf32> -> vector<8x256xf32>
    %690 = arith.extf %687 : vector<8x256xbf16> to vector<8x256xf32>
    %691 = arith.addf %690, %689 : vector<8x256xf32>
    %692 = arith.negf %691 : vector<8x256xf32>
    %693 = math.exp %692 : vector<8x256xf32>
    %cst_200 = arith.constant 1.000000e+00 : f32
    %694 = vector.broadcast %cst_200 : f32 to vector<8x256xf32>
    %695 = arith.addf %694, %693 : vector<8x256xf32>
    %696 = arith.divf %694, %695 : vector<8x256xf32>
    %697 = vector.extract_strided_slice %696 {offsets = [0, 0], sizes = [8, 64], strides = [1, 1]} : vector<8x256xf32> to vector<8x64xf32>
    %698 = vector.extract_strided_slice %696 {offsets = [0, 64], sizes = [8, 64], strides = [1, 1]} : vector<8x256xf32> to vector<8x64xf32>
    %699 = vector.extract_strided_slice %691 {offsets = [0, 128], sizes = [8, 64], strides = [1, 1]} : vector<8x256xf32> to vector<8x64xf32>
    %700 = math.tanh %699 : vector<8x64xf32>
    %701 = vector.extract_strided_slice %696 {offsets = [0, 192], sizes = [8, 64], strides = [1, 1]} : vector<8x256xf32> to vector<8x64xf32>
    %702 = arith.mulf %698, %679 : vector<8x64xf32>
    %703 = arith.mulf %697, %700 : vector<8x64xf32>
    %704 = arith.addf %702, %703 : vector<8x64xf32>
    %705 = math.tanh %704 : vector<8x64xf32>
    %706 = arith.mulf %701, %705 : vector<8x64xf32>
    %707 = vector.broadcast %c7_i32_193 : i32 to vector<8x64xi32>
    %708 = vector.broadcast %680 : i32 to vector<8x64xi32>
    %709 = arith.select %22, %707, %708 : vector<8x64xi1>, vector<8x64xi32>
    %710 = vector.broadcast %0 : vector<8x1xi32> to vector<8x64xi32>
    %711 = arith.cmpi slt, %709, %710 : vector<8x64xi32>
    %712 = arith.select %711, %706, %678 : vector<8x64xi1>, vector<8x64xf32>
    %713 = arith.select %711, %704, %679 : vector<8x64xi1>, vector<8x64xf32>
    %c8_i32_201 = arith.constant 8 : i32
    %714 = vector.extract_strided_slice %390 {offsets = [0, 0], sizes = [8, 32], strides = [1, 1]} : vector<8x64xf32> to vector<8x32xf32>
    %715 = vector.extract_strided_slice %712 {offsets = [0, 0], sizes = [8, 32], strides = [1, 1]} : vector<8x64xf32> to vector<8x32xf32>
    %716 = vector.extract_strided_slice %390 {offsets = [0, 32], sizes = [8, 32], strides = [1, 1]} : vector<8x64xf32> to vector<8x32xf32>
    %717 = vector.extract_strided_slice %712 {offsets = [0, 32], sizes = [8, 32], strides = [1, 1]} : vector<8x64xf32> to vector<8x32xf32>
    %718 = tpu.concatenate %714, %715, %716, %717 in 1 : vector<8x32xf32>, vector<8x32xf32>, vector<8x32xf32>, vector<8x32xf32> -> vector<8x128xf32>
    %c0_202 = arith.constant 0 : index
    %c0_203 = arith.constant 0 : index
    %719 = vector.load %arg11[%c0_202, %c0_203] : memref<8x128xf32, #tpu.memory_space<vmem>>, vector<8x128xf32>
    tpu.vector_store %arg11[%c0_202, %c0_203], %718 {strides = array<i32>} : memref<8x128xf32, #tpu.memory_space<vmem>>, vector<8x128xf32>,
    return
  }
  func.func @transform_0(%arg0: i32) -> (i32, i32, i32) {
    %c0_i32 = arith.constant 0 : i32
    %c0_i32_0 = arith.constant 0 : i32
    %c0_i32_1 = arith.constant 0 : i32
    return %c0_i32, %arg0, %c0_i32_0 : i32, i32, i32
  }
  func.func @transform_1(%arg0: i32) -> (i32, i32) {
    %c0_i32 = arith.constant 0 : i32
    %c0_i32_0 = arith.constant 0 : i32
    return %arg0, %c0_i32 : i32, i32
  }
  func.func @transform_2(%arg0: i32) -> (i32, i32) {
    %c0_i32 = arith.constant 0 : i32
    %c0_i32_0 = arith.constant 0 : i32
    %c0_i32_1 = arith.constant 0 : i32
    return %c0_i32, %c0_i32_0 : i32, i32
  }
  func.func @transform_3(%arg0: i32) -> (i32, i32) {
    %c0_i32 = arith.constant 0 : i32
    %c0_i32_0 = arith.constant 0 : i32
    %c0_i32_1 = arith.constant 0 : i32
    return %c0_i32, %c0_i32_0 : i32, i32
  }
  func.func @transform_4(%arg0: i32) -> (i32, i32) {
    %c0_i32 = arith.constant 0 : i32
    %c0_i32_0 = arith.constant 0 : i32
    %c0_i32_1 = arith.constant 0 : i32
    return %c0_i32, %c0_i32_0 : i32, i32
  }
  func.func @transform_5(%arg0: i32) -> (i32, i32) {
    %c0_i32 = arith.constant 0 : i32
    %c0_i32_0 = arith.constant 0 : i32
    %c0_i32_1 = arith.constant 0 : i32
    return %c0_i32, %c0_i32_0 : i32, i32
  }
  func.func @transform_6(%arg0: i32) -> (i32, i32) {
    %c0_i32 = arith.constant 0 : i32
    %c0_i32_0 = arith.constant 0 : i32
    %c0_i32_1 = arith.constant 0 : i32
    return %c0_i32, %c0_i32_0 : i32, i32
  }
  func.func @transform_7(%arg0: i32) -> (i32, i32) {
    %c0_i32 = arith.constant 0 : i32
    %c0_i32_0 = arith.constant 0 : i32
    %c0_i32_1 = arith.constant 0 : i32
    return %c0_i32, %c0_i32_0 : i32, i32
  }
  func.func @transform_8(%arg0: i32) -> (i32, i32) {
    %c0_i32 = arith.constant 0 : i32
    %c0_i32_0 = arith.constant 0 : i32
    %c0_i32_1 = arith.constant 0 : i32
    return %c0_i32, %c0_i32_0 : i32, i32
  }
  func.func @transform_9(%arg0: i32) -> (i32, i32) {
    %c0_i32 = arith.constant 0 : i32
    %c0_i32_0 = arith.constant 0 : i32
    %c0_i32_1 = arith.constant 0 : i32
    return %c0_i32, %c0_i32_0 : i32, i32
  }
  func.func @transform_10(%arg0: i32) -> (i32, i32) {
    %c0_i32 = arith.constant 0 : i32
    %c0_i32_0 = arith.constant 0 : i32
    return %arg0, %c0_i32 : i32, i32
  }
}

</mosaic_0001>

<bundles_post_ra>
// kernel: tpu_custom_call.1
= control target key start
LH: loop header
LB: loop body
LE: loop exit
PB: predicated region body
PF: predicated region fallthrough
CT: control target
= control target key end

     0   :  { %15 = vsyncpa [#allocation5], 0  ;;  %s3581_s0 = inlined_call_operand.hbm [shape: f32[8,8,32], index: 0, kind: input, shape index: {}]   ;;  %s3582_s1 = inlined_call_operand.vmem [shape: s32[8,1], index: 1, kind: input, shape index: {}]   ;;  %s3583_s2 = inlined_call_operand.hbm [shape: bf16[32,256], index: 2, kind: input, shape index: {}]   ;;  %s3584_s3 = inlined_call_operand.vmem [shape: f32[1,256], index: 3, kind: input, shape index: {}]   ;;  %s3585_s4 = inlined_call_operand.hbm [shape: bf16[64,256], index: 4, kind: input, shape index: {}]   ;;  %s3586_s5 = inlined_call_operand.vmem [shape: f32[1,64], index: 5, kind: input, shape index: {}]   ;;  %s3587_s6 = inlined_call_operand.vmem [shape: f32[1,64], index: 6, kind: input, shape index: {}]   ;;  %s3588_s7 = inlined_call_operand.hbm [shape: bf16[64,256], index: 7, kind: input, shape index: {}]   ;;  %s3589_s8 = inlined_call_operand.vmem [shape: f32[1,256], index: 8, kind: input, shape index: {}]   ;;  %s3590_s9 = inlined_call_operand.hbm [shape: bf16[64,256], index: 9, kind: input, shape index: {}]   ;;  %s3591_s10 = inlined_call_operand.hbm [shape: f32[8,128], index: 10, kind: output, shape index: {}]  }
   0x1   :  { %16 = vsyncpa [#allocation8], 0 }
   0x2   :  { %17 = vsyncpa [#allocation11], 0 }
   0x3   :  { %18 = vsyncpa [#allocation6], 0  ;;  %s2796_s13 = smov [#allocation7]   ;;  %s2797_s15 = smov [#allocation10]  }
   0x4   :  { %s38_s14 = sshll.u32 %s2796_s13, 4  ;;  %s68_s16 = sshll.u32 %s2797_s15, 4  ;;  %s39_s14 = int_to_ptr.vmem [resolvable:$true] %s38_s14  ;;  %s2869_s16 = int_to_ptr.vmem [resolvable:$true] %s68_s16 }
   0x5   :  { %s2656_s19 = scalar_lea.hbm %s3583_s2, 512 }
   0x6   :  { %p2657_p0 = scmp.ne.s32.totalorder %s3583_s2, %s2656_s19  ;;  %p2660_p1 = scmp.lt.u32.totalorder %s2656_s19, %s3583_s2 }
   0x8   :  { %p2662_p2 = pnand %p2660_p1, %p2657_p0 }
   0xa   :  { %2665 = shalt.err (!%p2662_p2)
}
   0xb   :  { %s2666_s24 = scalar_lea.vmem %s39_s14, 512  ;;  %p2671_p4 = scmp.lt.s32.totalorder %s39_s14, %s39_s14 }
   0xc   :  { %p2667_p3 = scmp.ne.s32.totalorder %s39_s14, %s2666_s24  ;;  %p2672_p5 = scmp.lt.s32.totalorder %s2666_s24, %s2666_s24 }
   0xe   :  { %p2673_p6 = por %p2672_p5, %p2671_p4 }
  0x10   :  { %p2674_p7 = pnand %p2673_p6, %p2667_p3 }
  0x12   :  { %2677 = shalt.err (!%p2674_p7)
}
  0x13   :  { %s2798_s25 = smov 128   ;;  %s2799_s26 = smov 8  }
  0x14   :  { %44 = dma.hbm_to_vmem [thread:$0]  %s3583_s2, 512, %s39_s14, [#allocation8], %s2798_s25, %s2798_s25, %s2799_s26  }
  0x15   :  { %s2678_s11 = scalar_lea.hbm %s3588_s7, 1024 }
  0x16   :  { %p2679_p8 = scmp.ne.s32.totalorder %s3588_s7, %s2678_s11  ;;  %p2682_p9 = scmp.lt.u32.totalorder %s2678_s11, %s3588_s7 }
  0x18   :  { %p2684_p10 = pnand %p2682_p9, %p2679_p8 }
  0x1a   :  { %2687 = shalt.err (!%p2684_p10)
}
  0x1b   :  { %s2688_s18 = scalar_lea.vmem %s2869_s16, 1024  ;;  %p2693_p12 = scmp.lt.s32.totalorder %s2869_s16, %s2869_s16 }
  0x1c   :  { %p2689_p11 = scmp.ne.s32.totalorder %s2869_s16, %s2688_s18  ;;  %p2694_p13 = scmp.lt.s32.totalorder %s2688_s18, %s2688_s18 }
  0x1e   :  { %p2695_p0 = por %p2694_p13, %p2693_p12 }
  0x20   :  { %p2696_p1 = pnand %p2695_p0, %p2689_p11 }
  0x22   :  { %2699 = shalt.err (!%p2696_p1)
}
  0x23   :  { %74 = dma.hbm_to_vmem [thread:$0]  %s3588_s7, 1024, %s2869_s16, [#allocation11], %s2798_s25, %s2798_s25, %s2799_s26  }
  0x24   :  { %s2800_s19 = smov [#allocation4]   ;;  %s2801_s21 = smov [#allocation9]  }
  0x25   :  { %s24_s20 = sshll.u32 %s2800_s19, 4  ;;  %s52_s22 = sshll.u32 %s2801_s21, 4  ;;  %s25_s20 = int_to_ptr.vmem [resolvable:$true] %s24_s20  ;;  %s2906_s22 = int_to_ptr.vmem [resolvable:$true] %s52_s22 }
  0x26   :  { %s2700_s27 = scalar_lea.hbm %s3581_s0, 1024 }
  0x27   :  { %p2701_p2 = scmp.ne.s32.totalorder %s3581_s0, %s2700_s27  ;;  %p2704_p3 = scmp.lt.u32.totalorder %s2700_s27, %s3581_s0 }
  0x29   :  { %p2706_p4 = pnand %p2704_p3, %p2701_p2 }
  0x2b   :  { %2709 = shalt.err (!%p2706_p4)
}
  0x2c   :  { %s2710_s7 = scalar_lea.vmem %s25_s20, 1024  ;;  %p2715_p6 = scmp.lt.s32.totalorder %s25_s20, %s25_s20 }
  0x2d   :  { %p2711_p5 = scmp.ne.s32.totalorder %s25_s20, %s2710_s7  ;;  %p2716_p7 = scmp.lt.s32.totalorder %s2710_s7, %s2710_s7 }
  0x2f   :  { %p2717_p8 = por %p2716_p7, %p2715_p6 }
  0x31   :  { %p2718_p9 = pnand %p2717_p8, %p2711_p5 }
  0x33   :  { %2721 = shalt.err (!%p2718_p9)
}
  0x34   :  { %30 = dma.hbm_to_vmem [thread:$0]  %s3581_s0, 1024, %s25_s20, [#allocation5], %s2798_s25, %s2798_s25, %s2799_s26  }
  0x35   :  { %s2722_s17 = scalar_lea.hbm %s3585_s4, 1024 }
  0x36   :  { %p2723_p10 = scmp.ne.s32.totalorder %s3585_s4, %s2722_s17  ;;  %p2726_p11 = scmp.lt.u32.totalorder %s2722_s17, %s3585_s4 }
  0x38   :  { %p2728_p12 = pnand %p2726_p11, %p2723_p10 }
  0x3a   :  { %2731 = shalt.err (!%p2728_p12)
}
  0x3b   :  { %s2732_s21 = scalar_lea.vmem %s2906_s22, 1024  ;;  %p2737_p0 = scmp.lt.s32.totalorder %s2906_s22, %s2906_s22 }
  0x3c   :  { %p2733_p13 = scmp.ne.s32.totalorder %s2906_s22, %s2732_s21  ;;  %p2738_p1 = scmp.lt.s32.totalorder %s2732_s21, %s2732_s21 }
  0x3e   :  { %p2739_p2 = por %p2738_p1, %p2737_p0 }
  0x40   :  { %p2740_p3 = pnand %p2739_p2, %p2733_p13 }
  0x42   :  { %2743 = shalt.err (!%p2740_p3)
}
  0x43   :  { %58 = dma.hbm_to_vmem [thread:$0]  %s3585_s4, 1024, %s2906_s22, [#allocation8], %s2798_s25, %s2798_s25, %s2799_s26  }
  0x44   :  { %s2802_s23 = smov [#allocation12]   ;;  %s2744_s29 = scalar_lea.hbm %s3590_s9, 1024 }
  0x45   :  { %s82_s24 = sshll.u32 %s2802_s23, 4  ;;  %p2745_p4 = scmp.ne.s32.totalorder %s3590_s9, %s2744_s29  ;;  %s83_s24 = int_to_ptr.vmem [resolvable:$true] %s82_s24 }
  0x46   :  { %p2748_p5 = scmp.lt.u32.totalorder %s2744_s29, %s3590_s9 }
  0x48   :  { %p2750_p6 = pnand %p2748_p5, %p2745_p4 }
  0x4a   :  { %2753 = shalt.err (!%p2750_p6)
}
  0x4b   :  { %s2754_s12 = scalar_lea.vmem %s83_s24, 1024  ;;  %p2759_p8 = scmp.lt.s32.totalorder %s83_s24, %s83_s24 }
  0x4c   :  { %p2755_p7 = scmp.ne.s32.totalorder %s83_s24, %s2754_s12  ;;  %p2760_p9 = scmp.lt.s32.totalorder %s2754_s12, %s2754_s12 }
  0x4e   :  { %p2761_p10 = por %p2760_p9, %p2759_p8 }
  0x50   :  { %p2762_p11 = pnand %p2761_p10, %p2755_p7 }
  0x52   :  { %2765 = shalt.err (!%p2762_p11)
}
  0x53   :  { %88 = dma.hbm_to_vmem [thread:$0]  %s3590_s9, 1024, %s83_s24, [#allocation11], %s2798_s25, %s2798_s25, %s2799_s26  }
  0x54   :  { %2788 = dma.done.wait [#allocation5], 1024  }
  0x55   :  { %2789 = vsyncadd [#allocation5], 4294966272 }
  0x56   :  { %2790 = dma.done.wait [#allocation8], 1536  }
  0x57   :  { %2791 = vsyncadd [#allocation8], 4294965760 }
  0x58   :  { %2792 = dma.done.wait [#allocation11], 2048  }
  0x59   :  { %2793 = vsyncadd [#allocation11], 4294965248  ;;  %v2803_v0 = vmov 0   ;;  %v2406_v1 = vld [vmem:[#allocation7 + $0x4] ss:$8 sps:$4 sm:$0xff]   ;;  %vm184_vm0 = vcmask 261120   ;;  %v106_v25 = vlaneseq }
  0x5a   :  { %229 = vmatprep.mubr.bf16.mxu0 %v2803_v0  ;;  %431 = vmatprep.mubr.bf16.mxu1 %v2803_v0  ;;  %v2408_v2 = vld [vmem:[#allocation7] ss:$8 sps:$4 sm:$0xff]   ;;  %v2409_v3 = vld [vmem:[#allocation7 + $0x14] ss:$8 sps:$4 sm:$0xff]   ;;  %v2411_v4 = vld [vmem:[#allocation7 + $0x10] ss:$8 sps:$4 sm:$0xff]  }
  0x5b   :  { %2405 = vset.pattern.permute.xlu0 %v2803_v0  ;;  %197 = vmatprep.subr.bf16.mxu0 %v2406_v1  ;;  %v136_v5 = vld [vmem:[#allocation4] sm:$0xff]  ;;  %v137_v6 = vld [vmem:[#allocation4 + $0x8] sm:$0xff]  ;;  %v2966_v10 = vld [vmem:[#allocation9 + $0x14] ss:$8 sps:$4 sm:$0xff]   ;;  %v3013_v26 = vshrl.u32 %v106_v25, 7  ;;  %v3024_v40 = vand.u32 127, %v106_v25 }
  0x5c   :  { %198 = vmatpush1.bf16.msra.mxu0 %v2408_v2  ;;  %v2961_v7 = vld [vmem:[#allocation9 + $0x4] ss:$8 sps:$4 sm:$0xff]   ;;  %v2963_v8 = vld [vmem:[#allocation9] ss:$8 sps:$4 sm:$0xff]   ;;  %v144_v9 = vpack.c.bf16 %v137_v6, %v136_v5  ;;  %v2969_v11 = vld [vmem:[#allocation9 + $0x10] ss:$8 sps:$4 sm:$0xff]  }
  0x5d   :  { %199 = vmatprep.subr.bf16.mxu0 %v2409_v3  ;;  %399 = vmatprep.subr.bf16.mxu1 %v2961_v7  ;;  %v2972_v12 = vld [vmem:[#allocation9 + $0x24] ss:$8 sps:$4 sm:$0xff]   ;;  %v138_v13 = vld [vmem:[#allocation4 + $0x10] sm:$0xff]  ;;  %v139_v14 = vld [vmem:[#allocation4 + $0x18] sm:$0xff]  ;;  %v156_v27 = vsub.s32 0, %v3013_v26  ;;  %v160_v29 = vsub.s32 1, %v3013_v26 }
  0x5e   :  { %400 = vmatpush1.bf16.msra.mxu1 %v2963_v8  ;;  %v2976_v15 = vld [vmem:[#allocation9 + $0x20] ss:$8 sps:$4 sm:$0xff]   ;;  %v2978_v16 = vld [vmem:[#allocation9 + $0x34] ss:$8 sps:$4 sm:$0xff]   ;;  %v2984_v17 = vld [vmem:[#allocation9 + $0x30] ss:$8 sps:$4 sm:$0xff]   ;;  %v145_v18 = vpack.c.bf16 %v139_v14, %v138_v13 }
  0x5f   :  { %401 = vmatprep.subr.bf16.mxu1 %v2966_v10  ;;  %v140_v19 = vld [vmem:[#allocation4 + $0x20] sm:$0xff]  ;;  %v141_v20 = vld [vmem:[#allocation4 + $0x28] sm:$0xff]  ;;  %v142_v22 = vld [vmem:[#allocation4 + $0x30] sm:$0xff]  ;;  %v108_v43 = vadd.s32 128, %v3024_v40  ;;  %v113_v51 = vand.u32 63, %v3024_v40  ;;  %vm135_vm4 = vcmp.lt.s32.totalorder %v3024_v40, 32 }
  0x60   :  { %200 = vmatpush1.bf16.msra.mxu0 %v2411_v4  ;;  %v146_v21 = vpack.c.bf16 %v141_v20, %v140_v19  ;;  %v143_v23 = vld [vmem:[#allocation4 + $0x38] sm:$0xff]  ;;  %v152_v28 = vld [vmem:[%s3584_s3] sm:$0x3]  ;;  %s2804_s3 = smov 64   ;;  %vm483_vm6 = vcmask 523520   ;;  %vm395_vm7 = vcmask 523264  }
  0x61   :  { %591 = vmatprep.subr.bf16.mxu0 %v2961_v7  ;;  %v147_v24 = vpack.c.bf16 %v143_v23, %v142_v22  ;;  %v157_v30 = vrot.slane %v152_v28, %v156_v27  ;;  %v161_v31 = vrot.slane %v152_v28, %v160_v29  ;;  %v120_v52 = vand.u32 63, %v108_v43  ;;  %s2813_s2 = smov [#allocation13]  }
  0x62   :  { %402 = vmatpush1.bf16.msra.mxu1 %v2969_v11  ;;  %vm133_vm1 = vcmp.lt.s32.totalorder %v113_v51, 32  ;;  %s2260_s14 = sshll.u32 %s2813_s2, 4  ;;  %vm2251_vm15 = vcmask 785408   ;;  %s2261_s14 = int_to_ptr.vmem [resolvable:$true] %s2260_s14 }
  0x63   :  { %2275 = vmatmul.mubr.msk.bf16.vlgmr.msra.gmra.mrb[0].mxu0 %vm184_vm0, %v144_v9  ;;  %403 = vmatprep.subr.bf16.mxu1 %v2972_v12  ;;  %vm134_vm2 = vcmp.lt.s32.totalorder %v120_v52, 32  ;;  %s2766_s19 = scalar_lea.vmem %s2261_s14, 128  ;;  %p2771_p13 = scmp.lt.s32.totalorder %s2261_s14, %s2261_s14 }
  0x64   :  { %239 = vmatprep.mubr.bf16.mxu0 %v2803_v0  ;;  %592 = vmatpush1.bf16.msra.mxu0 %v2963_v8  ;;  %vm3028_vm3 = vmpackc.low %vm134_vm2, %vm133_vm1  ;;  %p2767_p12 = scmp.ne.s32.totalorder %s2261_s14, %s2766_s19  ;;  %p2772_p0 = scmp.lt.s32.totalorder %s2766_s19, %s2766_s19 }
  0x65   :  { %593 = vmatprep.subr.bf16.mxu0 %v2966_v10 }
  0x66   :  { %404 = vmatpush1.bf16.msra.mxu1 %v2976_v15  ;;  %p2773_p1 = por %p2772_p0, %p2771_p13 }
  0x67   :  { %405 = vmatprep.subr.bf16.mxu1 %v2978_v16 }
  0x68   :  { %594 = vmatpush1.bf16.msra.mxu0 %v2969_v11  ;;  %p2774_p2 = pnand %p2773_p1, %p2767_p12 }
  0x69   :  { %595 = vmatprep.subr.bf16.mxu0 %v2972_v12 }
  0x6a   :  { %406 = vmatpush1.bf16.msra.mxu1 %v2984_v17 }
  0x6b   :  { %2276 = vmatmul.mubr.msk.bf16.gmra.mrb[4].mxu0 %vm184_vm0, %v145_v18  ;;  %494 = vmatprep.subr.bf16.mxu1 %v2961_v7 }
  0x6c   :  { %249 = vmatprep.mubr.bf16.mxu0 %v2803_v0  ;;  %596 = vmatpush1.bf16.msra.mxu0 %v2976_v15 }
  0x6d   :  { %597 = vmatprep.subr.bf16.mxu0 %v2978_v16  ;;  %432 = vmatmul.mubr.bf16.vlgmr.msra.gmra.mrb[0].mxu1 %v2803_v0 }
  0x6e   :  { %495 = vmatpush1.bf16.msra.mxu1 %v2963_v8  ;;  %526 = vmatprep.mubr.bf16.mxu1 %v2803_v0 }
  0x6f   :  { %496 = vmatprep.subr.bf16.mxu1 %v2966_v10 }
  0x70   :  { %598 = vmatpush1.bf16.msra.mxu0 %v2984_v17 }
  0x71   :  { %783 = vmatprep.subr.bf16.mxu0 %v2961_v7 }
  0x72   :  { %497 = vmatpush1.bf16.msra.mxu1 %v2969_v11 }
  0x73   :  { %2277 = vmatmul.mubr.msk.bf16.gmra.mrb[8].mxu0 %vm184_vm0, %v146_v21  ;;  %498 = vmatprep.subr.bf16.mxu1 %v2972_v12 }
  0x74   :  { %259 = vmatprep.mubr.bf16.mxu0 %v2803_v0 }
  0x76   :  { %499 = vmatpush1.bf16.msra.mxu1 %v2976_v15 }
  0x77   :  { %500 = vmatprep.subr.bf16.mxu1 %v2978_v16 }
  0x7a   :  { %501 = vmatpush1.bf16.msra.mxu1 %v2984_v17 }
  0x7b   :  { %2278 = vmatmul.mubr.msk.bf16.gmra.mrb[12].mxu0 %vm184_vm0, %v147_v24  ;;  %688 = vmatprep.subr.bf16.mxu1 %v2961_v7 }
  0x7c   :  { %623 = vmatprep.mubr.bf16.mxu0 %v2803_v0 }
 0x136   :  { %v231_v32 = vpop.f32.mrb[0].mxu0 }
 0x137   :  { %v232_v33 = vadd.f32 %v231_v32, %v157_v30  ;;  %v233_v34 = vpop.f32.mrb[1].mxu0 }
 0x138   :  { %v234_v35 = vadd.f32 %v233_v34, %v161_v31  ;;  %v235_v36 = vpop.f32.mrb[2].mxu0 }
 0x139   :  { %v236_v37 = vadd.f32 %v235_v36, %v157_v30  ;;  %v237_v38 = vpop.f32.mrb[3].mxu0 }
 0x13a   :  { %v2371_v39 = vpack.c.bf16 %v234_v35, %v232_v33  ;;  %v238_v41 = vadd.f32 %v237_v38, %v161_v31 }
 0x13c   :  { %v2372_v42 = vpack.c.bf16 %v238_v41, %v236_v37 }
 0x13e   :  { %v241_v44 = vpop.f32.mrb[4].mxu0 }
 0x13f   :  { %v242_v45 = vadd.f32 %v241_v44, %v157_v30  ;;  %v243_v46 = vpop.f32.mrb[5].mxu0 }
 0x140   :  { %v244_v47 = vadd.f32 %v243_v46, %v161_v31  ;;  %v245_v48 = vpop.f32.mrb[6].mxu0  ;;  %v433_v55 = vpop.f32.mrb[0].mxu1 }
 0x141   :  { %v246_v49 = vadd.f32 %v245_v48, %v157_v30  ;;  %v247_v50 = vpop.f32.mrb[7].mxu0  ;;  %v435_v56 = vpop.f32.mrb[1].mxu1 }
 0x142   :  { %v2373_v53 = vpack.c.bf16 %v244_v47, %v242_v45  ;;  %v248_v54 = vadd.f32 %v247_v50, %v161_v31  ;;  %v437_v58 = vpop.f32.mrb[2].mxu1 }
 0x143   :  { %v438_v59 = vpop.f32.mrb[3].mxu1 }
 0x144   :  { %v2374_v57 = vpack.c.bf16 %v248_v54, %v246_v49  ;;  %v2805_v59 = vmov 7  }
 0x146   :  { %v251_v60 = vpop.f32.mrb[8].mxu0 }
 0x147   :  { %v252_v61 = vadd.f32 %v251_v60, %v157_v30  ;;  %v253_v62 = vpop.f32.mrb[9].mxu0  ;;  %v3073_v60 = vsel %vm135_vm4, 0, %v2805_v59 }
 0x148   :  { %v254_v63 = vadd.f32 %v253_v62, %v161_v31  ;;  %v255_v1 = vpop.f32.mrb[10].mxu0 }
 0x149   :  { %v256_v3 = vadd.f32 %v255_v1, %v157_v30  ;;  %v257_v4 = vpop.f32.mrb[11].mxu0 }
 0x14a   :  { %v2375_v5 = vpack.c.bf16 %v254_v63, %v252_v61  ;;  %v258_v6 = vadd.f32 %v257_v4, %v161_v31 }
 0x14c   :  { %v2376_v9 = vpack.c.bf16 %v258_v6, %v256_v3  ;;  %v3034_v13 = vsel %vm3028_vm3, %v2374_v57, %v2375_v5  ;;  %v3038_v14 = vsel %vm3028_vm3, %v2375_v5, %v2374_v57 }
 0x14e   :  { %v261_v18 = vpop.f32.mrb[12].mxu0  ;;  %v3042_v19 = vsel %vm3028_vm3, %v2373_v53, %v2376_v9  ;;  %v3046_v20 = vsel %vm3028_vm3, %v2376_v9, %v2373_v53 }
 0x14f   :  { %v262_v21 = vadd.f32 %v261_v18, %v157_v30  ;;  %v263_v22 = vpop.f32.mrb[13].mxu0 }
 0x150   :  { %v264_v23 = vadd.f32 %v263_v22, %v161_v31  ;;  %v265_v24 = vpop.f32.mrb[14].mxu0 }
 0x151   :  { %v266_v25 = vadd.f32 %v265_v24, %v157_v30  ;;  %v267_v28 = vpop.f32.mrb[15].mxu0 }
 0x152   :  { %v2377_v32 = vpack.c.bf16 %v264_v23, %v262_v21  ;;  %v268_v33 = vadd.f32 %v267_v28, %v161_v31 }
 0x154   :  { %v2378_v34 = vpack.c.bf16 %v268_v33, %v266_v25  ;;  %v3050_v35 = vsel %vm3028_vm3, %v2372_v42, %v2377_v32  ;;  %v3054_v36 = vsel %vm3028_vm3, %v2377_v32, %v2372_v42 }
 0x155   :  { %v535_v4 = vunpack.c.l.bf16 %v3050_v35  ;;  %v536_v6 = vunpack.c.h.bf16 %v3050_v35 }
 0x156   :  { %v354_v37 = vsel %vm3028_vm3, %v2371_v39, %v2378_v34  ;;  %v3060_v38 = vsel %vm3028_vm3, %v2378_v34, %v2371_v39  ;;  %v105_v39 = vld [vmem:[%s3582_s1] sm:$0xff] }
 0x157   :  { %v440_v30 = vunpack.c.l.bf16 %v354_v37  ;;  %v441_v41 = vunpack.c.h.bf16 %v354_v37 }
 0x159   :  { %v442_v43 = vadd.f32 %v440_v30, %v433_v55  ;;  %v443_v31 = vadd.f32 %v441_v41, %v435_v56 }
 0x15b   :  { %v2295_v44 = vmul.f32 -1.442695, %v442_v43  ;;  %v2296_v49 = vmul.f32 -1.442695, %v443_v31 }
 0x15d   :  { %2448 = vpow2.f32 %v2295_v44 }
 0x15e   :  { %2450 = vtanh.f32 %v443_v31 }
 0x167   :  { %v2449_v45 = vpop.eup %2448 }
 0x168   :  { %v450_v46 = vadd.f32 1.0, %v2449_v45  ;;  %v2451_v47 = vpop.eup %2450 }
 0x16a   :  { %2452 = vrcp.f32 %v450_v46 }
 0x16b   :  { %2454 = vpow2.f32 %v2296_v49 }
 0x174   :  { %v2453_v42 = vpop.eup %2452 }
 0x175   :  { %v458_v48 = vmul.f32 %v2453_v42, %v2451_v47  ;;  %v2455_v50 = vpop.eup %2454  ;;  %v457_v52 = vmul.f32 0.0, %v2453_v42  ;;  %v2806_v42 = vmov 6  }
 0x176   :  { %v451_v51 = vadd.f32 1.0, %v2455_v50 }
 0x177   :  { %460 = vrot.lane.b32.xlu0 %v458_v48, %s2804_s3  ;;  %v565_v48 = vsel %vm135_vm4, 1, %v2806_v42 }
 0x178   :  { %2456 = vrcp.f32 %v451_v51 }
 0x17b   :  { %468 = vperm.xlu0 %2405, %v105_v39  }
 0x182   :  { %v2457_v55 = vpop.eup %2456 }
 0x1e9   :  { %v461_v53 = vpop.permute.xlu0 %460 }
 0x1ea   :  { %v463_v54 = vadd.f32 %v461_v53, %v457_v52 }
 0x1ec   :  { %2458 = vtanh.f32 %v463_v54 }
 0x1f6   :  { %v2459_v56 = vpop.eup %2458 }
 0x1f7   :  { %v465_v57 = vmul.f32 %v2459_v56, %v2457_v55  ;;  %v632_v55 = vunpack.c.l.bf16 %v3042_v19 }
 0x1f9   :  { %472 = vrot.lane.b32.xlu1 %v465_v57, %s2804_s3  ;;  %v633_v57 = vunpack.c.h.bf16 %v3042_v19 }
 0x1fa   :  { %v3069_v58 = vpop.permute.xlu0 %468 }
 0x1fb   :  { %vm470_vm5 = vcmp.lt.s32.totalorder %v3073_v60, %v3069_v58  ;;  %vm3104_vm8 = vcmp.lt.s32.totalorder %v565_v48, %v3069_v58  ;;  %v730_v48 = vunpack.c.h.bf16 %v3034_v13 }
 0x1fd   :  { %477 = vrot.lane.b32.xlu1 %v463_v54, %s2804_s3 }
 0x26b   :  { %v473_v61 = vpop.permute.xlu1 %472 }
 0x26c   :  { %v475_v62 = vsel %vm470_vm5, %v473_v61, 0.0 }
 0x26d   :  { %481 = vst.msk [vmem:[#allocation3] sm:$0xff] %vm184_vm0, %v475_v62  ;;  %v490_v63 = vpack.c.bf16 %v475_v62, %v475_v62 }
 0x26e   :  { %484 = vst.msk [vmem:[#allocation3 + $0x38] sm:$0xff] %vm483_vm6, %v475_v62 }
 0x26f   :  { %v478_v1 = vpop.permute.xlu1 %477  ;;  %2297 = vmatmul.mubr.msk.bf16.vlgmr.msra.gmra.mrb[4].mxu1 %vm395_vm7, %v490_v63 }
 0x270   :  { %v480_v3 = vsel %vm470_vm5, %v478_v1, 0.0  ;;  %689 = vmatpush1.bf16.msra.mxu1 %v2963_v8  ;;  %720 = vmatprep.mubr.bf16.mxu1 %v2803_v0 }
 0x271   :  { %553 = vrot.lane.b32.xlu1 %v480_v3, %s2804_s3  ;;  %690 = vmatprep.subr.bf16.mxu1 %v2966_v10 }
 0x274   :  { %691 = vmatpush1.bf16.msra.mxu1 %v2969_v11 }
 0x275   :  { %692 = vmatprep.subr.bf16.mxu1 %v2972_v12 }
 0x278   :  { %693 = vmatpush1.bf16.msra.mxu1 %v2976_v15 }
 0x279   :  { %694 = vmatprep.subr.bf16.mxu1 %v2978_v16 }
 0x27c   :  { %695 = vmatpush1.bf16.msra.mxu1 %v2984_v17 }
 0x27d   :  { %876 = vmatprep.subr.bf16.mxu1 %v2961_v7 }
 0x2e3   :  { %v554_v35 = vpop.permute.xlu1 %553 }
 0x342   :  { %v528_v5 = vpop.f32.mrb[4].mxu1 }
 0x343   :  { %v537_v9 = vadd.f32 %v535_v4, %v528_v5  ;;  %v530_v18 = vpop.f32.mrb[5].mxu1 }
 0x344   :  { %v538_v21 = vadd.f32 %v536_v6, %v530_v18  ;;  %v532_v22 = vpop.f32.mrb[6].mxu1 }
 0x345   :  { %v2298_v23 = vmul.f32 -1.442695, %v537_v9  ;;  %v533_v24 = vpop.f32.mrb[7].mxu1 }
 0x346   :  { %v2299_v37 = vmul.f32 -1.442695, %v538_v21 }
 0x347   :  { %2460 = vpow2.f32 %v2298_v23 }
 0x348   :  { %2462 = vtanh.f32 %v538_v21 }
 0x351   :  { %v2461_v25 = vpop.eup %2460 }
 0x352   :  { %v545_v28 = vadd.f32 1.0, %v2461_v25  ;;  %v2463_v32 = vpop.eup %2462 }
 0x354   :  { %2464 = vrcp.f32 %v545_v28 }
 0x355   :  { %2466 = vpow2.f32 %v2299_v37  ;;  %v2807_v37 = vmov 5  }
 0x35e   :  { %v2465_v33 = vpop.eup %2464 }
 0x35f   :  { %v557_v34 = vmul.f32 %v2465_v33, %v2463_v32  ;;  %v2467_v30 = vpop.eup %2466  ;;  %v556_v43 = vmul.f32 %v2465_v33, %v554_v35 }
 0x360   :  { %v546_v41 = vadd.f32 1.0, %v2467_v30  ;;  %v662_v30 = vsel %vm135_vm4, 2, %v2807_v37  ;;  %v825_v37 = vunpack.c.h.bf16 %v3038_v14 }
 0x361   :  { %559 = vrot.lane.b32.xlu0 %v557_v34, %s2804_s3  ;;  %vm3135_vm9 = vcmp.lt.s32.totalorder %v662_v30, %v3069_v58 }
 0x362   :  { %2468 = vrcp.f32 %v546_v41 }
 0x36c   :  { %v2469_v45 = vpop.eup %2468 }
 0x3d3   :  { %v560_v31 = vpop.permute.xlu0 %559 }
 0x3d4   :  { %v562_v44 = vadd.f32 %v560_v31, %v556_v43 }
 0x3d6   :  { %2470 = vtanh.f32 %v562_v44  ;;  %573 = vrot.lane.b32.xlu0 %v562_v44, %s2804_s3 }
 0x3e0   :  { %v2471_v46 = vpop.eup %2470 }
 0x3e1   :  { %v564_v47 = vmul.f32 %v2471_v46, %v2469_v45 }
 0x3e3   :  { %568 = vrot.lane.b32.xlu1 %v564_v47, %s2804_s3  ;;  %v729_v47 = vunpack.c.l.bf16 %v3034_v13 }
 0x448   :  { %v574_v39 = vpop.permute.xlu0 %573 }
 0x449   :  { %v576_v50 = vsel %vm3104_vm8, %v574_v39, %v480_v3 }
 0x44a   :  { %650 = vrot.lane.b32.xlu1 %v576_v50, %s2804_s3 }
 0x455   :  { %v569_v51 = vpop.permute.xlu1 %568 }
 0x456   :  { %v571_v52 = vsel %vm3104_vm8, %v569_v51, %v475_v62  ;;  %v577_v53 = vsel %vm3104_vm8, %v569_v51, 0.0 }
 0x457   :  { %579 = vst.msk [vmem:[#allocation3 + $0x8] sm:$0xff] %vm184_vm0, %v577_v53  ;;  %v587_v54 = vpack.c.bf16 %v571_v52, %v571_v52 }
 0x458   :  { %581 = vst.msk [vmem:[#allocation3 + $0x30] sm:$0xff] %vm483_vm6, %v577_v53 }
 0x459   :  { %2300 = vmatmul.mubr.msk.bf16.vlgmr.msra.gmra.mrb[16].mxu0 %vm395_vm7, %v587_v54 }
 0x45a   :  { %784 = vmatpush1.bf16.msra.mxu0 %v2963_v8  ;;  %815 = vmatprep.mubr.bf16.mxu0 %v2803_v0 }
 0x45b   :  { %785 = vmatprep.subr.bf16.mxu0 %v2966_v10 }
 0x45e   :  { %786 = vmatpush1.bf16.msra.mxu0 %v2969_v11 }
 0x45f   :  { %787 = vmatprep.subr.bf16.mxu0 %v2972_v12 }
 0x462   :  { %788 = vmatpush1.bf16.msra.mxu0 %v2976_v15 }
 0x463   :  { %789 = vmatprep.subr.bf16.mxu0 %v2978_v16 }
 0x466   :  { %790 = vmatpush1.bf16.msra.mxu0 %v2984_v17 }
 0x467   :  { %969 = vmatprep.subr.bf16.mxu0 %v2961_v7 }
 0x4bc   :  { %v651_v19 = vpop.permute.xlu1 %650 }
 0x52c   :  { %v625_v56 = vpop.f32.mrb[16].mxu0 }
 0x52d   :  { %v634_v59 = vadd.f32 %v632_v55, %v625_v56  ;;  %v627_v61 = vpop.f32.mrb[17].mxu0 }
 0x52e   :  { %v635_v62 = vadd.f32 %v633_v57, %v627_v61  ;;  %v629_v63 = vpop.f32.mrb[18].mxu0 }
 0x52f   :  { %v2301_v1 = vmul.f32 -1.442695, %v634_v59  ;;  %v630_v3 = vpop.f32.mrb[19].mxu0 }
 0x530   :  { %v2302_v21 = vmul.f32 -1.442695, %v635_v62 }
 0x531   :  { %2472 = vpow2.f32 %v2301_v1 }
 0x532   :  { %2474 = vtanh.f32 %v635_v62 }
 0x53b   :  { %v2473_v4 = vpop.eup %2472 }
 0x53c   :  { %v642_v5 = vadd.f32 1.0, %v2473_v4  ;;  %v2475_v6 = vpop.eup %2474 }
 0x53e   :  { %2476 = vrcp.f32 %v642_v5 }
 0x53f   :  { %2478 = vpow2.f32 %v2302_v21 }
 0x548   :  { %v2477_v9 = vpop.eup %2476 }
 0x549   :  { %v654_v18 = vmul.f32 %v2477_v9, %v2475_v6  ;;  %v2479_v22 = vpop.eup %2478  ;;  %v653_v24 = vmul.f32 %v2477_v9, %v651_v19 }
 0x54a   :  { %v643_v23 = vadd.f32 1.0, %v2479_v22 }
 0x54b   :  { %656 = vrot.lane.b32.xlu0 %v654_v18, %s2804_s3  ;;  %v2808_v18 = vmov 4  }
 0x54c   :  { %2480 = vrcp.f32 %v643_v23  ;;  %v759_v21 = vsel %vm135_vm4, 3, %v2808_v18  ;;  %v918_v18 = vunpack.c.h.bf16 %v3046_v20 }
 0x54d   :  { %vm3166_vm10 = vcmp.lt.s32.totalorder %v759_v21, %v3069_v58 }
 0x556   :  { %v2481_v32 = vpop.eup %2480 }
 0x5bd   :  { %v657_v25 = vpop.permute.xlu0 %656 }
 0x5be   :  { %v659_v28 = vadd.f32 %v657_v25, %v653_v24 }
 0x5c0   :  { %2482 = vtanh.f32 %v659_v28  ;;  %670 = vrot.lane.b32.xlu0 %v659_v28, %s2804_s3 }
 0x5ca   :  { %v2483_v33 = vpop.eup %2482 }
 0x5cb   :  { %v661_v34 = vmul.f32 %v2483_v33, %v2481_v32  ;;  %v824_v33 = vunpack.c.l.bf16 %v3038_v14 }
 0x5cd   :  { %665 = vrot.lane.b32.xlu1 %v661_v34, %s2804_s3 }
 0x632   :  { %v671_v35 = vpop.permute.xlu0 %670 }
 0x633   :  { %v673_v43 = vsel %vm3135_vm9, %v671_v35, %v576_v50 }
 0x634   :  { %747 = vrot.lane.b32.xlu1 %v673_v43, %s2804_s3 }
 0x63f   :  { %v666_v31 = vpop.permute.xlu1 %665 }
 0x640   :  { %v668_v44 = vsel %vm3135_vm9, %v666_v31, %v571_v52  ;;  %v674_v45 = vsel %vm3135_vm9, %v666_v31, 0.0 }
 0x641   :  { %676 = vst.msk [vmem:[#allocation3 + $0x10] sm:$0xff] %vm184_vm0, %v674_v45  ;;  %v684_v46 = vpack.c.bf16 %v668_v44, %v668_v44 }
 0x642   :  { %678 = vst.msk [vmem:[#allocation3 + $0x28] sm:$0xff] %vm483_vm6, %v674_v45 }
 0x643   :  { %2303 = vmatmul.mubr.msk.bf16.vlgmr.msra.gmra.mrb[8].mxu1 %vm395_vm7, %v684_v46 }
 0x644   :  { %877 = vmatpush1.bf16.msra.mxu1 %v2963_v8  ;;  %908 = vmatprep.mubr.bf16.mxu1 %v2803_v0 }
 0x645   :  { %878 = vmatprep.subr.bf16.mxu1 %v2966_v10 }
 0x648   :  { %879 = vmatpush1.bf16.msra.mxu1 %v2969_v11 }
 0x649   :  { %880 = vmatprep.subr.bf16.mxu1 %v2972_v12 }
 0x64c   :  { %881 = vmatpush1.bf16.msra.mxu1 %v2976_v15 }
 0x64d   :  { %882 = vmatprep.subr.bf16.mxu1 %v2978_v16 }
 0x650   :  { %883 = vmatpush1.bf16.msra.mxu1 %v2984_v17 }
 0x651   :  { %1062 = vmatprep.subr.bf16.mxu1 %v2961_v7 }
 0x6a6   :  { %v748_v13 = vpop.permute.xlu1 %747 }
 0x716   :  { %v722_v42 = vpop.f32.mrb[8].mxu1 }
 0x717   :  { %v731_v39 = vadd.f32 %v729_v47, %v722_v42  ;;  %v724_v50 = vpop.f32.mrb[9].mxu1 }
 0x718   :  { %v732_v51 = vadd.f32 %v730_v48, %v724_v50  ;;  %v726_v52 = vpop.f32.mrb[10].mxu1 }
 0x719   :  { %v2304_v53 = vmul.f32 -1.442695, %v731_v39  ;;  %v727_v54 = vpop.f32.mrb[11].mxu1 }
 0x71a   :  { %v2305_v7 = vmul.f32 -1.442695, %v732_v51 }
 0x71b   :  { %2484 = vpow2.f32 %v2304_v53 }
 0x71c   :  { %2486 = vtanh.f32 %v732_v51 }
 0x725   :  { %v2485_v55 = vpop.eup %2484 }
 0x726   :  { %v739_v56 = vadd.f32 1.0, %v2485_v55  ;;  %v2487_v57 = vpop.eup %2486 }
 0x728   :  { %2488 = vrcp.f32 %v739_v56 }
 0x729   :  { %2490 = vpow2.f32 %v2305_v7 }
 0x732   :  { %v2489_v59 = vpop.eup %2488 }
 0x733   :  { %v751_v61 = vmul.f32 %v2489_v59, %v2487_v57  ;;  %v2491_v62 = vpop.eup %2490  ;;  %v750_v1 = vmul.f32 %v2489_v59, %v748_v13 }
 0x734   :  { %v740_v63 = vadd.f32 1.0, %v2491_v62 }
 0x735   :  { %753 = vrot.lane.b32.xlu0 %v751_v61, %s2804_s3  ;;  %v2809_v61 = vmov 3  }
 0x736   :  { %2492 = vrcp.f32 %v740_v63  ;;  %v854_v7 = vsel %vm135_vm4, 4, %v2809_v61 }
 0x737   :  { %vm3196_vm11 = vcmp.lt.s32.totalorder %v854_v7, %v3069_v58 }
 0x740   :  { %v2493_v5 = vpop.eup %2492 }
 0x7a7   :  { %v754_v3 = vpop.permute.xlu0 %753 }
 0x7a8   :  { %v756_v4 = vadd.f32 %v754_v3, %v750_v1 }
 0x7aa   :  { %2494 = vtanh.f32 %v756_v4  ;;  %767 = vrot.lane.b32.xlu0 %v756_v4, %s2804_s3 }
 0x7b4   :  { %v2495_v6 = vpop.eup %2494 }
 0x7b5   :  { %v758_v9 = vmul.f32 %v2495_v6, %v2493_v5  ;;  %v917_v6 = vunpack.c.l.bf16 %v3046_v20 }
 0x7b7   :  { %762 = vrot.lane.b32.xlu1 %v758_v9, %s2804_s3 }
 0x81c   :  { %v768_v22 = vpop.permute.xlu0 %767 }
 0x81d   :  { %v770_v23 = vsel %vm3166_vm10, %v768_v22, %v673_v43 }
 0x81e   :  { %842 = vrot.lane.b32.xlu1 %v770_v23, %s2804_s3 }
 0x829   :  { %v763_v24 = vpop.permute.xlu1 %762 }
 0x82a   :  { %v765_v25 = vsel %vm3166_vm10, %v763_v24, %v668_v44  ;;  %v771_v28 = vsel %vm3166_vm10, %v763_v24, 0.0 }
 0x82b   :  { %773 = vst.msk [vmem:[#allocation3 + $0x18] sm:$0xff] %vm184_vm0, %v771_v28  ;;  %v779_v32 = vpack.c.bf16 %v765_v25, %v765_v25 }
 0x82c   :  { %775 = vst.msk [vmem:[#allocation3 + $0x20] sm:$0xff] %vm483_vm6, %v771_v28 }
 0x82d   :  { %2306 = vmatmul.mubr.msk.bf16.vlgmr.msra.gmra.mrb[20].mxu0 %vm395_vm7, %v779_v32 }
 0x82e   :  { %970 = vmatpush1.bf16.msra.mxu0 %v2963_v8  ;;  %1001 = vmatprep.mubr.bf16.mxu0 %v2803_v0 }
 0x82f   :  { %971 = vmatprep.subr.bf16.mxu0 %v2966_v10 }
 0x832   :  { %972 = vmatpush1.bf16.msra.mxu0 %v2969_v11 }
 0x833   :  { %973 = vmatprep.subr.bf16.mxu0 %v2972_v12 }
 0x836   :  { %974 = vmatpush1.bf16.msra.mxu0 %v2976_v15 }
 0x837   :  { %975 = vmatprep.subr.bf16.mxu0 %v2978_v16 }
 0x83a   :  { %976 = vmatpush1.bf16.msra.mxu0 %v2984_v17 }
 0x890   :  { %v843_v14 = vpop.permute.xlu1 %842 }
 0x900   :  { %v817_v34 = vpop.f32.mrb[20].mxu0 }
 0x901   :  { %v826_v30 = vadd.f32 %v824_v33, %v817_v34  ;;  %v819_v35 = vpop.f32.mrb[21].mxu0 }
 0x902   :  { %v827_v43 = vadd.f32 %v825_v37, %v819_v35  ;;  %v821_v31 = vpop.f32.mrb[22].mxu0 }
 0x903   :  { %v2307_v44 = vmul.f32 -1.442695, %v826_v30  ;;  %v822_v45 = vpop.f32.mrb[23].mxu0  ;;  %v2810_v31 = vmov 2  }
 0x904   :  { %v2308_v50 = vmul.f32 -1.442695, %v827_v43 }
 0x905   :  { %2496 = vpow2.f32 %v2307_v44  ;;  %v947_v44 = vsel %vm135_vm4, 5, %v2810_v31 }
 0x906   :  { %2498 = vtanh.f32 %v827_v43  ;;  %vm3226_vm12 = vcmp.lt.s32.totalorder %v947_v44, %v3069_v58 }
 0x90f   :  { %v2497_v46 = vpop.eup %2496 }
 0x910   :  { %v834_v47 = vadd.f32 1.0, %v2497_v46  ;;  %v2499_v42 = vpop.eup %2498 }
 0x912   :  { %2500 = vrcp.f32 %v834_v47 }
 0x913   :  { %2502 = vpow2.f32 %v2308_v50 }
 0x91c   :  { %v2501_v48 = vpop.eup %2500 }
 0x91d   :  { %v846_v39 = vmul.f32 %v2501_v48, %v2499_v42  ;;  %v2503_v51 = vpop.eup %2502  ;;  %v845_v53 = vmul.f32 %v2501_v48, %v843_v14 }
 0x91e   :  { %v835_v52 = vadd.f32 1.0, %v2503_v51  ;;  %v1010_v51 = vunpack.c.l.bf16 %v3054_v36 }
 0x91f   :  { %848 = vrot.lane.b32.xlu0 %v846_v39, %s2804_s3 }
 0x920   :  { %2504 = vrcp.f32 %v835_v52  ;;  %v1011_v52 = vunpack.c.h.bf16 %v3054_v36 }
 0x92a   :  { %v2505_v56 = vpop.eup %2504 }
 0x991   :  { %v849_v54 = vpop.permute.xlu0 %848 }
 0x992   :  { %v851_v55 = vadd.f32 %v849_v54, %v845_v53 }
 0x994   :  { %2506 = vtanh.f32 %v851_v55  ;;  %862 = vrot.lane.b32.xlu0 %v851_v55, %s2804_s3 }
 0x99e   :  { %v2507_v57 = vpop.eup %2506 }
 0x99f   :  { %v853_v59 = vmul.f32 %v2507_v57, %v2505_v56 }
 0x9a1   :  { %857 = vrot.lane.b32.xlu1 %v853_v59, %s2804_s3 }
 0xa06   :  { %v863_v62 = vpop.permute.xlu0 %862 }
 0xa07   :  { %v865_v63 = vsel %vm3196_vm11, %v863_v62, %v770_v23 }
 0xa08   :  { %935 = vrot.lane.b32.xlu1 %v865_v63, %s2804_s3 }
 0xa13   :  { %v858_v1 = vpop.permute.xlu1 %857 }
 0xa14   :  { %v860_v3 = vsel %vm3196_vm11, %v858_v1, %v765_v25  ;;  %v866_v4 = vsel %vm3196_vm11, %v858_v1, 0.0 }
 0xa15   :  { %867 = vst.msk [vmem:[#allocation3 + $0x20] sm:$0xff] %vm184_vm0, %v866_v4  ;;  %v872_v5 = vpack.c.bf16 %v860_v3, %v860_v3 }
 0xa16   :  { %868 = vst.msk [vmem:[#allocation3 + $0x18] sm:$0xff] %vm483_vm6, %v866_v4 }
 0xa17   :  { %2309 = vmatmul.mubr.msk.bf16.vlgmr.msra.gmra.mrb[12].mxu1 %vm395_vm7, %v872_v5 }
 0xa18   :  { %1063 = vmatpush1.bf16.msra.mxu1 %v2963_v8  ;;  %1094 = vmatprep.mubr.bf16.mxu1 %v2803_v0 }
 0xa19   :  { %1064 = vmatprep.subr.bf16.mxu1 %v2966_v10 }
 0xa1c   :  { %1065 = vmatpush1.bf16.msra.mxu1 %v2969_v11 }
 0xa1d   :  { %1066 = vmatprep.subr.bf16.mxu1 %v2972_v12 }
 0xa20   :  { %1067 = vmatpush1.bf16.msra.mxu1 %v2976_v15 }
 0xa21   :  { %1068 = vmatprep.subr.bf16.mxu1 %v2978_v16 }
 0xa24   :  { %1069 = vmatpush1.bf16.msra.mxu1 %v2984_v17 }
 0xa7a   :  { %v936_v20 = vpop.permute.xlu1 %935 }
 0xaea   :  { %v910_v9 = vpop.f32.mrb[12].mxu1 }
 0xaeb   :  { %v919_v8 = vadd.f32 %v917_v6, %v910_v9  ;;  %v912_v21 = vpop.f32.mrb[13].mxu1 }
 0xaec   :  { %v920_v22 = vadd.f32 %v918_v18, %v912_v21  ;;  %v914_v23 = vpop.f32.mrb[14].mxu1 }
 0xaed   :  { %v2310_v10 = vmul.f32 -1.442695, %v919_v8  ;;  %v915_v24 = vpop.f32.mrb[15].mxu1  ;;  %v2811_v23 = vmov 1  }
 0xaee   :  { %v2311_v17 = vmul.f32 -1.442695, %v920_v22 }
 0xaef   :  { %2508 = vpow2.f32 %v2310_v10  ;;  %v1040_v10 = vsel %vm135_vm4, 6, %v2811_v23 }
 0xaf0   :  { %2510 = vtanh.f32 %v920_v22  ;;  %vm3249_vm13 = vcmp.lt.s32.totalorder %v1040_v10, %v3069_v58 }
 0xaf9   :  { %v2509_v11 = vpop.eup %2508 }
 0xafa   :  { %v927_v12 = vadd.f32 1.0, %v2509_v11  ;;  %v2511_v15 = vpop.eup %2510 }
 0xafc   :  { %2512 = vrcp.f32 %v927_v12 }
 0xafd   :  { %2514 = vpow2.f32 %v2311_v17 }
 0xb06   :  { %v2513_v16 = vpop.eup %2512 }
 0xb07   :  { %v939_v25 = vmul.f32 %v2513_v16, %v2511_v15  ;;  %v2515_v28 = vpop.eup %2514  ;;  %v938_v33 = vmul.f32 %v2513_v16, %v936_v20 }
 0xb08   :  { %v928_v32 = vadd.f32 1.0, %v2515_v28  ;;  %v1103_v28 = vunpack.c.l.bf16 %v3060_v38 }
 0xb09   :  { %941 = vrot.lane.b32.xlu0 %v939_v25, %s2804_s3 }
 0xb0a   :  { %2516 = vrcp.f32 %v928_v32  ;;  %v1104_v32 = vunpack.c.h.bf16 %v3060_v38 }
 0xb14   :  { %v2517_v30 = vpop.eup %2516 }
 0xb7b   :  { %v942_v34 = vpop.permute.xlu0 %941 }
 0xb7c   :  { %v944_v37 = vadd.f32 %v942_v34, %v938_v33 }
 0xb7e   :  { %2518 = vtanh.f32 %v944_v37  ;;  %955 = vrot.lane.b32.xlu0 %v944_v37, %s2804_s3 }
 0xb88   :  { %v2519_v35 = vpop.eup %2518 }
 0xb89   :  { %v946_v43 = vmul.f32 %v2519_v35, %v2517_v30 }
 0xb8b   :  { %950 = vrot.lane.b32.xlu1 %v946_v43, %s2804_s3 }
 0xbf0   :  { %v956_v45 = vpop.permute.xlu0 %955 }
 0xbf1   :  { %v958_v47 = vsel %vm3226_vm12, %v956_v45, %v865_v63 }
 0xbf2   :  { %1028 = vrot.lane.b32.xlu1 %v958_v47, %s2804_s3 }
 0xbfd   :  { %v951_v42 = vpop.permute.xlu1 %950 }
 0xbfe   :  { %v953_v48 = vsel %vm3226_vm12, %v951_v42, %v860_v3  ;;  %v959_v39 = vsel %vm3226_vm12, %v951_v42, 0.0 }
 0xbff   :  { %960 = vst.msk [vmem:[#allocation3 + $0x28] sm:$0xff] %vm184_vm0, %v959_v39  ;;  %v965_v50 = vpack.c.bf16 %v953_v48, %v953_v48 }
 0xc00   :  { %961 = vst.msk [vmem:[#allocation3 + $0x10] sm:$0xff] %vm483_vm6, %v959_v39 }
 0xc01   :  { %2312 = vmatmul.mubr.msk.bf16.vlgmr.msra.gmra.mrb[24].mxu0 %vm395_vm7, %v965_v50 }
 0xc02   :  { %1394 = vmatprep.mubr.bf16.mxu0 %v2803_v0 }
 0xc07   :  { %v1145_v40 = vld [vmem:[#allocation3 + $0x10] sm:$0xff] }
 0xc64   :  { %v1029_v36 = vpop.permute.xlu1 %1028 }
 0xcd4   :  { %v1003_v14 = vpop.f32.mrb[24].mxu0 }
 0xcd5   :  { %v1012_v53 = vadd.f32 %v1010_v51, %v1003_v14  ;;  %v1005_v54 = vpop.f32.mrb[25].mxu0 }
 0xcd6   :  { %v1013_v55 = vadd.f32 %v1011_v52, %v1005_v54  ;;  %v1007_v56 = vpop.f32.mrb[26].mxu0 }
 0xcd7   :  { %v2313_v57 = vmul.f32 -1.442695, %v1012_v53  ;;  %v1008_v59 = vpop.f32.mrb[27].mxu0 }
 0xcd8   :  { %v2314_v3 = vmul.f32 -1.442695, %v1013_v55  ;;  %v1147_v59 = vld [vmem:[#allocation3 + $0x20] sm:$0xff] }
 0xcd9   :  { %2520 = vpow2.f32 %v2313_v57 }
 0xcda   :  { %2522 = vtanh.f32 %v1013_v55 }
 0xce3   :  { %v2521_v61 = vpop.eup %2520 }
 0xce4   :  { %v1020_v7 = vadd.f32 1.0, %v2521_v61  ;;  %v2523_v62 = vpop.eup %2522  ;;  %v1163_v61 = vsel %vm395_vm7, %v1147_v59, 0.0 }
 0xce6   :  { %2524 = vrcp.f32 %v1020_v7 }
 0xce7   :  { %2526 = vpow2.f32 %v2314_v3 }
 0xcf0   :  { %v2525_v63 = vpop.eup %2524 }
 0xcf1   :  { %v1032_v1 = vmul.f32 %v2525_v63, %v2523_v62  ;;  %v2527_v4 = vpop.eup %2526  ;;  %v1031_v6 = vmul.f32 %v2525_v63, %v1029_v36  ;;  %v3278_v63 = vsel %vm135_vm4, 7, %v2803_v0 }
 0xcf2   :  { %v1021_v5 = vadd.f32 1.0, %v2527_v4  ;;  %vm1134_vm14 = vcmp.lt.s32.totalorder %v3278_v63, %v3069_v58 }
 0xcf3   :  { %1034 = vrot.lane.b32.xlu0 %v1032_v1, %s2804_s3 }
 0xcf4   :  { %2528 = vrcp.f32 %v1021_v5  ;;  %v1157_v5 = vsel %vm395_vm7, %v1145_v40, 0.0 }
 0xcfe   :  { %v2529_v8 = vpop.eup %2528 }
 0xd65   :  { %v1035_v9 = vpop.permute.xlu0 %1034 }
 0xd66   :  { %v1037_v18 = vadd.f32 %v1035_v9, %v1031_v6  ;;  %v1146_v6 = vld [vmem:[#allocation3 + $0x18] sm:$0xff] }
 0xd67   :  { %v1160_v9 = vsel %vm395_vm7, %v1146_v6, 0.0 }
 0xd68   :  { %2530 = vtanh.f32 %v1037_v18  ;;  %1048 = vrot.lane.b32.xlu0 %v1037_v18, %s2804_s3  ;;  %v1148_v18 = vld [vmem:[#allocation3 + $0x28] sm:$0xff] }
 0xd72   :  { %v2531_v21 = vpop.eup %2530 }
 0xd73   :  { %v1039_v22 = vmul.f32 %v2531_v21, %v2529_v8  ;;  %v1166_v8 = vsel %vm395_vm7, %v1148_v18, 0.0 }
 0xd75   :  { %1043 = vrot.lane.b32.xlu1 %v1039_v22, %s2804_s3 }
 0xdda   :  { %v1049_v24 = vpop.permute.xlu0 %1048 }
 0xddb   :  { %v1051_v12 = vsel %vm3249_vm13, %v1049_v24, %v958_v47 }
 0xddc   :  { %1121 = vrot.lane.b32.xlu1 %v1051_v12, %s2804_s3 }
 0xde7   :  { %v1044_v15 = vpop.permute.xlu1 %1043 }
 0xde8   :  { %v3258_v16 = vsel %vm3249_vm13, %v1044_v15, %v953_v48  ;;  %v1052_v25 = vsel %vm3249_vm13, %v1044_v15, 0.0 }
 0xde9   :  { %1053 = vst.msk [vmem:[#allocation3 + $0x30] sm:$0xff] %vm184_vm0, %v1052_v25  ;;  %v1058_v17 = vpack.c.bf16 %v3258_v16, %v3258_v16 }
 0xdea   :  { %1054 = vst.msk [vmem:[#allocation3 + $0x8] sm:$0xff] %vm483_vm6, %v1052_v25 }
 0xdeb   :  { %2315 = vmatmul.mubr.msk.bf16.vlgmr.msra.gmra.mrb[16].mxu1 %vm395_vm7, %v1058_v17 }
 0xdec   :  { %1590 = vmatprep.mubr.bf16.mxu1 %v2803_v0 }
 0xdf0   :  { %v1149_v7 = vld [vmem:[#allocation3 + $0x30] sm:$0xff] }
 0xdf1   :  { %v1144_v56 = vld [vmem:[#allocation3 + $0x8] sm:$0xff]  ;;  %v1169_v62 = vsel %vm395_vm7, %v1149_v7, 0.0 }
 0xdf2   :  { %v1154_v57 = vsel %vm395_vm7, %v1144_v56, 0.0 }
 0xe4e   :  { %v1122_v38 = vpop.permute.xlu1 %1121 }
 0xebe   :  { %v1096_v20 = vpop.f32.mrb[16].mxu1 }
 0xebf   :  { %v1105_v33 = vadd.f32 %v1103_v28, %v1096_v20  ;;  %v1098_v34 = vpop.f32.mrb[17].mxu1 }
 0xec0   :  { %v1106_v37 = vadd.f32 %v1104_v32, %v1098_v34  ;;  %v1100_v30 = vpop.f32.mrb[18].mxu1 }
 0xec1   :  { %v2316_v35 = vmul.f32 -1.442695, %v1105_v33  ;;  %v1101_v43 = vpop.f32.mrb[19].mxu1 }
 0xec2   :  { %v2317_v48 = vmul.f32 -1.442695, %v1106_v37 }
 0xec3   :  { %2532 = vpow2.f32 %v2316_v35 }
 0xec4   :  { %2534 = vtanh.f32 %v1106_v37 }
 0xecd   :  { %v2533_v31 = vpop.eup %2532 }
 0xece   :  { %v1113_v44 = vadd.f32 1.0, %v2533_v31  ;;  %v2535_v45 = vpop.eup %2534 }
 0xed0   :  { %2536 = vrcp.f32 %v1113_v44 }
 0xed1   :  { %2538 = vpow2.f32 %v2317_v48 }
 0xeda   :  { %v2537_v47 = vpop.eup %2536 }
 0xedb   :  { %v1125_v42 = vmul.f32 %v2537_v47, %v2535_v45  ;;  %v2539_v39 = vpop.eup %2538  ;;  %v1124_v51 = vmul.f32 %v2537_v47, %v1122_v38 }
 0xedc   :  { %v1114_v50 = vadd.f32 1.0, %v2539_v39 }
 0xedd   :  { %1127 = vrot.lane.b32.xlu0 %v1125_v42, %s2804_s3 }
 0xede   :  { %2540 = vrcp.f32 %v1114_v50 }
 0xee8   :  { %v2541_v53 = vpop.eup %2540 }
 0xf4f   :  { %v1128_v14 = vpop.permute.xlu0 %1127 }
 0xf50   :  { %v1130_v52 = vadd.f32 %v1128_v14, %v1124_v51 }
 0xf52   :  { %2542 = vtanh.f32 %v1130_v52 }
 0xf5c   :  { %v2543_v54 = vpop.eup %2542 }
 0xf5d   :  { %v1132_v55 = vmul.f32 %v2543_v54, %v2541_v53 }
 0xf5f   :  { %1136 = vrot.lane.b32.xlu1 %v1132_v55, %s2804_s3 }
 0xf83   :  { %1155 = vadd.xlane.f32.xlu1 %v1154_v57 }
 0xf87   :  { %1164 = vadd.xlane.f32.xlu1 %v1163_v61 }
 0xf8b   :  { %1170 = vadd.xlane.f32.xlu1 %v1169_v62 }
 0xfd1   :  { %v3282_v1 = vpop.permute.xlu1 %1136 }
 0xfd2   :  { %v1140_v3 = vsel %vm1134_vm14, %v3282_v1, 0.0 }
 0xfd3   :  { %1141 = vst.msk [vmem:[#allocation3 + $0x38] sm:$0xff] %vm184_vm0, %v1140_v3 }
 0xfd4   :  { %1142 = vst.msk [vmem:[#allocation3] sm:$0xff] %vm483_vm6, %v1140_v3 }
 0xfda   :  { %v1150_v21 = vld [vmem:[#allocation3 + $0x38] sm:$0xff] }
 0xfdb   :  { %v1143_v4 = vld [vmem:[#allocation3] sm:$0xff]  ;;  %v1172_v22 = vsel %vm395_vm7, %v1150_v21, 0.0 }
 0xfdc   :  { %v1151_v36 = vsel %vm395_vm7, %v1143_v4, 0.0 }
 0xfdd   :  { %1152 = vadd.xlane.f32.xlu0 %v1151_v36 }
 0xfe1   :  { %1158 = vadd.xlane.f32.xlu0 %v1157_v5  ;;  %v2424_v5 = vld [vmem:[#allocation10] ss:$8 sps:$4 sm:$0xff]  }
 0xfe5   :  { %1161 = vadd.xlane.f32.xlu0 %v1160_v9  ;;  %v2427_v9 = vld [vmem:[#allocation10 + $0x10] ss:$8 sps:$4 sm:$0xff]  }
 0xfe9   :  { %1167 = vadd.xlane.f32.xlu0 %v1166_v8  ;;  %v2430_v8 = vld [vmem:[#allocation10 + $0x20] ss:$8 sps:$4 sm:$0xff]  }
 0xfed   :  { %1173 = vadd.xlane.f32.xlu0 %v1172_v22  ;;  %v2433_v22 = vld [vmem:[#allocation10 + $0x30] ss:$8 sps:$4 sm:$0xff]  }
0x1010   :  { %v1156_v23 = vpop.xlane.xlu1 %1155 }
0x1011   :  { %v1177_v10 = vmul.f32 0.015625, %v1156_v23  ;;  %v3335_v23 = vld [vmem:[#allocation12 + $0x4] ss:$8 sps:$4 sm:$0xff]  }
0x1012   :  { %1558 = vmatprep.subr.bf16.mxu1 %v3335_v23 }
0x1013   :  { %v3295_v24 = vsub.f32 %v1144_v56, %v1177_v10  ;;  %v3339_v10 = vld [vmem:[#allocation12] ss:$8 sps:$4 sm:$0xff]  }
0x1014   :  { %v1165_v25 = vpop.xlane.xlu1 %1164  ;;  %1559 = vmatpush1.bf16.msra.mxu1 %v3339_v10 }
0x1015   :  { %v1193_v12 = vmul.f32 %v3295_v24, %v3295_v24  ;;  %v1180_v20 = vmul.f32 0.015625, %v1165_v25  ;;  %v3346_v25 = vld [vmem:[#allocation12 + $0x24] ss:$8 sps:$4 sm:$0xff]  }
0x1017   :  { %v1203_v15 = vsel %vm395_vm7, %v1193_v12, 0.0  ;;  %v3304_v35 = vsub.f32 %v1147_v59, %v1180_v20  ;;  %v3342_v12 = vld [vmem:[#allocation12 + $0x14] ss:$8 sps:$4 sm:$0xff]   ;;  %v3356_v20 = vld [vmem:[#allocation12 + $0x30] ss:$8 sps:$4 sm:$0xff]  }
0x1018   :  { %1204 = vadd.xlane.f32.xlu0 %v1203_v15  ;;  %v1171_v33 = vpop.xlane.xlu1 %1170  ;;  %v3344_v15 = vld [vmem:[#allocation12 + $0x10] ss:$8 sps:$4 sm:$0xff]   ;;  %1560 = vmatprep.subr.bf16.mxu1 %v3342_v12 }
0x1019   :  { %v1182_v43 = vmul.f32 0.015625, %v1171_v33  ;;  %v1196_v50 = vmul.f32 %v3304_v35, %v3304_v35  ;;  %1561 = vmatpush1.bf16.msra.mxu1 %v3344_v15 }
0x101a   :  { %1562 = vmatprep.subr.bf16.mxu1 %v3346_v25 }
0x101b   :  { %v3311_v48 = vsub.f32 %v1149_v7, %v1182_v43  ;;  %v1212_v54 = vsel %vm395_vm7, %v1196_v50, 0.0 }
0x101d   :  { %v1198_v56 = vmul.f32 %v3311_v48, %v3311_v48 }
0x101f   :  { %v1218_v62 = vsel %vm395_vm7, %v1198_v56, 0.0 }
0x106a   :  { %v1153_v17 = vpop.xlane.xlu0 %1152 }
0x106b   :  { %v1176_v28 = vmul.f32 0.015625, %v1153_v17  ;;  %v3351_v17 = vld [vmem:[#allocation12 + $0x20] ss:$8 sps:$4 sm:$0xff]  }
0x106c   :  { %1563 = vmatpush1.bf16.msra.mxu1 %v3351_v17 }
0x106d   :  { %v3300_v32 = vsub.f32 %v1143_v4, %v1176_v28  ;;  %v3354_v28 = vld [vmem:[#allocation12 + $0x34] ss:$8 sps:$4 sm:$0xff]  }
0x106e   :  { %v1159_v34 = vpop.xlane.xlu0 %1158  ;;  %1564 = vmatprep.subr.bf16.mxu1 %v3354_v28 }
0x106f   :  { %v1178_v37 = vmul.f32 0.015625, %v1159_v34  ;;  %v1192_v30 = vmul.f32 %v3300_v32, %v3300_v32 }
0x1070   :  { %1565 = vmatpush1.bf16.msra.mxu1 %v3356_v20 }
0x1071   :  { %v3306_v31 = vsub.f32 %v1145_v40, %v1178_v37  ;;  %v1200_v44 = vsel %vm395_vm7, %v1192_v30, 0.0  ;;  %v2426_v40 = vld [vmem:[#allocation10 + $0x4] ss:$8 sps:$4 sm:$0xff]   ;;  %1642 = vmatprep.subr.bf16.mxu1 %v3335_v23 }
0x1072   :  { %1201 = vadd.xlane.f32.xlu1 %v1200_v44  ;;  %v1162_v45 = vpop.xlane.xlu0 %1161  ;;  %1362 = vmatprep.subr.bf16.mxu0 %v2426_v40 }
0x1073   :  { %v1179_v47 = vmul.f32 0.015625, %v1162_v45  ;;  %v1194_v42 = vmul.f32 %v3306_v31, %v3306_v31  ;;  %1363 = vmatpush1.bf16.msra.mxu0 %v2424_v5  ;;  %1591 = vmatmul.mubr.bf16.vlgmr.msra.gmra.mrb[20].mxu1 %v2803_v0 }
0x1074   :  { %1643 = vmatpush1.bf16.msra.mxu1 %v3339_v10  ;;  %1674 = vmatprep.mubr.bf16.mxu1 %v2803_v0 }
0x1075   :  { %v3313_v39 = vsub.f32 %v1146_v6, %v1179_v47  ;;  %v1206_v38 = vsel %vm395_vm7, %v1194_v42, 0.0  ;;  %v2429_v6 = vld [vmem:[#allocation10 + $0x14] ss:$8 sps:$4 sm:$0xff]   ;;  %1644 = vmatprep.subr.bf16.mxu1 %v3342_v12 }
0x1076   :  { %1207 = vadd.xlane.f32.xlu1 %v1206_v38  ;;  %v1168_v51 = vpop.xlane.xlu0 %1167  ;;  %1364 = vmatprep.subr.bf16.mxu0 %v2429_v6 }
0x1077   :  { %v1181_v14 = vmul.f32 0.015625, %v1168_v51  ;;  %v1195_v52 = vmul.f32 %v3313_v39, %v3313_v39  ;;  %1365 = vmatpush1.bf16.msra.mxu0 %v2427_v9 }
0x1078   :  { %1645 = vmatpush1.bf16.msra.mxu1 %v3344_v15 }
0x1079   :  { %v3320_v53 = vsub.f32 %v1148_v18, %v1181_v14  ;;  %v1209_v55 = vsel %vm395_vm7, %v1195_v52, 0.0  ;;  %v2432_v18 = vld [vmem:[#allocation10 + $0x24] ss:$8 sps:$4 sm:$0xff]   ;;  %1646 = vmatprep.subr.bf16.mxu1 %v3346_v25 }
0x107a   :  { %1213 = vadd.xlane.f32.xlu1 %v1212_v54  ;;  %1210 = vadd.xlane.f32.xlu0 %v1209_v55  ;;  %v1174_v57 = vpop.xlane.xlu0 %1173 }
0x107b   :  { %v1183_v59 = vmul.f32 0.015625, %v1174_v57  ;;  %v1197_v61 = vmul.f32 %v3320_v53, %v3320_v53  ;;  %1366 = vmatprep.subr.bf16.mxu0 %v2432_v18 }
0x107c   :  { %1367 = vmatpush1.bf16.msra.mxu0 %v2430_v8  ;;  %1647 = vmatpush1.bf16.msra.mxu1 %v3351_v17 }
0x107d   :  { %v3328_v7 = vsub.f32 %v1150_v21, %v1183_v59  ;;  %v1215_v3 = vsel %vm395_vm7, %v1197_v61, 0.0  ;;  %v2435_v21 = vld [vmem:[#allocation10 + $0x34] ss:$8 sps:$4 sm:$0xff]   ;;  %1648 = vmatprep.subr.bf16.mxu1 %v3354_v28  ;;  %v2318_v59 = vld [vmem:[%s3586_s5] ss:$0 sm:$0xff] }
0x107e   :  { %1219 = vadd.xlane.f32.xlu1 %v1218_v62  ;;  %1216 = vadd.xlane.f32.xlu0 %v1215_v3 }
0x107f   :  { %v1199_v4 = vmul.f32 %v3328_v7, %v3328_v7  ;;  %1368 = vmatprep.subr.bf16.mxu0 %v2435_v21 }
0x1080   :  { %1369 = vmatpush1.bf16.msra.mxu0 %v2433_v22  ;;  %1649 = vmatpush1.bf16.msra.mxu1 %v3356_v20 }
0x1081   :  { %v1221_v36 = vsel %vm395_vm7, %v1199_v4, 0.0  ;;  %1730 = vmatprep.subr.bf16.mxu0 %v3335_v23  ;;  %1818 = vmatprep.subr.bf16.mxu1 %v3335_v23 }
0x1082   :  { %1222 = vadd.xlane.f32.xlu0 %v1221_v36 }
0x10a5   :  { %v1205_v33 = vpop.xlane.xlu0 %1204 }
0x10a6   :  { %v1225_v34 = vmul.f32 0.015625, %v1205_v33 }
0x10a8   :  { %v1233_v37 = vadd.f32 1e-05, %v1225_v34 }
0x10aa   :  { %2544 = vrsqrt.f32 %v1233_v37 }
0x10b4   :  { %v2545_v51 = vpop.eup %2544 }
0x10b5   :  { %v1249_v55 = vmul.f32 %v2545_v51, %v3295_v24  ;;  %v2319_v24 = vld [vmem:[%s3587_s6] ss:$0 sm:$0xff] }
0x10b7   :  { %v1264_v36 = vmul.f32 %v2318_v59, %v1249_v55 }
0x10b9   :  { %v1279_v34 = vadd.f32 %v2319_v24, %v1264_v36 }
0x10ff   :  { %v1202_v30 = vpop.xlane.xlu1 %1201 }
0x1100   :  { %v1224_v43 = vmul.f32 0.015625, %v1202_v30 }
0x1102   :  { %v1232_v44 = vadd.f32 1e-05, %v1224_v43 }
0x1103   :  { %v1208_v45 = vpop.xlane.xlu1 %1207 }
0x1104   :  { %2546 = vrsqrt.f32 %v1232_v44  ;;  %v1226_v47 = vmul.f32 0.015625, %v1208_v45 }
0x1106   :  { %v1234_v42 = vadd.f32 1e-05, %v1226_v47 }
0x1107   :  { %v1214_v38 = vpop.xlane.xlu1 %1213  ;;  %v1211_v50 = vpop.xlane.xlu0 %1210 }
0x1108   :  { %2548 = vrsqrt.f32 %v1234_v42  ;;  %v1228_v14 = vmul.f32 0.015625, %v1214_v38  ;;  %v1227_v52 = vmul.f32 0.015625, %v1211_v50 }
0x110a   :  { %v1235_v54 = vadd.f32 1e-05, %v1227_v52  ;;  %v1236_v56 = vadd.f32 1e-05, %v1228_v14 }
0x110b   :  { %v1217_v57 = vpop.xlane.xlu0 %1216  ;;  %v1220_v61 = vpop.xlane.xlu1 %1219 }
0x110c   :  { %v1229_v62 = vmul.f32 0.015625, %v1217_v57  ;;  %2550 = vrsqrt.f32 %v1235_v54  ;;  %v1230_v5 = vmul.f32 0.015625, %v1220_v61 }
0x110d   :  { %2552 = vrsqrt.f32 %v1236_v56 }
0x110e   :  { %v2547_v3 = vpop.eup %2546  ;;  %v1237_v4 = vadd.f32 1e-05, %v1229_v62  ;;  %v1238_v22 = vadd.f32 1e-05, %v1230_v5 }
0x110f   :  { %v1248_v40 = vmul.f32 %v2547_v3, %v3300_v32  ;;  %v1223_v6 = vpop.xlane.xlu0 %1222 }
0x1110   :  { %v1231_v9 = vmul.f32 0.015625, %v1223_v6  ;;  %2554 = vrsqrt.f32 %v1237_v4 }
0x1111   :  { %v1263_v18 = vmul.f32 %v2318_v59, %v1248_v40 }
0x1112   :  { %v2549_v8 = vpop.eup %2548  ;;  %v1239_v21 = vadd.f32 1e-05, %v1231_v9  ;;  %v1298_v9 = vld [vmem:[%s3589_s8] sm:$0x3]  ;;  %s2812_s8 = smov 32  }
0x1113   :  { %v1278_v33 = vadd.f32 %v2319_v24, %v1263_v18  ;;  %v1250_v37 = vmul.f32 %v2549_v8, %v3306_v31  ;;  %v1307_v18 = vrot.slane %v1298_v9, %v160_v29 }
0x1114   :  { %2556 = vrsqrt.f32 %v1239_v21 }
0x1115   :  { %v1286_v30 = vpack.c.bf16 %v1279_v34, %v1278_v33  ;;  %2558 = vrsqrt.f32 %v1238_v22  ;;  %v1265_v44 = vmul.f32 %v2318_v59, %v1250_v37 }
0x1116   :  { %v2551_v32 = vpop.eup %2550 }
0x1117   :  { %2328 = vmatmul.mubr.msk.bf16.vlgmr.msra.gmra.mrb[28].mxu0 %vm395_vm7, %v1286_v30  ;;  %v1251_v43 = vmul.f32 %v2551_v32, %v3313_v39  ;;  %v2553_v45 = vpop.eup %2552  ;;  %v1280_v50 = vadd.f32 %v2319_v24, %v1265_v44 }
0x1118   :  { %1404 = vmatprep.mubr.bf16.mxu0 %v2803_v0  ;;  %1731 = vmatpush1.bf16.msra.mxu0 %v3339_v10  ;;  %v1252_v31 = vmul.f32 %v2553_v45, %v3304_v35 }
0x1119   :  { %1732 = vmatprep.subr.bf16.mxu0 %v3342_v12  ;;  %v1266_v47 = vmul.f32 %v2318_v59, %v1251_v43 }
0x111a   :  { %v2555_v42 = vpop.eup %2554  ;;  %v1267_v54 = vmul.f32 %v2318_v59, %v1252_v31 }
0x111b   :  { %v1253_v38 = vmul.f32 %v2555_v42, %v3320_v53  ;;  %v1281_v51 = vadd.f32 %v2319_v24, %v1266_v47 }
0x111c   :  { %1733 = vmatpush1.bf16.msra.mxu0 %v3344_v15  ;;  %v1282_v57 = vadd.f32 %v2319_v24, %v1267_v54 }
0x111d   :  { %1734 = vmatprep.subr.bf16.mxu0 %v3346_v25  ;;  %v1287_v39 = vpack.c.bf16 %v1281_v51, %v1280_v50  ;;  %v1268_v14 = vmul.f32 %v2318_v59, %v1253_v38 }
0x111e   :  { %v2557_v52 = vpop.eup %2556 }
0x111f   :  { %2329 = vmatmul.mubr.msk.bf16.gmra.mrb[32].mxu0 %vm395_vm7, %v1287_v39  ;;  %v2559_v55 = vpop.eup %2558  ;;  %v1255_v35 = vmul.f32 %v2557_v52, %v3328_v7  ;;  %v1283_v53 = vadd.f32 %v2319_v24, %v1268_v14 }
0x1120   :  { %1414 = vmatprep.mubr.bf16.mxu0 %v2803_v0  ;;  %1735 = vmatpush1.bf16.msra.mxu0 %v3351_v17  ;;  %v1254_v56 = vmul.f32 %v2559_v55, %v3311_v48 }
0x1121   :  { %1736 = vmatprep.subr.bf16.mxu0 %v3354_v28  ;;  %v1288_v61 = vpack.c.bf16 %v1283_v53, %v1282_v57  ;;  %v1270_v62 = vmul.f32 %v2318_v59, %v1255_v35 }
0x1122   :  { %v1269_v3 = vmul.f32 %v2318_v59, %v1254_v56  ;;  %v1303_v59 = vrot.slane %v1298_v9, %v156_v27 }
0x1123   :  { %v1285_v4 = vadd.f32 %v2319_v24, %v1270_v62 }
0x1124   :  { %1737 = vmatpush1.bf16.msra.mxu0 %v3356_v20  ;;  %v1284_v36 = vadd.f32 %v2319_v24, %v1269_v3 }
0x1125   :  { %1904 = vmatprep.subr.bf16.mxu0 %v3335_v23 }
0x1126   :  { %v1289_v7 = vpack.c.bf16 %v1285_v4, %v1284_v36 }
0x1127   :  { %2330 = vmatmul.mubr.msk.bf16.gmra.mrb[36].mxu0 %vm395_vm7, %v1288_v61 }
0x1128   :  { %1424 = vmatprep.mubr.bf16.mxu0 %v2803_v0 }
0x112f   :  { %2331 = vmatmul.mubr.msk.bf16.gmra.mrb[40].mxu0 %vm395_vm7, %v1289_v7 }
0x1130   :  { %1762 = vmatprep.mubr.bf16.mxu0 %v2803_v0 }
0x1146   :  { %v1592_v48 = vpop.f32.mrb[20].mxu1 }
0x1147   :  { %v1594_v40 = vpop.f32.mrb[21].mxu1 }
0x1148   :  { %v1596_v5 = vpop.f32.mrb[22].mxu1 }
0x1149   :  { %v1597_v6 = vpop.f32.mrb[23].mxu1 }
0x11ea   :  { %v1396_v24 = vpop.f32.mrb[28].mxu0 }
0x11eb   :  { %v1397_v8 = vadd.f32 %v1396_v24, %v1303_v59  ;;  %v1398_v21 = vpop.f32.mrb[29].mxu0 }
0x11ec   :  { %v1399_v22 = vadd.f32 %v1398_v21, %v1307_v18  ;;  %v1400_v33 = vpop.f32.mrb[30].mxu0 }
0x11ed   :  { %v1401_v34 = vadd.f32 %v1400_v33, %v1303_v59  ;;  %v1402_v37 = vpop.f32.mrb[31].mxu0 }
0x11ee   :  { %v2379_v30 = vpack.c.bf16 %v1399_v22, %v1397_v8  ;;  %v1403_v32 = vadd.f32 %v1402_v37, %v1307_v18 }
0x11f0   :  { %v2380_v43 = vpack.c.bf16 %v1403_v32, %v1401_v34 }
0x11f2   :  { %v1406_v44 = vpop.f32.mrb[32].mxu0 }
0x11f3   :  { %v1407_v45 = vadd.f32 %v1406_v44, %v1303_v59  ;;  %v1408_v47 = vpop.f32.mrb[33].mxu0 }
0x11f4   :  { %v1409_v42 = vadd.f32 %v1408_v47, %v1307_v18  ;;  %v1410_v31 = vpop.f32.mrb[34].mxu0 }
0x11f5   :  { %v1411_v38 = vadd.f32 %v1410_v31, %v1303_v59  ;;  %v1412_v27 = vpop.f32.mrb[35].mxu0 }
0x11f6   :  { %v2381_v50 = vpack.c.bf16 %v1409_v42, %v1407_v45  ;;  %v1413_v26 = vadd.f32 %v1412_v27, %v1307_v18 }
0x11f8   :  { %v2382_v29 = vpack.c.bf16 %v1413_v26, %v1411_v38 }
0x11fa   :  { %v1416_v51 = vpop.f32.mrb[36].mxu0 }
0x11fb   :  { %v1417_v39 = vadd.f32 %v1416_v51, %v1303_v59  ;;  %v1418_v14 = vpop.f32.mrb[37].mxu0 }
0x11fc   :  { %v1419_v52 = vadd.f32 %v1418_v14, %v1307_v18  ;;  %v1420_v54 = vpop.f32.mrb[38].mxu0 }
0x11fd   :  { %v1421_v55 = vadd.f32 %v1420_v54, %v1303_v59  ;;  %v1422_v35 = vpop.f32.mrb[39].mxu0 }
0x11fe   :  { %v2383_v53 = vpack.c.bf16 %v1419_v52, %v1417_v39  ;;  %v1423_v56 = vadd.f32 %v1422_v35, %v1307_v18 }
0x1200   :  { %v2384_v57 = vpack.c.bf16 %v1423_v56, %v1421_v55  ;;  %v3410_v61 = vsel %vm3028_vm3, %v2382_v29, %v2383_v53  ;;  %v3414_v62 = vsel %vm3028_vm3, %v2383_v53, %v2382_v29 }
0x1201   :  { %v1859_v41 = vunpack.c.l.bf16 %v3410_v61  ;;  %v1945_v19 = vunpack.c.l.bf16 %v3414_v62 }
0x1202   :  { %v1426_v3 = vpop.f32.mrb[40].mxu0  ;;  %v3418_v4 = vsel %vm3028_vm3, %v2381_v50, %v2384_v57  ;;  %v3422_v36 = vsel %vm3028_vm3, %v2384_v57, %v2381_v50 }
0x1203   :  { %v1427_v7 = vadd.f32 %v1426_v3, %v1303_v59  ;;  %v1428_v5 = vpop.f32.mrb[41].mxu0  ;;  %v1771_v49 = vunpack.c.l.bf16 %v3418_v4  ;;  %v2031_v13 = vunpack.c.l.bf16 %v3422_v36 }
0x1204   :  { %v1429_v6 = vadd.f32 %v1428_v5, %v1307_v18  ;;  %v1430_v9 = vpop.f32.mrb[42].mxu0 }
0x1205   :  { %v1431_v24 = vadd.f32 %v1430_v9, %v1303_v59  ;;  %v1432_v8 = vpop.f32.mrb[43].mxu0 }
0x1206   :  { %v2385_v21 = vpack.c.bf16 %v1429_v6, %v1427_v7  ;;  %v1433_v22 = vadd.f32 %v1432_v8, %v1307_v18 }
0x1208   :  { %v2386_v33 = vpack.c.bf16 %v1433_v22, %v1431_v24  ;;  %v1637_v34 = vsel %vm3028_vm3, %v2380_v43, %v2385_v21  ;;  %v3428_v37 = vsel %vm3028_vm3, %v2385_v21, %v2380_v43 }
0x1209   :  { %v1683_v60 = vunpack.c.l.bf16 %v1637_v34  ;;  %v1684_v57 = vunpack.c.h.bf16 %v1637_v34 }
0x120a   :  { %v1517_v32 = vsel %vm3028_vm3, %v2379_v30, %v2386_v33  ;;  %v3434_v44 = vsel %vm3028_vm3, %v2386_v33, %v2379_v30 }
0x120b   :  { %v1599_v45 = vunpack.c.l.bf16 %v1517_v32  ;;  %v1600_v59 = vunpack.c.h.bf16 %v1517_v32 }
0x120d   :  { %v1601_v47 = vadd.f32 %v1599_v45, %v1592_v48  ;;  %v1602_v42 = vadd.f32 %v1600_v59, %v1594_v40 }
0x120f   :  { %v2348_v18 = vmul.f32 -1.442695, %v1601_v47  ;;  %v2349_v26 = vmul.f32 -1.442695, %v1602_v42 }
0x1211   :  { %2560 = vpow2.f32 %v2348_v18 }
0x1212   :  { %2562 = vtanh.f32 %v1602_v42 }
0x121b   :  { %v2561_v31 = vpop.eup %2560 }
0x121c   :  { %v1609_v38 = vadd.f32 1.0, %v2561_v31  ;;  %v2563_v27 = vpop.eup %2562 }
0x121e   :  { %2564 = vrcp.f32 %v1609_v38 }
0x121f   :  { %2566 = vpow2.f32 %v2349_v26 }
0x1228   :  { %v2565_v43 = vpop.eup %2564 }
0x1229   :  { %v1617_v50 = vmul.f32 %v2565_v43, %v2563_v27  ;;  %v2567_v2 = vpop.eup %2566  ;;  %v1616_v29 = vmul.f32 0.0, %v2565_v43 }
0x122a   :  { %v1610_v30 = vadd.f32 1.0, %v2567_v2 }
0x122b   :  { %1619 = vrot.lane.b32.xlu1 %v1617_v50, %s2804_s3 }
0x122c   :  { %2568 = vrcp.f32 %v1610_v30 }
0x1236   :  { %v2569_v48 = vpop.eup %2568 }
0x129d   :  { %v1620_v51 = vpop.permute.xlu1 %1619 }
0x129e   :  { %v1622_v39 = vadd.f32 %v1620_v51, %v1616_v29 }
0x12a0   :  { %2570 = vtanh.f32 %v1622_v39  ;;  %1631 = vrot.lane.b32.xlu1 %v1622_v39, %s2804_s3  ;;  %v1772_v39 = vunpack.c.h.bf16 %v3418_v4 }
0x12aa   :  { %v2571_v40 = vpop.eup %2570 }
0x12ab   :  { %v1624_v14 = vmul.f32 %v2571_v40, %v2569_v48 }
0x12ad   :  { %1626 = vrot.lane.b32.xlu0 %v1624_v14, %s2804_s3 }
0x1312   :  { %v1632_v52 = vpop.permute.xlu1 %1631 }
0x1313   :  { %v1634_v54 = vsel %vm470_vm5, %v1632_v52, 0.0 }
0x1314   :  { %1701 = vrot.lane.b32.xlu1 %v1634_v54, %s2804_s3 }
0x131f   :  { %v1627_v55 = vpop.permute.xlu0 %1626 }
0x1320   :  { %v1629_v35 = vsel %vm470_vm5, %v1627_v55, 0.0 }
0x1321   :  { %v1638_v53 = vpack.c.bf16 %v1629_v35, %v1629_v35 }
0x1323   :  { %2350 = vmatmul.mubr.msk.bf16.vlgmr.msra.gmra.mrb[24].mxu1 %vm395_vm7, %v1638_v53 }
0x1324   :  { %1819 = vmatpush1.bf16.msra.mxu1 %v3339_v10  ;;  %1850 = vmatprep.mubr.bf16.mxu1 %v2803_v0 }
0x1325   :  { %1820 = vmatprep.subr.bf16.mxu1 %v3342_v12 }
0x1328   :  { %1821 = vmatpush1.bf16.msra.mxu1 %v3344_v15 }
0x1329   :  { %1822 = vmatprep.subr.bf16.mxu1 %v3346_v25 }
0x132c   :  { %1823 = vmatpush1.bf16.msra.mxu1 %v3351_v17 }
0x132d   :  { %1824 = vmatprep.subr.bf16.mxu1 %v3354_v28 }
0x1330   :  { %1825 = vmatpush1.bf16.msra.mxu1 %v3356_v20 }
0x1331   :  { %1990 = vmatprep.subr.bf16.mxu1 %v3335_v23 }
0x1386   :  { %v1702_v34 = vpop.permute.xlu1 %1701 }
0x13f6   :  { %v1676_v56 = vpop.f32.mrb[24].mxu1 }
0x13f7   :  { %v1685_v3 = vadd.f32 %v1683_v60, %v1676_v56  ;;  %v1678_v7 = vpop.f32.mrb[25].mxu1 }
0x13f8   :  { %v1686_v5 = vadd.f32 %v1684_v57, %v1678_v7  ;;  %v1680_v6 = vpop.f32.mrb[26].mxu1 }
0x13f9   :  { %v2351_v9 = vmul.f32 -1.442695, %v1685_v3  ;;  %v1681_v24 = vpop.f32.mrb[27].mxu1 }
0x13fa   :  { %v2352_v45 = vmul.f32 -1.442695, %v1686_v5 }
0x13fb   :  { %2572 = vpow2.f32 %v2351_v9 }
0x13fc   :  { %2574 = vtanh.f32 %v1686_v5 }
0x1405   :  { %v2573_v8 = vpop.eup %2572 }
0x1406   :  { %v1693_v21 = vadd.f32 1.0, %v2573_v8  ;;  %v2575_v22 = vpop.eup %2574 }
0x1408   :  { %2576 = vrcp.f32 %v1693_v21 }
0x1409   :  { %2578 = vpow2.f32 %v2352_v45 }
0x1412   :  { %v2577_v33 = vpop.eup %2576 }
0x1413   :  { %v1705_v32 = vmul.f32 %v2577_v33, %v2575_v22  ;;  %v2579_v59 = vpop.eup %2578  ;;  %v1704_v42 = vmul.f32 %v2577_v33, %v1702_v34 }
0x1414   :  { %v1694_v47 = vadd.f32 1.0, %v2579_v59 }
0x1415   :  { %1707 = vrot.lane.b32.xlu0 %v1705_v32, %s2804_s3 }
0x1416   :  { %2580 = vrcp.f32 %v1694_v47 }
0x1420   :  { %v2581_v38 = vpop.eup %2580 }
0x1487   :  { %v1708_v18 = vpop.permute.xlu0 %1707 }
0x1488   :  { %v1710_v31 = vadd.f32 %v1708_v18, %v1704_v42  ;;  %v1860_v42 = vunpack.c.h.bf16 %v3410_v61 }
0x148a   :  { %2582 = vtanh.f32 %v1710_v31  ;;  %1719 = vrot.lane.b32.xlu0 %v1710_v31, %s2804_s3 }
0x1494   :  { %v2583_v27 = vpop.eup %2582 }
0x1495   :  { %v1712_v43 = vmul.f32 %v2583_v27, %v2581_v38 }
0x1497   :  { %1714 = vrot.lane.b32.xlu1 %v1712_v43, %s2804_s3 }
0x14fc   :  { %v1720_v50 = vpop.permute.xlu0 %1719 }
0x14fd   :  { %v1722_v26 = vsel %vm3104_vm8, %v1720_v50, %v1634_v54 }
0x14fe   :  { %1789 = vrot.lane.b32.xlu1 %v1722_v26, %s2804_s3 }
0x1509   :  { %v1715_v2 = vpop.permute.xlu1 %1714 }
0x150a   :  { %v1717_v30 = vsel %vm3104_vm8, %v1715_v2, %v1629_v35 }
0x150b   :  { %v1726_v29 = vpack.c.bf16 %v1717_v30, %v1717_v30 }
0x150d   :  { %2353 = vmatmul.mubr.msk.bf16.vlgmr.msra.gmra.mrb[44].mxu0 %vm395_vm7, %v1726_v29 }
0x150e   :  { %1905 = vmatpush1.bf16.msra.mxu0 %v3339_v10  ;;  %1936 = vmatprep.mubr.bf16.mxu0 %v2803_v0 }
0x150f   :  { %1906 = vmatprep.subr.bf16.mxu0 %v3342_v12 }
0x1512   :  { %1907 = vmatpush1.bf16.msra.mxu0 %v3344_v15 }
0x1513   :  { %1908 = vmatprep.subr.bf16.mxu0 %v3346_v25 }
0x1516   :  { %1909 = vmatpush1.bf16.msra.mxu0 %v3351_v17 }
0x1517   :  { %1910 = vmatprep.subr.bf16.mxu0 %v3354_v28 }
0x151a   :  { %1911 = vmatpush1.bf16.msra.mxu0 %v3356_v20 }
0x151b   :  { %2076 = vmatprep.subr.bf16.mxu0 %v3335_v23 }
0x1570   :  { %v1790_v4 = vpop.permute.xlu1 %1789 }
0x15e0   :  { %v1764_v51 = vpop.f32.mrb[44].mxu0 }
0x15e1   :  { %v1773_v48 = vadd.f32 %v1771_v49, %v1764_v51  ;;  %v1766_v40 = vpop.f32.mrb[45].mxu0 }
0x15e2   :  { %v1774_v14 = vadd.f32 %v1772_v39, %v1766_v40  ;;  %v1768_v52 = vpop.f32.mrb[46].mxu0 }
0x15e3   :  { %v2354_v54 = vmul.f32 -1.442695, %v1773_v48  ;;  %v1769_v55 = vpop.f32.mrb[47].mxu0 }
0x15e4   :  { %v2355_v3 = vmul.f32 -1.442695, %v1774_v14 }
0x15e5   :  { %2584 = vpow2.f32 %v2354_v54 }
0x15e6   :  { %2586 = vtanh.f32 %v1774_v14 }
0x15ef   :  { %v2585_v35 = vpop.eup %2584 }
0x15f0   :  { %v1781_v53 = vadd.f32 1.0, %v2585_v35  ;;  %v2587_v60 = vpop.eup %2586 }
0x15f2   :  { %2588 = vrcp.f32 %v1781_v53 }
0x15f3   :  { %2590 = vpow2.f32 %v2355_v3 }
0x15fc   :  { %v2589_v56 = vpop.eup %2588 }
0x15fd   :  { %v1793_v57 = vmul.f32 %v2589_v56, %v2587_v60  ;;  %v2591_v7 = vpop.eup %2590  ;;  %v1792_v6 = vmul.f32 %v2589_v56, %v1790_v4 }
0x15fe   :  { %v1782_v5 = vadd.f32 1.0, %v2591_v7  ;;  %v1946_v7 = vunpack.c.h.bf16 %v3414_v62 }
0x15ff   :  { %1795 = vrot.lane.b32.xlu0 %v1793_v57, %s2804_s3 }
0x1600   :  { %2592 = vrcp.f32 %v1782_v5 }
0x160a   :  { %v2593_v8 = vpop.eup %2592 }
0x1671   :  { %v1796_v9 = vpop.permute.xlu0 %1795 }
0x1672   :  { %v1798_v24 = vadd.f32 %v1796_v9, %v1792_v6 }
0x1674   :  { %2594 = vtanh.f32 %v1798_v24  ;;  %1807 = vrot.lane.b32.xlu0 %v1798_v24, %s2804_s3 }
0x167e   :  { %v2595_v21 = vpop.eup %2594 }
0x167f   :  { %v1800_v22 = vmul.f32 %v2595_v21, %v2593_v8 }
0x1681   :  { %1802 = vrot.lane.b32.xlu1 %v1800_v22, %s2804_s3 }
0x16e6   :  { %v1808_v33 = vpop.permute.xlu0 %1807 }
0x16e7   :  { %v1810_v32 = vsel %vm3135_vm9, %v1808_v33, %v1722_v26 }
0x16e8   :  { %1877 = vrot.lane.b32.xlu1 %v1810_v32, %s2804_s3 }
0x16f3   :  { %v1803_v45 = vpop.permute.xlu1 %1802 }
0x16f4   :  { %v1805_v59 = vsel %vm3135_vm9, %v1803_v45, %v1717_v30 }
0x16f5   :  { %v1814_v34 = vpack.c.bf16 %v1805_v59, %v1805_v59 }
0x16f7   :  { %2356 = vmatmul.mubr.msk.bf16.vlgmr.msra.gmra.mrb[28].mxu1 %vm395_vm7, %v1814_v34 }
0x16f8   :  { %1991 = vmatpush1.bf16.msra.mxu1 %v3339_v10  ;;  %2022 = vmatprep.mubr.bf16.mxu1 %v2803_v0 }
0x16f9   :  { %1992 = vmatprep.subr.bf16.mxu1 %v3342_v12 }
0x16fc   :  { %1993 = vmatpush1.bf16.msra.mxu1 %v3344_v15 }
0x16fd   :  { %1994 = vmatprep.subr.bf16.mxu1 %v3346_v25 }
0x1700   :  { %1995 = vmatpush1.bf16.msra.mxu1 %v3351_v17 }
0x1701   :  { %1996 = vmatprep.subr.bf16.mxu1 %v3354_v28 }
0x1704   :  { %1997 = vmatpush1.bf16.msra.mxu1 %v3356_v20 }
0x1705   :  { %2162 = vmatprep.subr.bf16.mxu1 %v3335_v23 }
0x175a   :  { %v1878_v61 = vpop.permute.xlu1 %1877 }
0x17ca   :  { %v1852_v47 = vpop.f32.mrb[28].mxu1 }
0x17cb   :  { %v1861_v18 = vadd.f32 %v1859_v41, %v1852_v47  ;;  %v1854_v31 = vpop.f32.mrb[29].mxu1 }
0x17cc   :  { %v1862_v38 = vadd.f32 %v1860_v42, %v1854_v31  ;;  %v1856_v27 = vpop.f32.mrb[30].mxu1 }
0x17cd   :  { %v2357_v43 = vmul.f32 -1.442695, %v1861_v18  ;;  %v1857_v50 = vpop.f32.mrb[31].mxu1 }
0x17ce   :  { %v2358_v23 = vmul.f32 -1.442695, %v1862_v38 }
0x17cf   :  { %2596 = vpow2.f32 %v2357_v43 }
0x17d0   :  { %2598 = vtanh.f32 %v1862_v38 }
0x17d9   :  { %v2597_v26 = vpop.eup %2596 }
0x17da   :  { %v1869_v2 = vadd.f32 1.0, %v2597_v26  ;;  %v2599_v30 = vpop.eup %2598 }
0x17dc   :  { %2600 = vrcp.f32 %v1869_v2 }
0x17dd   :  { %2602 = vpow2.f32 %v2358_v23 }
0x17e6   :  { %v2601_v29 = vpop.eup %2600 }
0x17e7   :  { %v1881_v49 = vmul.f32 %v2601_v29, %v2599_v30  ;;  %v2603_v51 = vpop.eup %2602  ;;  %v1880_v48 = vmul.f32 %v2601_v29, %v1878_v61 }
0x17e8   :  { %v1870_v39 = vadd.f32 1.0, %v2603_v51 }
0x17e9   :  { %1883 = vrot.lane.b32.xlu0 %v1881_v49, %s2804_s3  ;;  %v2032_v49 = vunpack.c.h.bf16 %v3422_v36 }
0x17ea   :  { %2604 = vrcp.f32 %v1870_v39 }
0x17f4   :  { %v2605_v52 = vpop.eup %2604 }
0x185b   :  { %v1884_v40 = vpop.permute.xlu0 %1883 }
0x185c   :  { %v1886_v14 = vadd.f32 %v1884_v40, %v1880_v48 }
0x185e   :  { %2606 = vtanh.f32 %v1886_v14  ;;  %1895 = vrot.lane.b32.xlu0 %v1886_v14, %s2804_s3 }
0x1868   :  { %v2607_v54 = vpop.eup %2606 }
0x1869   :  { %v1888_v55 = vmul.f32 %v2607_v54, %v2605_v52 }
0x186b   :  { %1890 = vrot.lane.b32.xlu1 %v1888_v55, %s2804_s3 }
0x18d0   :  { %v1896_v35 = vpop.permute.xlu0 %1895 }
0x18d1   :  { %v1898_v53 = vsel %vm3166_vm10, %v1896_v35, %v1810_v32 }
0x18d2   :  { %1963 = vrot.lane.b32.xlu1 %v1898_v53, %s2804_s3 }
0x18dd   :  { %v1891_v60 = vpop.permute.xlu1 %1890 }
0x18de   :  { %v1893_v56 = vsel %vm3166_vm10, %v1891_v60, %v1805_v59 }
0x18df   :  { %v1900_v57 = vpack.c.bf16 %v1893_v56, %v1893_v56 }
0x18e1   :  { %2359 = vmatmul.mubr.msk.bf16.vlgmr.msra.gmra.mrb[48].mxu0 %vm395_vm7, %v1900_v57 }
0x18e2   :  { %2077 = vmatpush1.bf16.msra.mxu0 %v3339_v10  ;;  %2108 = vmatprep.mubr.bf16.mxu0 %v2803_v0 }
0x18e3   :  { %2078 = vmatprep.subr.bf16.mxu0 %v3342_v12 }
0x18e6   :  { %2079 = vmatpush1.bf16.msra.mxu0 %v3344_v15 }
0x18e7   :  { %2080 = vmatprep.subr.bf16.mxu0 %v3346_v25 }
0x18ea   :  { %2081 = vmatpush1.bf16.msra.mxu0 %v3351_v17 }
0x18eb   :  { %2082 = vmatprep.subr.bf16.mxu0 %v3354_v28 }
0x18ee   :  { %2083 = vmatpush1.bf16.msra.mxu0 %v3356_v20 }
0x1944   :  { %v1964_v62 = vpop.permute.xlu1 %1963 }
0x19b4   :  { %v1938_v3 = vpop.f32.mrb[48].mxu0 }
0x19b5   :  { %v1947_v4 = vadd.f32 %v1945_v19, %v1938_v3  ;;  %v1940_v5 = vpop.f32.mrb[49].mxu0 }
0x19b6   :  { %v1948_v6 = vadd.f32 %v1946_v7, %v1940_v5  ;;  %v1942_v9 = vpop.f32.mrb[50].mxu0  ;;  %v2117_v7 = vunpack.c.l.bf16 %v3428_v37  ;;  %v2118_v5 = vunpack.c.h.bf16 %v3428_v37 }
0x19b7   :  { %v2360_v24 = vmul.f32 -1.442695, %v1947_v4  ;;  %v1943_v8 = vpop.f32.mrb[51].mxu0 }
0x19b8   :  { %v2361_v59 = vmul.f32 -1.442695, %v1948_v6 }
0x19b9   :  { %2608 = vpow2.f32 %v2360_v24 }
0x19ba   :  { %2610 = vtanh.f32 %v1948_v6 }
0x19c3   :  { %v2609_v21 = vpop.eup %2608 }
0x19c4   :  { %v1955_v22 = vadd.f32 1.0, %v2609_v21  ;;  %v2611_v33 = vpop.eup %2610 }
0x19c6   :  { %2612 = vrcp.f32 %v1955_v22 }
0x19c7   :  { %2614 = vpow2.f32 %v2361_v59 }
0x19d0   :  { %v2613_v32 = vpop.eup %2612 }
0x19d1   :  { %v1967_v45 = vmul.f32 %v2613_v32, %v2611_v33  ;;  %v2615_v34 = vpop.eup %2614  ;;  %v1966_v47 = vmul.f32 %v2613_v32, %v1964_v62 }
0x19d2   :  { %v1956_v41 = vadd.f32 1.0, %v2615_v34 }
0x19d3   :  { %1969 = vrot.lane.b32.xlu0 %v1967_v45, %s2804_s3 }
0x19d4   :  { %2616 = vrcp.f32 %v1956_v41 }
0x19de   :  { %v2617_v31 = vpop.eup %2616 }
0x1a45   :  { %v1970_v42 = vpop.permute.xlu0 %1969 }
0x1a46   :  { %v1972_v18 = vadd.f32 %v1970_v42, %v1966_v47 }
0x1a48   :  { %2618 = vtanh.f32 %v1972_v18  ;;  %1981 = vrot.lane.b32.xlu0 %v1972_v18, %s2804_s3 }
0x1a52   :  { %v2619_v38 = vpop.eup %2618 }
0x1a53   :  { %v1974_v27 = vmul.f32 %v2619_v38, %v2617_v31 }
0x1a55   :  { %1976 = vrot.lane.b32.xlu1 %v1974_v27, %s2804_s3 }
0x1aba   :  { %v1982_v43 = vpop.permute.xlu0 %1981 }
0x1abb   :  { %v1984_v50 = vsel %vm3196_vm11, %v1982_v43, %v1898_v53 }
0x1abc   :  { %2049 = vrot.lane.b32.xlu1 %v1984_v50, %s2804_s3 }
0x1ac7   :  { %v1977_v26 = vpop.permute.xlu1 %1976 }
0x1ac8   :  { %v1979_v2 = vsel %vm3196_vm11, %v1977_v26, %v1893_v56 }
0x1ac9   :  { %v1986_v30 = vpack.c.bf16 %v1979_v2, %v1979_v2 }
0x1acb   :  { %2362 = vmatmul.mubr.msk.bf16.vlgmr.msra.gmra.mrb[32].mxu1 %vm395_vm7, %v1986_v30 }
0x1acc   :  { %2163 = vmatpush1.bf16.msra.mxu1 %v3339_v10  ;;  %2194 = vmatprep.mubr.bf16.mxu1 %v2803_v0 }
0x1acd   :  { %2164 = vmatprep.subr.bf16.mxu1 %v3342_v12 }
0x1ad0   :  { %2165 = vmatpush1.bf16.msra.mxu1 %v3344_v15 }
0x1ad1   :  { %2166 = vmatprep.subr.bf16.mxu1 %v3346_v25 }
0x1ad4   :  { %2167 = vmatpush1.bf16.msra.mxu1 %v3351_v17 }
0x1ad5   :  { %2168 = vmatprep.subr.bf16.mxu1 %v3354_v28 }
0x1ad8   :  { %2169 = vmatpush1.bf16.msra.mxu1 %v3356_v20 }
0x1b2e   :  { %v2050_v36 = vpop.permute.xlu1 %2049 }
0x1b9e   :  { %v2024_v29 = vpop.f32.mrb[32].mxu1 }
0x1b9f   :  { %v2033_v10 = vadd.f32 %v2031_v13, %v2024_v29  ;;  %v2026_v23 = vpop.f32.mrb[33].mxu1  ;;  %v2203_v13 = vunpack.c.l.bf16 %v3434_v44 }
0x1ba0   :  { %v2034_v0 = vadd.f32 %v2032_v49, %v2026_v23  ;;  %v2028_v51 = vpop.f32.mrb[34].mxu1  ;;  %v2204_v49 = vunpack.c.h.bf16 %v3434_v44 }
0x1ba1   :  { %v2363_v12 = vmul.f32 -1.442695, %v2033_v10  ;;  %v2029_v61 = vpop.f32.mrb[35].mxu1 }
0x1ba2   :  { %v2364_v20 = vmul.f32 -1.442695, %v2034_v0 }
0x1ba3   :  { %2620 = vpow2.f32 %v2363_v12 }
0x1ba4   :  { %2622 = vtanh.f32 %v2034_v0 }
0x1bad   :  { %v2621_v15 = vpop.eup %2620 }
0x1bae   :  { %v2041_v25 = vadd.f32 1.0, %v2621_v15  ;;  %v2623_v17 = vpop.eup %2622 }
0x1bb0   :  { %2624 = vrcp.f32 %v2041_v25 }
0x1bb1   :  { %2626 = vpow2.f32 %v2364_v20 }
0x1bba   :  { %v2625_v28 = vpop.eup %2624 }
0x1bbb   :  { %v2053_v39 = vmul.f32 %v2625_v28, %v2623_v17  ;;  %v2627_v48 = vpop.eup %2626  ;;  %v2052_v14 = vmul.f32 %v2625_v28, %v2050_v36 }
0x1bbc   :  { %v2042_v40 = vadd.f32 1.0, %v2627_v48 }
0x1bbd   :  { %2055 = vrot.lane.b32.xlu0 %v2053_v39, %s2804_s3 }
0x1bbe   :  { %2628 = vrcp.f32 %v2042_v40 }
0x1bc8   :  { %v2629_v55 = vpop.eup %2628 }
0x1c2f   :  { %v2056_v52 = vpop.permute.xlu0 %2055 }
0x1c30   :  { %v2058_v54 = vadd.f32 %v2056_v52, %v2052_v14 }
0x1c32   :  { %2630 = vtanh.f32 %v2058_v54  ;;  %2067 = vrot.lane.b32.xlu0 %v2058_v54, %s2804_s3 }
0x1c3c   :  { %v2631_v35 = vpop.eup %2630 }
0x1c3d   :  { %v2060_v53 = vmul.f32 %v2631_v35, %v2629_v55  ;;  %v1139_v35 = vsel %vm1134_vm14, %v3282_v1, %v3258_v16 }
0x1c3f   :  { %2062 = vrot.lane.b32.xlu1 %v2060_v53, %s2804_s3 }
0x1ca4   :  { %v2068_v60 = vpop.permute.xlu0 %2067 }
0x1ca5   :  { %v2070_v56 = vsel %vm3226_vm12, %v2068_v60, %v1984_v50 }
0x1ca6   :  { %2135 = vrot.lane.b32.xlu1 %v2070_v56, %s2804_s3 }
0x1cb1   :  { %v2063_v57 = vpop.permute.xlu1 %2062 }
0x1cb2   :  { %v2065_v19 = vsel %vm3226_vm12, %v2063_v57, %v1979_v2 }
0x1cb3   :  { %v2072_v3 = vpack.c.bf16 %v2065_v19, %v2065_v19 }
0x1cb5   :  { %2365 = vmatmul.mubr.msk.bf16.vlgmr.msra.gmra.mrb[52].mxu0 %vm395_vm7, %v2072_v3 }
0x1d18   :  { %v2136_v37 = vpop.permute.xlu1 %2135 }
0x1d88   :  { %v2110_v4 = vpop.f32.mrb[52].mxu0 }
0x1d89   :  { %v2119_v6 = vadd.f32 %v2117_v7, %v2110_v4  ;;  %v2112_v9 = vpop.f32.mrb[53].mxu0 }
0x1d8a   :  { %v2120_v24 = vadd.f32 %v2118_v5, %v2112_v9  ;;  %v2114_v8 = vpop.f32.mrb[54].mxu0 }
0x1d8b   :  { %v2366_v21 = vmul.f32 -1.442695, %v2119_v6  ;;  %v2115_v22 = vpop.f32.mrb[55].mxu0 }
0x1d8c   :  { %v2367_v34 = vmul.f32 -1.442695, %v2120_v24 }
0x1d8d   :  { %2632 = vpow2.f32 %v2366_v21 }
0x1d8e   :  { %2634 = vtanh.f32 %v2120_v24 }
0x1d97   :  { %v2633_v33 = vpop.eup %2632 }
0x1d98   :  { %v2127_v32 = vadd.f32 1.0, %v2633_v33  ;;  %v2635_v46 = vpop.eup %2634 }
0x1d9a   :  { %2636 = vrcp.f32 %v2127_v32 }
0x1d9b   :  { %2638 = vpow2.f32 %v2367_v34 }
0x1da4   :  { %v2637_v45 = vpop.eup %2636 }
0x1da5   :  { %v2139_v59 = vmul.f32 %v2637_v45, %v2635_v46  ;;  %v2639_v62 = vpop.eup %2638  ;;  %v2138_v47 = vmul.f32 %v2637_v45, %v2136_v37 }
0x1da6   :  { %v2128_v41 = vadd.f32 1.0, %v2639_v62 }
0x1da7   :  { %2141 = vrot.lane.b32.xlu0 %v2139_v59, %s2804_s3 }
0x1da8   :  { %2640 = vrcp.f32 %v2128_v41 }
0x1db2   :  { %v2641_v31 = vpop.eup %2640 }
0x1e19   :  { %v2142_v42 = vpop.permute.xlu0 %2141 }
0x1e1a   :  { %v2144_v18 = vadd.f32 %v2142_v42, %v2138_v47 }
0x1e1c   :  { %2642 = vtanh.f32 %v2144_v18  ;;  %2153 = vrot.lane.b32.xlu0 %v2144_v18, %s2804_s3 }
0x1e26   :  { %v2643_v38 = vpop.eup %2642 }
0x1e27   :  { %v2146_v27 = vmul.f32 %v2643_v38, %v2641_v31 }
0x1e29   :  { %2148 = vrot.lane.b32.xlu1 %v2146_v27, %s2804_s3 }
0x1e8e   :  { %v2154_v43 = vpop.permute.xlu0 %2153 }
0x1e8f   :  { %v2156_v50 = vsel %vm3249_vm13, %v2154_v43, %v2070_v56 }
0x1e90   :  { %2221 = vrot.lane.b32.xlu1 %v2156_v50, %s2804_s3 }
0x1e9b   :  { %v2149_v26 = vpop.permute.xlu1 %2148 }
0x1e9c   :  { %v2151_v2 = vsel %vm3249_vm13, %v2149_v26, %v2065_v19 }
0x1e9d   :  { %v2158_v30 = vpack.c.bf16 %v2151_v2, %v2151_v2 }
0x1e9f   :  { %2368 = vmatmul.mubr.msk.bf16.vlgmr.msra.gmra.mrb[36].mxu1 %vm395_vm7, %v2158_v30 }
0x1f02   :  { %v2222_v44 = vpop.permute.xlu1 %2221 }
0x1f72   :  { %v2196_v29 = vpop.f32.mrb[36].mxu1 }
0x1f73   :  { %v2205_v10 = vadd.f32 %v2203_v13, %v2196_v29  ;;  %v2198_v23 = vpop.f32.mrb[37].mxu1 }
0x1f74   :  { %v2206_v0 = vadd.f32 %v2204_v49, %v2198_v23  ;;  %v2200_v51 = vpop.f32.mrb[38].mxu1 }
0x1f75   :  { %v2369_v12 = vmul.f32 -1.442695, %v2205_v10  ;;  %v2201_v61 = vpop.f32.mrb[39].mxu1 }
0x1f76   :  { %v2370_v39 = vmul.f32 -1.442695, %v2206_v0 }
0x1f77   :  { %2644 = vpow2.f32 %v2369_v12 }
0x1f78   :  { %2646 = vtanh.f32 %v2206_v0 }
0x1f81   :  { %v2645_v15 = vpop.eup %2644 }
0x1f82   :  { %v2213_v25 = vadd.f32 1.0, %v2645_v15  ;;  %v2647_v11 = vpop.eup %2646 }
0x1f84   :  { %2648 = vrcp.f32 %v2213_v25 }
0x1f85   :  { %2650 = vpow2.f32 %v2370_v39 }
0x1f8e   :  { %v2649_v17 = vpop.eup %2648 }
0x1f8f   :  { %v2225_v28 = vmul.f32 %v2649_v17, %v2647_v11  ;;  %v2651_v20 = vpop.eup %2650  ;;  %v2224_v36 = vmul.f32 %v2649_v17, %v2222_v44 }
0x1f90   :  { %v2214_v48 = vadd.f32 1.0, %v2651_v20 }
0x1f91   :  { %2227 = vrot.lane.b32.xlu0 %v2225_v28, %s2804_s3 }
0x1f92   :  { %2652 = vrcp.f32 %v2214_v48 }
0x1f9c   :  { %v2653_v52 = vpop.eup %2652 }
0x2003   :  { %v2228_v40 = vpop.permute.xlu0 %2227 }
0x2004   :  { %v2230_v14 = vadd.f32 %v2228_v40, %v2224_v36 }
0x2006   :  { %2654 = vtanh.f32 %v2230_v14 }
0x2010   :  { %v2655_v54 = vpop.eup %2654 }
0x2011   :  { %v2232_v55 = vmul.f32 %v2655_v54, %v2653_v52 }
0x2013   :  { %2234 = vrot.lane.b32.xlu1 %v2232_v55, %s2804_s3 }
0x2017   :  { %2243 = vrot.lane.b32.xlu1 %v1139_v35, %s2812_s8 }
0x2085   :  { %v2235_v53 = vpop.permute.xlu1 %2234 }
0x2086   :  { %v2237_v60 = vsel %vm1134_vm14, %v2235_v53, %v2151_v2 }
0x2087   :  { %2239 = vrot.lane.b32.xlu0 %v2237_v60, %s2812_s8 }
0x2089   :  { %v2244_v19 = vpop.permute.xlu1 %2243 }
0x208b   :  { %2246 = vrot.lane.b32.xlu0 %v2237_v60, %s2804_s3 }
0x20f9   :  { %v2240_v56 = vpop.permute.xlu0 %2239 }
0x20fa   :  { %v2249_v57 = vsel %vm184_vm0, %v1139_v35, %v2240_v56 }
0x20fb   :  { %v2250_v16 = vsel %vm395_vm7, %v2249_v57, %v2244_v19 }
0x20fd   :  { %v2247_v3 = vpop.permute.xlu0 %2246 }
0x20fe   :  { %v2252_v1 = vsel %vm2251_vm15, %v2250_v16, %v2247_v3 }
0x20ff   :  { %2253 = vst [vmem:[#allocation13] sm:$0xff] %v2252_v1 }
0x2100   :  { %2777 = shalt.err (!%p2774_p2)
}
0x2101   :  { %s2778_s20 = scalar_lea.hbm %s3591_s10, 128 }
0x2102   :  { %p2779_p3 = scmp.ne.s32.totalorder %s3591_s10, %s2778_s20  ;;  %p2782_p4 = scmp.lt.u32.totalorder %s2778_s20, %s3591_s10 }
0x2104   :  { %p2784_p5 = pnand %p2782_p4, %p2779_p3 }
0x2106   :  { %2787 = shalt.err (!%p2784_p5)
}
0x2107   :  { %2263 = dma.vmem_to_hbm [thread:$0]  %s2261_s14, 128, %s3591_s10, [#allocation6]  }
0x2108   :  { %2794 = dma.done.wait [#allocation6], 128  }
0x2109   :  { %2795 = vsyncadd [#allocation6], 4294967168 }
0x210a   :  { %2267 = vsyncpa [#allocation5], 1 }
0x210b   :  { %2268 = vsyncpa [#allocation8], 1 }
0x210c   :  { %2269 = vsyncpa [#allocation11], 1 }
0x210d   :  { %2270 = vsyncpa [#allocation6], 1 }

</bundles_post_ra>
